<compile_context>
chip_gen: v5e
topology: v5e:2x2
jax: 0.10.0
libtpu: 0.0.40
codegen_flags: <defaults>
</compile_context>

<pallas_src>
import functools

import jax
import jax.numpy as jnp
import numpy as np
from jax.experimental import pallas as pl
from jax.experimental.pallas import tpu as pltpu

_TM_MAX = 2048            # max rows of the im2col matrix per M tile
_A_TILE_BYTES = 4 << 20   # cap the bf16 A tile at 4 MiB (VMEM budget)
_LANES = 128
_EPS = 1e-5
_SLOPE = 0.2


def _round_up(x, m):
    return (x + m - 1) // m * m


# ----------------------------------------------------------------------------
# Kernel 1: single-K-step matmul (bf16 MXU inputs, f32 accumulation in
#           registers) with fused epilogue, written to o_ref exactly once.
#   mode == "bias"     : refs = a, b, bias, o          (bias + optional leaky)
#   mode == "bn_fused" : refs = a, b, gamma, beta, o   (whole M in one tile)
#   mode == "bn_split" : refs = a, b, o, sum, sq       (raw out + tile stats)
# ----------------------------------------------------------------------------
def conv_mm_kernel(*refs, mode, m_true, leaky):
    if mode == "bn_fused":
        a_ref, b_ref, gamma_ref, beta_ref, o_ref = refs
    elif mode == "bias":
        a_ref, b_ref, bias_ref, o_ref = refs
    else:  # "bn_split"
        a_ref, b_ref, o_ref, sum_ref, sq_ref = refs

    acc = jnp.dot(a_ref[...], b_ref[...], preferred_element_type=jnp.float32)

    if mode == "bn_split":
        # Raw conv output (bf16) + per-M-tile partial statistics.  Padded A
        # rows are all-zero and BN convs have no bias, so they do not disturb
        # the sums; 1/m_true is applied in the tiny host-side glue.
        o_ref[...] = acc.astype(o_ref.dtype)
        psum = acc.sum(axis=0, keepdims=True)            # (1, npad)
        psq = (acc * acc).sum(axis=0, keepdims=True)
        sum_ref[...] = jnp.broadcast_to(psum, sum_ref.shape)
        sq_ref[...] = jnp.broadcast_to(psq, sq_ref.shape)
        return

    if mode == "bn_fused":
        # Batch stats over the (single-tile) row axis; padded rows are zero.
        inv_m = jnp.float32(1.0 / m_true)
        mean = acc.sum(axis=0, keepdims=True) * inv_m
        var = (acc * acc).sum(axis=0, keepdims=True) * inv_m - mean * mean
        var = jnp.maximum(var, 0.0)
        scale = gamma_ref[...] * jax.lax.rsqrt(var + _EPS)
        acc = (acc - mean) * scale + beta_ref[...]
    else:  # "bias"
        acc = acc + bias_ref[...]
    if leaky:
        acc = jnp.where(acc >= 0.0, acc, _SLOPE * acc)
    o_ref[...] = acc.astype(o_ref.dtype)


# ----------------------------------------------------------------------------
# Kernel 2: scale-shift (+LeakyReLU) for the multi-tile BatchNorm path.
# ----------------------------------------------------------------------------
def scale_shift_kernel(x_ref, scale_ref, shift_ref, o_ref, *, leaky):
    y = x_ref[...].astype(jnp.float32) * scale_ref[...] + shift_ref[...]
    if leaky:
        y = jnp.where(y >= 0.0, y, _SLOPE * y)
    o_ref[...] = y.astype(o_ref.dtype)


# ----------------------------------------------------------------------------
# Glue: im2col patch extraction (pure JAX slicing/reshape).
# ----------------------------------------------------------------------------
def _im2col(x_nhwc, kh, kw, stride, pad):
    n, h, w, c = x_nhwc.shape
    xp = jnp.pad(x_nhwc, ((0, 0), (pad, pad), (pad, pad), (0, 0)))
    oh = (h + 2 * pad - kh) // stride + 1
    ow = (w + 2 * pad - kw) // stride + 1
    cols = []
    for dh in range(kh):
        for dw in range(kw):
            cols.append(xp[:, dh:dh + stride * oh:stride,
                           dw:dw + stride * ow:stride, :])
    patches = jnp.stack(cols, axis=3)                  # (N, OH, OW, kh*kw, C)
    return patches.reshape(n * oh * ow, kh * kw * c), oh, ow


def _pad_channel_vec(v, cout, npad):
    return jnp.pad(v.reshape(1, cout).astype(jnp.float32),
                   ((0, 0), (0, npad - cout)))


# ----------------------------------------------------------------------------
# One conv "layer" = im2col + single Pallas matmul with fused epilogue.
# ----------------------------------------------------------------------------
def conv_layer(x_nhwc, w_hwio, stride, *, mode, leaky,
               bias=None, gamma=None, beta=None,
               out_f32=False, tm_max=_TM_MAX):
    kh, kw, cin, cout = w_hwio.shape
    n = x_nhwc.shape[0]

    # Pad *input channels* to a multiple of 8 so K = kh*kw*cin is a multiple
    # of 128 -- no K padding (hence no pad copy) of the im2col matrix.
    cin_pad = _round_up(cin, 8)
    x_bf = x_nhwc.astype(jnp.bfloat16)
    if cin_pad != cin:
        x_bf = jnp.pad(x_bf, ((0, 0), (0, 0), (0, 0), (0, cin_pad - cin)))
        w_hwio = jnp.pad(w_hwio, ((0, 0), (0, 0), (0, cin_pad - cin), (0, 0)))

    # TODO(synk): replace this HBM-materialised im2col with an in-kernel
    #             16-tap shifted-window gather (dominant remaining traffic).
    a, oh, ow = _im2col(x_bf, kh, kw, stride, pad=1)     # (m, kp) bf16
    m, kp = a.shape
    npad = _round_up(cout, _LANES)

    # Single reduction step (tk == kp); cap the A tile at ~4 MiB so the whole
    # pipeline fits every generation's scoped-VMEM default with no flags.
    tm_cap = min(tm_max, _A_TILE_BYTES // (2 * kp))
    tm_cap = max(128, (tm_cap // 16) * 16)
    if m <= tm_cap:
        tm = _round_up(m, 16)            # bf16 sublane packing
        mp = tm
    else:
        tm = tm_cap
        mp = _round_up(m, tm)
    if mp != m:
        a = jnp.pad(a, ((0, mp - m), (0, 0)))            # zero rows (BN-safe)
    b = jnp.pad(w_hwio.reshape(kp, cout).astype(jnp.bfloat16),
                ((0, 0), (0, npad - cout)))
    grid_m = mp // tm
    out_dtype = jnp.float32 if out_f32 else jnp.bfloat16

    fused_bn = (mode == "bn") and (grid_m == 1)
    if mode == "bn" and not fused_bn:
        mm_mode, extras = "bn_split", []
        out_shape = (jax.ShapeDtypeStruct((mp, npad), out_dtype),
                     jax.ShapeDtypeStruct((grid_m * 8, npad), jnp.float32),
                     jax.ShapeDtypeStruct((grid_m * 8, npad), jnp.float32))
        out_specs = (pl.BlockSpec((tm, npad), lambda i: (i, 0)),
                     pl.BlockSpec((8, npad), lambda i: (i, 0)),
                     pl.BlockSpec((8, npad), lambda i: (i, 0)))
    elif mode == "bn":
        mm_mode = "bn_fused"
        extras = [_pad_channel_vec(gamma, cout, npad),
                  _pad_channel_vec(beta, cout, npad)]
        out_shape = jax.ShapeDtypeStruct((mp, npad), out_dtype)
        out_specs = pl.BlockSpec((tm, npad), lambda i: (i, 0))
    else:  # bias-only layer (no scale multiply, just the bias vector)
        mm_mode = "bias"
        extras = [_pad_channel_vec(bias, cout, npad)]
        out_shape = jax.ShapeDtypeStruct((mp, npad), out_dtype)
        out_specs = pl.BlockSpec((tm, npad), lambda i: (i, 0))

    kernel = functools.partial(conv_mm_kernel, mode=mm_mode, m_true=m,
                               leaky=leaky)
    result = pl.pallas_call(
        kernel,
        out_shape=out_shape,
        grid_spec=pltpu.PrefetchScalarGridSpec(
            num_scalar_prefetch=0,
            grid=(grid_m,),
            in_specs=[pl.BlockSpec((tm, kp), lambda i: (i, 0)),
                      pl.BlockSpec((kp, npad), lambda i: (0, 0))]
                     + [pl.BlockSpec((1, npad), lambda i: (0, 0))
                        for _ in extras],
            out_specs=out_specs,
        ),
        compiler_params=pltpu.CompilerParams(
            dimension_semantics=("parallel",)),
        cost_estimate=pl.CostEstimate(
            flops=2 * mp * kp * npad,
            transcendentals=0,
            bytes_accessed=(2 * mp * kp + 2 * kp * npad
                            + jnp.dtype(out_dtype).itemsize * mp * npad)),
    )(a, b, *extras)

    if mm_mode == "bn_split":
        conv_raw, psum, psq = result
        # Tiny per-channel glue: reduce the per-tile partials (row 0 of each
        # 8-row block holds the tile's sum), then one scale-shift pass.
        csum = psum[0::8, :].sum(axis=0, keepdims=True)
        csq = psq[0::8, :].sum(axis=0, keepdims=True)
        inv_m = 1.0 / m
        mean = csum * inv_m
        var = jnp.maximum(csq * inv_m - mean * mean, 0.0)
        gpad = _pad_channel_vec(gamma, cout, npad)
        bpad = _pad_channel_vec(beta, cout, npad)
        scale = gpad * jax.lax.rsqrt(var + _EPS)
        shift = bpad - mean * scale
        result = pl.pallas_call(
            functools.partial(scale_shift_kernel, leaky=leaky),
            out_shape=jax.ShapeDtypeStruct((mp, npad), out_dtype),
            grid_spec=pltpu.PrefetchScalarGridSpec(
                num_scalar_prefetch=0,
                grid=(grid_m,),
                in_specs=[pl.BlockSpec((tm, npad), lambda i: (i, 0)),
                          pl.BlockSpec((1, npad), lambda i: (0, 0)),
                          pl.BlockSpec((1, npad), lambda i: (0, 0))],
                out_specs=pl.BlockSpec((tm, npad), lambda i: (i, 0)),
            ),
            compiler_params=pltpu.CompilerParams(
                dimension_semantics=("parallel",)),
        )(conv_raw, scale, shift)

    return result[:m, :cout].reshape(n, oh, ow, cout)


# ----------------------------------------------------------------------------
# Parameter construction (deterministic) for NLayerDiscriminator.
# ----------------------------------------------------------------------------
def init_params(key, input_nc=3, ndf=16, n_layers=3):
    # channel plan: input_nc -> ndf -> 2ndf -> 4ndf -> 8ndf -> 1  (n_layers=3)
    chans = [input_nc, ndf]
    nf_mult = 1
    for n in range(1, n_layers):
        nf_mult = min(2 ** n, 8)
        chans.append(ndf * nf_mult)
    nf_mult = min(2 ** n_layers, 8)
    chans.append(ndf * nf_mult)
    chans.append(1)

    params = []
    for i in range(len(chans) - 1):
        cin, cout = chans[i], chans[i + 1]
        key, kw_, kb_, kg_, kbe_ = jax.random.split(key, 5)
        w = 0.05 * jax.random.normal(kw_, (4, 4, cin, cout), jnp.float32)
        is_first = (i == 0)
        is_last = (i == len(chans) - 2)
        if is_first or is_last:
            b = 0.05 * jax.random.normal(kb_, (cout,), jnp.float32)
            params.append(dict(kind="affine", w=w, bias=b,
                               stride=2 if is_first else 1,
                               leaky=not is_last))
        else:
            gamma = 1.0 + 0.1 * jax.random.normal(kg_, (cout,), jnp.float32)
            beta = 0.1 * jax.random.normal(kbe_, (cout,), jnp.float32)
            stride = 2 if i < n_layers else 1
            params.append(dict(kind="bn", w=w, gamma=gamma, beta=beta,
                               stride=stride, leaky=True))
    return params


# ----------------------------------------------------------------------------
# Full forward pass (Pallas) and pure-JAX reference.
# ----------------------------------------------------------------------------
def discriminator_forward(x_nchw, params, tm_max=_TM_MAX):
    x = jnp.transpose(x_nchw, (0, 2, 3, 1)).astype(jnp.bfloat16)   # -> NHWC
    for idx, p in enumerate(params):
        last = idx == len(params) - 1
        if p["kind"] == "affine":
            x = conv_layer(x, p["w"], p["stride"], mode="bias",
                           leaky=p["leaky"], bias=p["bias"],
                           out_f32=last, tm_max=tm_max)
        else:   # BatchNorm (train-mode batch stats, fresh PyTorch module)
            x = conv_layer(x, p["w"], p["stride"], mode="bn",
                           leaky=p["leaky"], gamma=p["gamma"], beta=p["beta"],
                           out_f32=False, tm_max=tm_max)
    return jnp.transpose(x, (0, 3, 1, 2)).astype(jnp.float32)      # -> NCHW


def discriminator_reference(x_nchw, params, bf16_inputs=False):
    """f32 reference.  bf16_inputs=True rounds conv inputs/weights to bf16
    (matching the kernel's MXU-input / bf16-activation quantization) but keeps
    f32 accumulation and f32 BN/bias/LeakyReLU."""
    def q(t):
        return t.astype(jnp.bfloat16).astype(jnp.float32) if bf16_inputs else t

    def conv(x, w_hwio, stride, bias=None):
        out = jax.lax.conv_general_dilated(
            q(x), q(w_hwio), window_strides=(stride, stride),
            padding=((1, 1), (1, 1)),
            dimension_numbers=("NCHW", "HWIO", "NCHW"),
            precision=jax.lax.Precision.HIGHEST)
        if bias is not None:
            out = out + bias.reshape(1, -1, 1, 1)
        return out

    def bn(x, gamma, beta, eps=_EPS):
        mean = x.mean(axis=(0, 2, 3), keepdims=True)
        var = x.var(axis=(0, 2, 3), keepdims=True)
        return ((x - mean) * jax.lax.rsqrt(var + eps)
                * gamma.reshape(1, -1, 1, 1) + beta.reshape(1, -1, 1, 1))

    def lrelu(x):
        return jnp.where(x >= 0.0, x, _SLOPE * x)

    x = x_nchw.astype(jnp.float32)
    for p in params:
        if p["kind"] == "affine":
            x = conv(x, p["w"], p["stride"], p["bias"])
            if p["leaky"]:
                x = lrelu(x)
        else:
            x = conv(x, p["w"], p["stride"], bias=None)
            x = bn(x, p["gamma"], p["beta"])
            x = lrelu(x)
    return x


if __name__ == "__main__":
    key = jax.random.PRNGKey(0)
    k_x, k_p, k_x2, k_x3 = jax.random.split(key, 4)

    params = init_params(k_p, input_nc=3, ndf=16, n_layers=3)
    fwd = jax.jit(lambda xx: discriminator_forward(xx, params))
    fwd_small_tiles = jax.jit(
        lambda xx: discriminator_forward(xx, params, tm_max=256))
    ref_f32 = jax.jit(lambda xx: discriminator_reference(xx, params, False))
    ref_bf16 = jax.jit(lambda xx: discriminator_reference(xx, params, True))

    # Case 1: small input (every layer fits a single M tile -> fused BN).
    x = jax.random.normal(k_x, (2, 3, 32, 32), jnp.float32)
    out = jax.block_until_ready(fwd(x))
    assert out.shape == (2, 1, 2, 2), out.shape
    np.testing.assert_allclose(np.asarray(out), np.asarray(ref_bf16(x)),
                               rtol=2e-2, atol=2e-2)
    # Loose tolerance vs the pure-f32 reference: MXU inputs/activations bf16.
    np.testing.assert_allclose(np.asarray(out), np.asarray(ref_f32(x)),
                               rtol=1e-1, atol=1e-1)

    # Case 2: larger input -- exercises multi-tile M ("parallel" grid) on the
    # first layer and the single-tile fused BN on the BN layers.
    x2 = jax.random.normal(k_x2, (2, 3, 128, 128), jnp.float32)
    out2 = jax.block_until_ready(fwd(x2))
    assert out2.shape == (2, 1, 14, 14), out2.shape
    np.testing.assert_allclose(np.asarray(out2), np.asarray(ref_bf16(x2)),
                               rtol=2e-2, atol=2e-2)
    np.testing.assert_allclose(np.asarray(out2), np.asarray(ref_f32(x2)),
                               rtol=1e-1, atol=1e-1)

    # Case 3: forced small M tiles -- exercises the multi-tile BN path
    # (per-tile partial stats emitted by the matmul + scale-shift kernel).
    x3 = jax.random.normal(k_x3, (2, 3, 64, 64), jnp.float32)
    out3 = jax.block_until_ready(fwd_small_tiles(x3))
    assert out3.shape == (2, 1, 6, 6), out3.shape
    np.testing.assert_allclose(np.asarray(out3), np.asarray(ref_bf16(x3)),
                               rtol=2e-2, atol=2e-2)

    print("KERNEL_OK")
</pallas_src>

<mosaic_0001>
module attributes {stable_mosaic.version = 11 : i64} {
  func.func @conv_mm_kernel(%arg0: i32, %arg1: memref<512x128xbf16, #tpu.memory_space<vmem>>, %arg2: memref<128x128xbf16, #tpu.memory_space<vmem>>, %arg3: memref<1x128xf32, #tpu.memory_space<vmem>>, %arg4: memref<512x128xbf16, #tpu.memory_space<vmem>>) attributes {dimension_semantics = [#tpu.dimension_semantics<parallel>], iteration_bounds = array<i64: 1>, scalar_prefetch = 0 : i64, scratch_operands = 0 : i64, tpu.core_type = #tpu.core_type<tc>, window_params = [{transform_indices = @transform_0, window_bounds = array<i64: 512, 128>}, {pipeline_mode = #tpu.pipeline_mode<synchronous>, transform_indices = @transform_1, window_bounds = array<i64: 128, 128>}, {pipeline_mode = #tpu.pipeline_mode<synchronous>, transform_indices = @transform_2, window_bounds = array<i64: 1, 128>}, {transform_indices = @transform_3, window_bounds = array<i64: 512, 128>}]} {
    %c0 = arith.constant 0 : index
    %c0_0 = arith.constant 0 : index
    %0 = vector.load %arg1[%c0, %c0_0] : memref<512x128xbf16, #tpu.memory_space<vmem>>, vector<512x128xbf16>
    %c0_1 = arith.constant 0 : index
    %c0_2 = arith.constant 0 : index
    %1 = vector.load %arg2[%c0_1, %c0_2] : memref<128x128xbf16, #tpu.memory_space<vmem>>, vector<128x128xbf16>
    %cst = arith.constant dense<0.000000e+00> : vector<512x128xf32>
    %2 = tpu.matmul %0, %1, %cst {dimension_numbers = #tpu.dot_dimension_numbers<[1], [0], [0], [1], [0, 0, 1, 1], [], []>} : vector<512x128xbf16>, vector<128x128xbf16>, vector<512x128xf32> -> vector<512x128xf32>
    %c0_3 = arith.constant 0 : index
    %c0_4 = arith.constant 0 : index
    %3 = vector.load %arg3[%c0_3, %c0_4] : memref<1x128xf32, #tpu.memory_space<vmem>>, vector<1x128xf32>
    %4 = vector.broadcast %3 : vector<1x128xf32> to vector<512x128xf32>
    %5 = arith.addf %2, %4 : vector<512x128xf32>
    %cst_5 = arith.constant 0.000000e+00 : f32
    %6 = vector.broadcast %cst_5 : f32 to vector<512x128xf32>
    %7 = arith.cmpf oge, %5, %6 : vector<512x128xf32>
    %cst_6 = arith.constant 2.000000e-01 : f32
    %8 = vector.broadcast %cst_6 : f32 to vector<512x128xf32>
    %9 = arith.mulf %8, %5 : vector<512x128xf32>
    %10 = arith.select %7, %5, %9 : vector<512x128xi1>, vector<512x128xf32>
    %11 = arith.truncf %10 : vector<512x128xf32> to vector<512x128xbf16>
    %c0_7 = arith.constant 0 : index
    %c0_8 = arith.constant 0 : index
    %12 = vector.load %arg4[%c0_7, %c0_8] : memref<512x128xbf16, #tpu.memory_space<vmem>>, vector<512x128xbf16>
    tpu.vector_store %arg4[%c0_7, %c0_8], %11 {strides = array<i32>} : memref<512x128xbf16, #tpu.memory_space<vmem>>, vector<512x128xbf16>,
    return
  }
  func.func @transform_0(%arg0: i32) -> (i32, i32) {
    %c0_i32 = arith.constant 0 : i32
    %c0_i32_0 = arith.constant 0 : i32
    return %arg0, %c0_i32 : i32, i32
  }
  func.func @transform_1(%arg0: i32) -> (i32, i32) {
    %c0_i32 = arith.constant 0 : i32
    %c0_i32_0 = arith.constant 0 : i32
    %c0_i32_1 = arith.constant 0 : i32
    return %c0_i32, %c0_i32_0 : i32, i32
  }
  func.func @transform_2(%arg0: i32) -> (i32, i32) {
    %c0_i32 = arith.constant 0 : i32
    %c0_i32_0 = arith.constant 0 : i32
    %c0_i32_1 = arith.constant 0 : i32
    return %c0_i32, %c0_i32_0 : i32, i32
  }
  func.func @transform_3(%arg0: i32) -> (i32, i32) {
    %c0_i32 = arith.constant 0 : i32
    %c0_i32_0 = arith.constant 0 : i32
    return %arg0, %c0_i32 : i32, i32
  }
}

module attributes {stable_mosaic.version = 11 : i64} {
  func.func @conv_mm_kernel(%arg0: i32, %arg1: memref<128x256xbf16, #tpu.memory_space<vmem>>, %arg2: memref<256x128xbf16, #tpu.memory_space<vmem>>, %arg3: memref<1x128xf32, #tpu.memory_space<vmem>>, %arg4: memref<1x128xf32, #tpu.memory_space<vmem>>, %arg5: memref<128x128xbf16, #tpu.memory_space<vmem>>) attributes {dimension_semantics = [#tpu.dimension_semantics<parallel>], iteration_bounds = array<i64: 1>, scalar_prefetch = 0 : i64, scratch_operands = 0 : i64, tpu.core_type = #tpu.core_type<tc>, window_params = [{transform_indices = @transform_0, window_bounds = array<i64: 128, 256>}, {pipeline_mode = #tpu.pipeline_mode<synchronous>, transform_indices = @transform_1, window_bounds = array<i64: 256, 128>}, {pipeline_mode = #tpu.pipeline_mode<synchronous>, transform_indices = @transform_2, window_bounds = array<i64: 1, 128>}, {pipeline_mode = #tpu.pipeline_mode<synchronous>, transform_indices = @transform_3, window_bounds = array<i64: 1, 128>}, {transform_indices = @transform_4, window_bounds = array<i64: 128, 128>}]} {
    %c0 = arith.constant 0 : index
    %c0_0 = arith.constant 0 : index
    %0 = vector.load %arg1[%c0, %c0_0] : memref<128x256xbf16, #tpu.memory_space<vmem>>, vector<128x256xbf16>
    %c0_1 = arith.constant 0 : index
    %c0_2 = arith.constant 0 : index
    %1 = vector.load %arg2[%c0_1, %c0_2] : memref<256x128xbf16, #tpu.memory_space<vmem>>, vector<256x128xbf16>
    %cst = arith.constant dense<0.000000e+00> : vector<128x128xf32>
    %2 = tpu.matmul %0, %1, %cst {dimension_numbers = #tpu.dot_dimension_numbers<[1], [0], [0], [1], [0, 0, 1, 1], [], []>} : vector<128x256xbf16>, vector<256x128xbf16>, vector<128x128xf32> -> vector<128x128xf32>
    %cst_3 = arith.constant dense<0.000000e+00> : vector<128xf32>
    %3 = vector.multi_reduction <add>, %2, %cst_3 [0] : vector<128x128xf32> to vector<128xf32>
    %4 = vector.shape_cast %3 : vector<128xf32> to vector<1x128xf32>
    %cst_4 = arith.constant 7.812500e-03 : f32
    %5 = vector.broadcast %cst_4 : f32 to vector<1x128xf32>
    %6 = arith.mulf %4, %5 : vector<1x128xf32>
    %7 = arith.mulf %2, %2 : vector<128x128xf32>
    %cst_5 = arith.constant dense<0.000000e+00> : vector<128xf32>
    %8 = vector.multi_reduction <add>, %7, %cst_5 [0] : vector<128x128xf32> to vector<128xf32>
    %9 = vector.shape_cast %8 : vector<128xf32> to vector<1x128xf32>
    %cst_6 = arith.constant 7.812500e-03 : f32
    %10 = vector.broadcast %cst_6 : f32 to vector<1x128xf32>
    %11 = arith.mulf %9, %10 : vector<1x128xf32>
    %12 = arith.mulf %6, %6 : vector<1x128xf32>
    %13 = arith.subf %11, %12 : vector<1x128xf32>
    %cst_7 = arith.constant 0.000000e+00 : f32
    %14 = vector.broadcast %cst_7 : f32 to vector<1x128xf32>
    %15 = arith.maximumf %13, %14 : vector<1x128xf32>
    %c0_8 = arith.constant 0 : index
    %c0_9 = arith.constant 0 : index
    %16 = vector.load %arg3[%c0_8, %c0_9] : memref<1x128xf32, #tpu.memory_space<vmem>>, vector<1x128xf32>
    %cst_10 = arith.constant 9.99999974E-6 : f32
    %17 = vector.broadcast %cst_10 : f32 to vector<1x128xf32>
    %18 = arith.addf %15, %17 : vector<1x128xf32>
    %19 = math.rsqrt %18 : vector<1x128xf32>
    %20 = arith.mulf %16, %19 : vector<1x128xf32>
    %21 = vector.broadcast %6 : vector<1x128xf32> to vector<128x128xf32>
    %22 = arith.subf %2, %21 : vector<128x128xf32>
    %23 = vector.broadcast %20 : vector<1x128xf32> to vector<128x128xf32>
    %24 = arith.mulf %22, %23 : vector<128x128xf32>
    %c0_11 = arith.constant 0 : index
    %c0_12 = arith.constant 0 : index
    %25 = vector.load %arg4[%c0_11, %c0_12] : memref<1x128xf32, #tpu.memory_space<vmem>>, vector<1x128xf32>
    %26 = vector.broadcast %25 : vector<1x128xf32> to vector<128x128xf32>
    %27 = arith.addf %24, %26 : vector<128x128xf32>
    %cst_13 = arith.constant 0.000000e+00 : f32
    %28 = vector.broadcast %cst_13 : f32 to vector<128x128xf32>
    %29 = arith.cmpf oge, %27, %28 : vector<128x128xf32>
    %cst_14 = arith.constant 2.000000e-01 : f32
    %30 = vector.broadcast %cst_14 : f32 to vector<128x128xf32>
    %31 = arith.mulf %30, %27 : vector<128x128xf32>
    %32 = arith.select %29, %27, %31 : vector<128x128xi1>, vector<128x128xf32>
    %33 = arith.truncf %32 : vector<128x128xf32> to vector<128x128xbf16>
    %c0_15 = arith.constant 0 : index
    %c0_16 = arith.constant 0 : index
    %34 = vector.load %arg5[%c0_15, %c0_16] : memref<128x128xbf16, #tpu.memory_space<vmem>>, vector<128x128xbf16>
    tpu.vector_store %arg5[%c0_15, %c0_16], %33 {strides = array<i32>} : memref<128x128xbf16, #tpu.memory_space<vmem>>, vector<128x128xbf16>,
    return
  }
  func.func @transform_0(%arg0: i32) -> (i32, i32) {
    %c0_i32 = arith.constant 0 : i32
    %c0_i32_0 = arith.constant 0 : i32
    return %arg0, %c0_i32 : i32, i32
  }
  func.func @transform_1(%arg0: i32) -> (i32, i32) {
    %c0_i32 = arith.constant 0 : i32
    %c0_i32_0 = arith.constant 0 : i32
    %c0_i32_1 = arith.constant 0 : i32
    return %c0_i32, %c0_i32_0 : i32, i32
  }
  func.func @transform_2(%arg0: i32) -> (i32, i32) {
    %c0_i32 = arith.constant 0 : i32
    %c0_i32_0 = arith.constant 0 : i32
    %c0_i32_1 = arith.constant 0 : i32
    return %c0_i32, %c0_i32_0 : i32, i32
  }
  func.func @transform_3(%arg0: i32) -> (i32, i32) {
    %c0_i32 = arith.constant 0 : i32
    %c0_i32_0 = arith.constant 0 : i32
    %c0_i32_1 = arith.constant 0 : i32
    return %c0_i32, %c0_i32_0 : i32, i32
  }
  func.func @transform_4(%arg0: i32) -> (i32, i32) {
    %c0_i32 = arith.constant 0 : i32
    %c0_i32_0 = arith.constant 0 : i32
    return %arg0, %c0_i32 : i32, i32
  }
}

module attributes {stable_mosaic.version = 11 : i64} {
  func.func @conv_mm_kernel(%arg0: i32, %arg1: memref<32x512xbf16, #tpu.memory_space<vmem>>, %arg2: memref<512x128xbf16, #tpu.memory_space<vmem>>, %arg3: memref<1x128xf32, #tpu.memory_space<vmem>>, %arg4: memref<1x128xf32, #tpu.memory_space<vmem>>, %arg5: memref<32x128xbf16, #tpu.memory_space<vmem>>) attributes {dimension_semantics = [#tpu.dimension_semantics<parallel>], iteration_bounds = array<i64: 1>, scalar_prefetch = 0 : i64, scratch_operands = 0 : i64, tpu.core_type = #tpu.core_type<tc>, window_params = [{transform_indices = @transform_0, window_bounds = array<i64: 32, 512>}, {pipeline_mode = #tpu.pipeline_mode<synchronous>, transform_indices = @transform_1, window_bounds = array<i64: 512, 128>}, {pipeline_mode = #tpu.pipeline_mode<synchronous>, transform_indices = @transform_2, window_bounds = array<i64: 1, 128>}, {pipeline_mode = #tpu.pipeline_mode<synchronous>, transform_indices = @transform_3, window_bounds = array<i64: 1, 128>}, {transform_indices = @transform_4, window_bounds = array<i64: 32, 128>}]} {
    %c0 = arith.constant 0 : index
    %c0_0 = arith.constant 0 : index
    %0 = vector.load %arg1[%c0, %c0_0] : memref<32x512xbf16, #tpu.memory_space<vmem>>, vector<32x512xbf16>
    %c0_1 = arith.constant 0 : index
    %c0_2 = arith.constant 0 : index
    %1 = vector.load %arg2[%c0_1, %c0_2] : memref<512x128xbf16, #tpu.memory_space<vmem>>, vector<512x128xbf16>
    %cst = arith.constant dense<0.000000e+00> : vector<32x128xf32>
    %2 = tpu.matmul %0, %1, %cst {dimension_numbers = #tpu.dot_dimension_numbers<[1], [0], [0], [1], [0, 0, 1, 1], [], []>} : vector<32x512xbf16>, vector<512x128xbf16>, vector<32x128xf32> -> vector<32x128xf32>
    %cst_3 = arith.constant dense<0.000000e+00> : vector<128xf32>
    %3 = vector.multi_reduction <add>, %2, %cst_3 [0] : vector<32x128xf32> to vector<128xf32>
    %4 = vector.shape_cast %3 : vector<128xf32> to vector<1x128xf32>
    %cst_4 = arith.constant 3.125000e-02 : f32
    %5 = vector.broadcast %cst_4 : f32 to vector<1x128xf32>
    %6 = arith.mulf %4, %5 : vector<1x128xf32>
    %7 = arith.mulf %2, %2 : vector<32x128xf32>
    %cst_5 = arith.constant dense<0.000000e+00> : vector<128xf32>
    %8 = vector.multi_reduction <add>, %7, %cst_5 [0] : vector<32x128xf32> to vector<128xf32>
    %9 = vector.shape_cast %8 : vector<128xf32> to vector<1x128xf32>
    %cst_6 = arith.constant 3.125000e-02 : f32
    %10 = vector.broadcast %cst_6 : f32 to vector<1x128xf32>
    %11 = arith.mulf %9, %10 : vector<1x128xf32>
    %12 = arith.mulf %6, %6 : vector<1x128xf32>
    %13 = arith.subf %11, %12 : vector<1x128xf32>
    %cst_7 = arith.constant 0.000000e+00 : f32
    %14 = vector.broadcast %cst_7 : f32 to vector<1x128xf32>
    %15 = arith.maximumf %13, %14 : vector<1x128xf32>
    %c0_8 = arith.constant 0 : index
    %c0_9 = arith.constant 0 : index
    %16 = vector.load %arg3[%c0_8, %c0_9] : memref<1x128xf32, #tpu.memory_space<vmem>>, vector<1x128xf32>
    %cst_10 = arith.constant 9.99999974E-6 : f32
    %17 = vector.broadcast %cst_10 : f32 to vector<1x128xf32>
    %18 = arith.addf %15, %17 : vector<1x128xf32>
    %19 = math.rsqrt %18 : vector<1x128xf32>
    %20 = arith.mulf %16, %19 : vector<1x128xf32>
    %21 = vector.broadcast %6 : vector<1x128xf32> to vector<32x128xf32>
    %22 = arith.subf %2, %21 : vector<32x128xf32>
    %23 = vector.broadcast %20 : vector<1x128xf32> to vector<32x128xf32>
    %24 = arith.mulf %22, %23 : vector<32x128xf32>
    %c0_11 = arith.constant 0 : index
    %c0_12 = arith.constant 0 : index
    %25 = vector.load %arg4[%c0_11, %c0_12] : memref<1x128xf32, #tpu.memory_space<vmem>>, vector<1x128xf32>
    %26 = vector.broadcast %25 : vector<1x128xf32> to vector<32x128xf32>
    %27 = arith.addf %24, %26 : vector<32x128xf32>
    %cst_13 = arith.constant 0.000000e+00 : f32
    %28 = vector.broadcast %cst_13 : f32 to vector<32x128xf32>
    %29 = arith.cmpf oge, %27, %28 : vector<32x128xf32>
    %cst_14 = arith.constant 2.000000e-01 : f32
    %30 = vector.broadcast %cst_14 : f32 to vector<32x128xf32>
    %31 = arith.mulf %30, %27 : vector<32x128xf32>
    %32 = arith.select %29, %27, %31 : vector<32x128xi1>, vector<32x128xf32>
    %33 = arith.truncf %32 : vector<32x128xf32> to vector<32x128xbf16>
    %c0_15 = arith.constant 0 : index
    %c0_16 = arith.constant 0 : index
    %34 = vector.load %arg5[%c0_15, %c0_16] : memref<32x128xbf16, #tpu.memory_space<vmem>>, vector<32x128xbf16>
    tpu.vector_store %arg5[%c0_15, %c0_16], %33 {strides = array<i32>} : memref<32x128xbf16, #tpu.memory_space<vmem>>, vector<32x128xbf16>,
    return
  }
  func.func @transform_0(%arg0: i32) -> (i32, i32) {
    %c0_i32 = arith.constant 0 : i32
    %c0_i32_0 = arith.constant 0 : i32
    return %arg0, %c0_i32 : i32, i32
  }
  func.func @transform_1(%arg0: i32) -> (i32, i32) {
    %c0_i32 = arith.constant 0 : i32
    %c0_i32_0 = arith.constant 0 : i32
    %c0_i32_1 = arith.constant 0 : i32
    return %c0_i32, %c0_i32_0 : i32, i32
  }
  func.func @transform_2(%arg0: i32) -> (i32, i32) {
    %c0_i32 = arith.constant 0 : i32
    %c0_i32_0 = arith.constant 0 : i32
    %c0_i32_1 = arith.constant 0 : i32
    return %c0_i32, %c0_i32_0 : i32, i32
  }
  func.func @transform_3(%arg0: i32) -> (i32, i32) {
    %c0_i32 = arith.constant 0 : i32
    %c0_i32_0 = arith.constant 0 : i32
    %c0_i32_1 = arith.constant 0 : i32
    return %c0_i32, %c0_i32_0 : i32, i32
  }
  func.func @transform_4(%arg0: i32) -> (i32, i32) {
    %c0_i32 = arith.constant 0 : i32
    %c0_i32_0 = arith.constant 0 : i32
    return %arg0, %c0_i32 : i32, i32
  }
}

module attributes {stable_mosaic.version = 11 : i64} {
  func.func @conv_mm_kernel(%arg0: i32, %arg1: memref<32x1024xbf16, #tpu.memory_space<vmem>>, %arg2: memref<1024x128xbf16, #tpu.memory_space<vmem>>, %arg3: memref<1x128xf32, #tpu.memory_space<vmem>>, %arg4: memref<1x128xf32, #tpu.memory_space<vmem>>, %arg5: memref<32x128xbf16, #tpu.memory_space<vmem>>) attributes {dimension_semantics = [#tpu.dimension_semantics<parallel>], iteration_bounds = array<i64: 1>, scalar_prefetch = 0 : i64, scratch_operands = 0 : i64, tpu.core_type = #tpu.core_type<tc>, window_params = [{transform_indices = @transform_0, window_bounds = array<i64: 32, 1024>}, {pipeline_mode = #tpu.pipeline_mode<synchronous>, transform_indices = @transform_1, window_bounds = array<i64: 1024, 128>}, {pipeline_mode = #tpu.pipeline_mode<synchronous>, transform_indices = @transform_2, window_bounds = array<i64: 1, 128>}, {pipeline_mode = #tpu.pipeline_mode<synchronous>, transform_indices = @transform_3, window_bounds = array<i64: 1, 128>}, {transform_indices = @transform_4, window_bounds = array<i64: 32, 128>}]} {
    %c0 = arith.constant 0 : index
    %c0_0 = arith.constant 0 : index
    %0 = vector.load %arg1[%c0, %c0_0] : memref<32x1024xbf16, #tpu.memory_space<vmem>>, vector<32x1024xbf16>
    %c0_1 = arith.constant 0 : index
    %c0_2 = arith.constant 0 : index
    %1 = vector.load %arg2[%c0_1, %c0_2] : memref<1024x128xbf16, #tpu.memory_space<vmem>>, vector<1024x128xbf16>
    %cst = arith.constant dense<0.000000e+00> : vector<32x128xf32>
    %2 = tpu.matmul %0, %1, %cst {dimension_numbers = #tpu.dot_dimension_numbers<[1], [0], [0], [1], [0, 0, 1, 1], [], []>} : vector<32x1024xbf16>, vector<1024x128xbf16>, vector<32x128xf32> -> vector<32x128xf32>
    %cst_3 = arith.constant dense<0.000000e+00> : vector<128xf32>
    %3 = vector.multi_reduction <add>, %2, %cst_3 [0] : vector<32x128xf32> to vector<128xf32>
    %4 = vector.shape_cast %3 : vector<128xf32> to vector<1x128xf32>
    %cst_4 = arith.constant 0.055555556 : f32
    %5 = vector.broadcast %cst_4 : f32 to vector<1x128xf32>
    %6 = arith.mulf %4, %5 : vector<1x128xf32>
    %7 = arith.mulf %2, %2 : vector<32x128xf32>
    %cst_5 = arith.constant dense<0.000000e+00> : vector<128xf32>
    %8 = vector.multi_reduction <add>, %7, %cst_5 [0] : vector<32x128xf32> to vector<128xf32>
    %9 = vector.shape_cast %8 : vector<128xf32> to vector<1x128xf32>
    %cst_6 = arith.constant 0.055555556 : f32
    %10 = vector.broadcast %cst_6 : f32 to vector<1x128xf32>
    %11 = arith.mulf %9, %10 : vector<1x128xf32>
    %12 = arith.mulf %6, %6 : vector<1x128xf32>
    %13 = arith.subf %11, %12 : vector<1x128xf32>
    %cst_7 = arith.constant 0.000000e+00 : f32
    %14 = vector.broadcast %cst_7 : f32 to vector<1x128xf32>
    %15 = arith.maximumf %13, %14 : vector<1x128xf32>
    %c0_8 = arith.constant 0 : index
    %c0_9 = arith.constant 0 : index
    %16 = vector.load %arg3[%c0_8, %c0_9] : memref<1x128xf32, #tpu.memory_space<vmem>>, vector<1x128xf32>
    %cst_10 = arith.constant 9.99999974E-6 : f32
    %17 = vector.broadcast %cst_10 : f32 to vector<1x128xf32>
    %18 = arith.addf %15, %17 : vector<1x128xf32>
    %19 = math.rsqrt %18 : vector<1x128xf32>
    %20 = arith.mulf %16, %19 : vector<1x128xf32>
    %21 = vector.broadcast %6 : vector<1x128xf32> to vector<32x128xf32>
    %22 = arith.subf %2, %21 : vector<32x128xf32>
    %23 = vector.broadcast %20 : vector<1x128xf32> to vector<32x128xf32>
    %24 = arith.mulf %22, %23 : vector<32x128xf32>
    %c0_11 = arith.constant 0 : index
    %c0_12 = arith.constant 0 : index
    %25 = vector.load %arg4[%c0_11, %c0_12] : memref<1x128xf32, #tpu.memory_space<vmem>>, vector<1x128xf32>
    %26 = vector.broadcast %25 : vector<1x128xf32> to vector<32x128xf32>
    %27 = arith.addf %24, %26 : vector<32x128xf32>
    %cst_13 = arith.constant 0.000000e+00 : f32
    %28 = vector.broadcast %cst_13 : f32 to vector<32x128xf32>
    %29 = arith.cmpf oge, %27, %28 : vector<32x128xf32>
    %cst_14 = arith.constant 2.000000e-01 : f32
    %30 = vector.broadcast %cst_14 : f32 to vector<32x128xf32>
    %31 = arith.mulf %30, %27 : vector<32x128xf32>
    %32 = arith.select %29, %27, %31 : vector<32x128xi1>, vector<32x128xf32>
    %33 = arith.truncf %32 : vector<32x128xf32> to vector<32x128xbf16>
    %c0_15 = arith.constant 0 : index
    %c0_16 = arith.constant 0 : index
    %34 = vector.load %arg5[%c0_15, %c0_16] : memref<32x128xbf16, #tpu.memory_space<vmem>>, vector<32x128xbf16>
    tpu.vector_store %arg5[%c0_15, %c0_16], %33 {strides = array<i32>} : memref<32x128xbf16, #tpu.memory_space<vmem>>, vector<32x128xbf16>,
    return
  }
  func.func @transform_0(%arg0: i32) -> (i32, i32) {
    %c0_i32 = arith.constant 0 : i32
    %c0_i32_0 = arith.constant 0 : i32
    return %arg0, %c0_i32 : i32, i32
  }
  func.func @transform_1(%arg0: i32) -> (i32, i32) {
    %c0_i32 = arith.constant 0 : i32
    %c0_i32_0 = arith.constant 0 : i32
    %c0_i32_1 = arith.constant 0 : i32
    return %c0_i32, %c0_i32_0 : i32, i32
  }
  func.func @transform_2(%arg0: i32) -> (i32, i32) {
    %c0_i32 = arith.constant 0 : i32
    %c0_i32_0 = arith.constant 0 : i32
    %c0_i32_1 = arith.constant 0 : i32
    return %c0_i32, %c0_i32_0 : i32, i32
  }
  func.func @transform_3(%arg0: i32) -> (i32, i32) {
    %c0_i32 = arith.constant 0 : i32
    %c0_i32_0 = arith.constant 0 : i32
    %c0_i32_1 = arith.constant 0 : i32
    return %c0_i32, %c0_i32_0 : i32, i32
  }
  func.func @transform_4(%arg0: i32) -> (i32, i32) {
    %c0_i32 = arith.constant 0 : i32
    %c0_i32_0 = arith.constant 0 : i32
    return %arg0, %c0_i32 : i32, i32
  }
}

module attributes {stable_mosaic.version = 11 : i64} {
  func.func @conv_mm_kernel(%arg0: i32, %arg1: memref<16x2048xbf16, #tpu.memory_space<vmem>>, %arg2: memref<2048x128xbf16, #tpu.memory_space<vmem>>, %arg3: memref<1x128xf32, #tpu.memory_space<vmem>>, %arg4: memref<16x128xf32, #tpu.memory_space<vmem>>) attributes {dimension_semantics = [#tpu.dimension_semantics<parallel>], iteration_bounds = array<i64: 1>, scalar_prefetch = 0 : i64, scratch_operands = 0 : i64, tpu.core_type = #tpu.core_type<tc>, window_params = [{transform_indices = @transform_0, window_bounds = array<i64: 16, 2048>}, {pipeline_mode = #tpu.pipeline_mode<synchronous>, transform_indices = @transform_1, window_bounds = array<i64: 2048, 128>}, {pipeline_mode = #tpu.pipeline_mode<synchronous>, transform_indices = @transform_2, window_bounds = array<i64: 1, 128>}, {transform_indices = @transform_3, window_bounds = array<i64: 16, 128>}]} {
    %c0 = arith.constant 0 : index
    %c0_0 = arith.constant 0 : index
    %0 = vector.load %arg1[%c0, %c0_0] : memref<16x2048xbf16, #tpu.memory_space<vmem>>, vector<16x2048xbf16>
    %c0_1 = arith.constant 0 : index
    %c0_2 = arith.constant 0 : index
    %1 = vector.load %arg2[%c0_1, %c0_2] : memref<2048x128xbf16, #tpu.memory_space<vmem>>, vector<2048x128xbf16>
    %cst = arith.constant dense<0.000000e+00> : vector<16x128xf32>
    %2 = tpu.matmul %0, %1, %cst {dimension_numbers = #tpu.dot_dimension_numbers<[1], [0], [0], [1], [0, 0, 1, 1], [], []>} : vector<16x2048xbf16>, vector<2048x128xbf16>, vector<16x128xf32> -> vector<16x128xf32>
    %c0_3 = arith.constant 0 : index
    %c0_4 = arith.constant 0 : index
    %3 = vector.load %arg3[%c0_3, %c0_4] : memref<1x128xf32, #tpu.memory_space<vmem>>, vector<1x128xf32>
    %4 = vector.broadcast %3 : vector<1x128xf32> to vector<16x128xf32>
    %5 = arith.addf %2, %4 : vector<16x128xf32>
    %c0_5 = arith.constant 0 : index
    %c0_6 = arith.constant 0 : index
    %6 = vector.load %arg4[%c0_5, %c0_6] : memref<16x128xf32, #tpu.memory_space<vmem>>, vector<16x128xf32>
    tpu.vector_store %arg4[%c0_5, %c0_6], %5 {strides = array<i32>} : memref<16x128xf32, #tpu.memory_space<vmem>>, vector<16x128xf32>,
    return
  }
  func.func @transform_0(%arg0: i32) -> (i32, i32) {
    %c0_i32 = arith.constant 0 : i32
    %c0_i32_0 = arith.constant 0 : i32
    return %arg0, %c0_i32 : i32, i32
  }
  func.func @transform_1(%arg0: i32) -> (i32, i32) {
    %c0_i32 = arith.constant 0 : i32
    %c0_i32_0 = arith.constant 0 : i32
    %c0_i32_1 = arith.constant 0 : i32
    return %c0_i32, %c0_i32_0 : i32, i32
  }
  func.func @transform_2(%arg0: i32) -> (i32, i32) {
    %c0_i32 = arith.constant 0 : i32
    %c0_i32_0 = arith.constant 0 : i32
    %c0_i32_1 = arith.constant 0 : i32
    return %c0_i32, %c0_i32_0 : i32, i32
  }
  func.func @transform_3(%arg0: i32) -> (i32, i32) {
    %c0_i32 = arith.constant 0 : i32
    %c0_i32_0 = arith.constant 0 : i32
    return %arg0, %c0_i32 : i32, i32
  }
}

</mosaic_0001>

<bundles_post_ra>
// kernel: _lambda_.5
= control target key start
LH: loop header
LB: loop body
LE: loop exit
PB: predicated region body
PF: predicated region fallthrough
CT: control target
= control target key end

     0   :  { %s1552_s1 = inlined_call_operand.vmem [shape: bf16[128,128], index: 1, kind: input, shape index: {}]   ;;  %s1553_s2 = inlined_call_operand.vmem [shape: f32[1,128], index: 2, kind: input, shape index: {}]   ;;  %s1554_s0 = inlined_call_operand.vmem [shape: bf16[512,128], index: 0, kind: input, shape index: {}]   ;;  %s1555_s3 = inlined_call_operand.vmem [shape: bf16[512,128], index: 3, kind: output, shape index: {}]  }
   0x1   :  { %v1030_v0 = vld [vmem:[%s1552_s1 + $0x38] sm:$0xff]  ;;  %v1029_v1 = vld [vmem:[%s1552_s1 + $0x30] sm:$0xff]  ;;  %v1028_v2 = vld [vmem:[%s1552_s1 + $0x28] sm:$0xff] }
   0x2   :  { %338 = vmatpush.bf16.msra.mxu0 %v1030_v0  ;;  %1222 = vmatpush.bf16.msra.mxu1 %v1030_v0  ;;  %v1027_v3 = vld [vmem:[%s1552_s1 + $0x20] sm:$0xff]  ;;  %v1026_v4 = vld [vmem:[%s1552_s1 + $0x18] sm:$0xff]  ;;  %v1025_v5 = vld [vmem:[%s1552_s1 + $0x10] sm:$0xff] }
   0x3   :  { %1223 = vmatpush.bf16.msra.mxu2 %v1030_v0  ;;  %1224 = vmatpush.bf16.msra.mxu3 %v1030_v0  ;;  %v1024_v6 = vld [vmem:[%s1552_s1 + $0x8] sm:$0xff]  ;;  %v1023_v7 = vld [vmem:[%s1552_s1] sm:$0xff]  ;;  %v993_v16 = vld [vmem:[%s1554_s0 + $0x10] sm:$0xff] }
   0x4   :  { %v991_v8 = vld [vmem:[%s1554_s0] sm:$0xff]  ;;  %v992_v12 = vld [vmem:[%s1554_s0 + $0x8] sm:$0xff]  ;;  %v1001_v17 = vld [vmem:[%s1554_s0 + $0x50] sm:$0xff] }
   0x5   :  { %v999_v9 = vld [vmem:[%s1554_s0 + $0x40] sm:$0xff]  ;;  %v1000_v13 = vld [vmem:[%s1554_s0 + $0x48] sm:$0xff]  ;;  %v1009_v18 = vld [vmem:[%s1554_s0 + $0x90] sm:$0xff] }
   0x6   :  { %339 = vmatpush.bf16.msra.mxu0 %v1029_v1  ;;  %1225 = vmatpush.bf16.msra.mxu1 %v1029_v1  ;;  %v1007_v10 = vld [vmem:[%s1554_s0 + $0x80] sm:$0xff]  ;;  %v1008_v14 = vld [vmem:[%s1554_s0 + $0x88] sm:$0xff]  ;;  %v1017_v19 = vld [vmem:[%s1554_s0 + $0xd0] sm:$0xff] }
   0x7   :  { %1226 = vmatpush.bf16.msra.mxu2 %v1029_v1  ;;  %1227 = vmatpush.bf16.msra.mxu3 %v1029_v1  ;;  %v1015_v11 = vld [vmem:[%s1554_s0 + $0xc0] sm:$0xff]  ;;  %v1016_v15 = vld [vmem:[%s1554_s0 + $0xc8] sm:$0xff]  ;;  %v994_v20 = vld [vmem:[%s1554_s0 + $0x18] sm:$0xff] }
   0x8   :  { %v1002_v21 = vld [vmem:[%s1554_s0 + $0x58] sm:$0xff]  ;;  %v995_v24 = vld [vmem:[%s1554_s0 + $0x20] sm:$0xff]  ;;  %v996_v28 = vld [vmem:[%s1554_s0 + $0x28] sm:$0xff] }
   0x9   :  { %v1010_v22 = vld [vmem:[%s1554_s0 + $0x98] sm:$0xff]  ;;  %v1003_v25 = vld [vmem:[%s1554_s0 + $0x60] sm:$0xff]  ;;  %v1004_v29 = vld [vmem:[%s1554_s0 + $0x68] sm:$0xff] }
   0xa   :  { %340 = vmatpush.bf16.msra.mxu0 %v1028_v2  ;;  %1228 = vmatpush.bf16.msra.mxu1 %v1028_v2  ;;  %v1018_v23 = vld [vmem:[%s1554_s0 + $0xd8] sm:$0xff]  ;;  %v1011_v26 = vld [vmem:[%s1554_s0 + $0xa0] sm:$0xff]  ;;  %v1012_v30 = vld [vmem:[%s1554_s0 + $0xa8] sm:$0xff] }
   0xb   :  { %1229 = vmatpush.bf16.msra.mxu2 %v1028_v2  ;;  %1230 = vmatpush.bf16.msra.mxu3 %v1028_v2  ;;  %v1019_v27 = vld [vmem:[%s1554_s0 + $0xe0] sm:$0xff]  ;;  %v1020_v31 = vld [vmem:[%s1554_s0 + $0xe8] sm:$0xff]  ;;  %v997_v32 = vld [vmem:[%s1554_s0 + $0x30] sm:$0xff] }
   0xc   :  { %v1005_v33 = vld [vmem:[%s1554_s0 + $0x70] sm:$0xff]  ;;  %v998_v36 = vld [vmem:[%s1554_s0 + $0x38] sm:$0xff]  ;;  %v1390_v42 = vld [vmem:[%s1553_s2] ss:$0 sm:$0xff] }
   0xd   :  { %v1013_v34 = vld [vmem:[%s1554_s0 + $0xb0] sm:$0xff]  ;;  %v1006_v37 = vld [vmem:[%s1554_s0 + $0x78] sm:$0xff] }
   0xe   :  { %341 = vmatpush.bf16.msra.mxu0 %v1027_v3  ;;  %1231 = vmatpush.bf16.msra.mxu1 %v1027_v3  ;;  %v1021_v35 = vld [vmem:[%s1554_s0 + $0xf0] sm:$0xff]  ;;  %v1014_v38 = vld [vmem:[%s1554_s0 + $0xb8] sm:$0xff] }
   0xf   :  { %1232 = vmatpush.bf16.msra.mxu2 %v1027_v3  ;;  %1233 = vmatpush.bf16.msra.mxu3 %v1027_v3  ;;  %v1022_v39 = vld [vmem:[%s1554_s0 + $0xf8] sm:$0xff] }
  0x12   :  { %342 = vmatpush.bf16.msra.mxu0 %v1026_v4  ;;  %1234 = vmatpush.bf16.msra.mxu1 %v1026_v4 }
  0x13   :  { %1235 = vmatpush.bf16.msra.mxu2 %v1026_v4  ;;  %1236 = vmatpush.bf16.msra.mxu3 %v1026_v4 }
  0x16   :  { %343 = vmatpush.bf16.msra.mxu0 %v1025_v5  ;;  %1237 = vmatpush.bf16.msra.mxu1 %v1025_v5 }
  0x17   :  { %1238 = vmatpush.bf16.msra.mxu2 %v1025_v5  ;;  %1239 = vmatpush.bf16.msra.mxu3 %v1025_v5 }
  0x1a   :  { %344 = vmatpush.bf16.msra.mxu0 %v1024_v6  ;;  %1240 = vmatpush.bf16.msra.mxu1 %v1024_v6 }
  0x1b   :  { %1241 = vmatpush.bf16.msra.mxu2 %v1024_v6  ;;  %1242 = vmatpush.bf16.msra.mxu3 %v1024_v6 }
  0x1e   :  { %345 = vmatpush.bf16.msra.mxu0 %v1023_v7  ;;  %1243 = vmatpush.bf16.msra.mxu1 %v1023_v7 }
  0x1f   :  { %1244 = vmatpush.bf16.msra.mxu2 %v1023_v7  ;;  %1245 = vmatpush.bf16.msra.mxu3 %v1023_v7 }
  0x21   :  { %346 = vmatmul.bf16.vlgmr.msra.gmra.mxu0 %v991_v8  ;;  %386 = vmatmul.bf16.vlgmr.msra.gmra.mxu1 %v999_v9 }
  0x22   :  { %426 = vmatmul.bf16.vlgmr.msra.gmra.mxu2 %v1007_v10  ;;  %466 = vmatmul.bf16.vlgmr.msra.gmra.mxu3 %v1015_v11 }
  0x31   :  { %351 = vmatmul.bf16.gmra.mxu0 %v992_v12  ;;  %391 = vmatmul.bf16.gmra.mxu1 %v1000_v13 }
  0x32   :  { %431 = vmatmul.bf16.gmra.mxu2 %v1008_v14  ;;  %471 = vmatmul.bf16.gmra.mxu3 %v1016_v15 }
  0x41   :  { %356 = vmatmul.bf16.gmra.mxu0 %v993_v16  ;;  %396 = vmatmul.bf16.gmra.mxu1 %v1001_v17 }
  0x42   :  { %436 = vmatmul.bf16.gmra.mxu2 %v1009_v18  ;;  %476 = vmatmul.bf16.gmra.mxu3 %v1017_v19 }
  0x51   :  { %361 = vmatmul.bf16.gmra.mxu0 %v994_v20  ;;  %401 = vmatmul.bf16.gmra.mxu1 %v1002_v21 }
  0x52   :  { %441 = vmatmul.bf16.gmra.mxu2 %v1010_v22  ;;  %481 = vmatmul.bf16.gmra.mxu3 %v1018_v23 }
  0x61   :  { %366 = vmatmul.bf16.gmra.mxu0 %v995_v24  ;;  %406 = vmatmul.bf16.gmra.mxu1 %v1003_v25 }
  0x62   :  { %446 = vmatmul.bf16.gmra.mxu2 %v1011_v26  ;;  %486 = vmatmul.bf16.gmra.mxu3 %v1019_v27 }
  0x71   :  { %371 = vmatmul.bf16.gmra.mxu0 %v996_v28  ;;  %411 = vmatmul.bf16.gmra.mxu1 %v1004_v29 }
  0x72   :  { %451 = vmatmul.bf16.gmra.mxu2 %v1012_v30  ;;  %491 = vmatmul.bf16.gmra.mxu3 %v1020_v31 }
  0x81   :  { %376 = vmatmul.bf16.gmra.mxu0 %v997_v32  ;;  %416 = vmatmul.bf16.gmra.mxu1 %v1005_v33 }
  0x82   :  { %456 = vmatmul.bf16.gmra.mxu2 %v1013_v34  ;;  %496 = vmatmul.bf16.gmra.mxu3 %v1021_v35 }
  0x91   :  { %381 = vmatmul.bf16.gmra.mxu0 %v998_v36  ;;  %421 = vmatmul.bf16.gmra.mxu1 %v1006_v37 }
  0x92   :  { %461 = vmatmul.bf16.gmra.mxu2 %v1014_v38  ;;  %501 = vmatmul.bf16.gmra.mxu3 %v1022_v39 }
  0x9e   :  { %v347_v40 = vpop.f32.mrf.mxu0  ;;  %v387_v41 = vpop.f32.mrf.mxu1 }
  0x9f   :  { %v348_v43 = vadd.f32 %v1390_v42, %v347_v40  ;;  %v388_v44 = vadd.f32 %v1390_v42, %v387_v41 }
  0xa1   :  { %v571_v49 = vmul.f32 0.2, %v348_v43  ;;  %v587_v50 = vmul.f32 0.2, %v388_v44  ;;  %vm507_vm0 = vcmp.ge.f32.partialorder %v348_v43, 0.0  ;;  %vm523_vm1 = vcmp.ge.f32.partialorder %v388_v44, 0.0 }
  0xa3   :  { %v635_v57 = vsel %vm507_vm0, %v348_v43, %v571_v49  ;;  %v651_v58 = vsel %vm523_vm1, %v388_v44, %v587_v50 }
  0xa5   :  { %v427_v45 = vpop.f32.mrf.mxu2  ;;  %v467_v46 = vpop.f32.mrf.mxu3 }
  0xa6   :  { %v349_v47 = vpop.f32.mrf.mxu0  ;;  %v389_v48 = vpop.f32.mrf.mxu1  ;;  %v428_v55 = vadd.f32 %v1390_v42, %v427_v45  ;;  %v468_v56 = vadd.f32 %v1390_v42, %v467_v46 }
  0xa7   :  { %v350_v51 = vadd.f32 %v1390_v42, %v349_v47  ;;  %v390_v52 = vadd.f32 %v1390_v42, %v389_v48 }
  0xa8   :  { %v603_v1 = vmul.f32 0.2, %v428_v55  ;;  %v619_v2 = vmul.f32 0.2, %v468_v56  ;;  %vm539_vm4 = vcmp.ge.f32.partialorder %v428_v55, 0.0  ;;  %vm555_vm5 = vcmp.ge.f32.partialorder %v468_v56, 0.0 }
  0xa9   :  { %vm508_vm2 = vcmp.ge.f32.partialorder %v350_v51, 0.0  ;;  %v572_v53 = vmul.f32 0.2, %v350_v51  ;;  %vm524_vm3 = vcmp.ge.f32.partialorder %v390_v52, 0.0  ;;  %v588_v54 = vmul.f32 0.2, %v390_v52 }
  0xaa   :  { %v667_v9 = vsel %vm539_vm4, %v428_v55, %v603_v1  ;;  %v683_v10 = vsel %vm555_vm5, %v468_v56, %v619_v2 }
  0xab   :  { %v636_v59 = vsel %vm508_vm2, %v350_v51, %v572_v53  ;;  %v652_v60 = vsel %vm524_vm3, %v390_v52, %v588_v54 }
  0xac   :  { %v1034_v61 = vpack.c.bf16 %v636_v59, %v635_v57  ;;  %v1074_v62 = vpack.c.bf16 %v652_v60, %v651_v58 }
  0xad   :  { %v429_v63 = vpop.f32.mrf.mxu2  ;;  %v469_v0 = vpop.f32.mrf.mxu3 }
  0xae   :  { %1035 = vst [vmem:[%s1555_s3] sm:$0xff] %v1034_v61   ;;  %v430_v3 = vadd.f32 %v1390_v42, %v429_v63  ;;  %v470_v4 = vadd.f32 %v1390_v42, %v469_v0  ;;  %v352_v5 = vpop.f32.mrf.mxu0  ;;  %v392_v6 = vpop.f32.mrf.mxu1 }
  0xaf   :  { %1198 = vst [vmem:[%s1555_s3 + $0x40] sm:$0xff] %v1074_v62   ;;  %v353_v15 = vadd.f32 %v1390_v42, %v352_v5  ;;  %v393_v16 = vadd.f32 %v1390_v42, %v392_v6 }
  0xb0   :  { %vm540_vm6 = vcmp.ge.f32.partialorder %v430_v3, 0.0  ;;  %v604_v7 = vmul.f32 0.2, %v430_v3  ;;  %vm556_vm7 = vcmp.ge.f32.partialorder %v470_v4, 0.0  ;;  %v620_v8 = vmul.f32 0.2, %v470_v4 }
  0xb1   :  { %v573_v21 = vmul.f32 0.2, %v353_v15  ;;  %v589_v22 = vmul.f32 0.2, %v393_v16  ;;  %vm509_vm8 = vcmp.ge.f32.partialorder %v353_v15, 0.0  ;;  %vm525_vm9 = vcmp.ge.f32.partialorder %v393_v16, 0.0 }
  0xb2   :  { %v668_v11 = vsel %vm540_vm6, %v430_v3, %v604_v7  ;;  %v684_v12 = vsel %vm556_vm7, %v470_v4, %v620_v8 }
  0xb3   :  { %v1114_v13 = vpack.c.bf16 %v668_v11, %v667_v9  ;;  %v1154_v14 = vpack.c.bf16 %v684_v12, %v683_v10  ;;  %v637_v29 = vsel %vm509_vm8, %v353_v15, %v573_v21  ;;  %v653_v30 = vsel %vm525_vm9, %v393_v16, %v589_v22 }
  0xb5   :  { %1206 = vst [vmem:[%s1555_s3 + $0x80] sm:$0xff] %v1114_v13   ;;  %v432_v17 = vpop.f32.mrf.mxu2  ;;  %v472_v18 = vpop.f32.mrf.mxu3 }
  0xb6   :  { %1214 = vst [vmem:[%s1555_s3 + $0xc0] sm:$0xff] %v1154_v14   ;;  %v354_v19 = vpop.f32.mrf.mxu0  ;;  %v394_v20 = vpop.f32.mrf.mxu1  ;;  %v433_v27 = vadd.f32 %v1390_v42, %v432_v17  ;;  %v473_v28 = vadd.f32 %v1390_v42, %v472_v18 }
  0xb7   :  { %v355_v23 = vadd.f32 %v1390_v42, %v354_v19  ;;  %v395_v24 = vadd.f32 %v1390_v42, %v394_v20 }
  0xb8   :  { %v605_v37 = vmul.f32 0.2, %v433_v27  ;;  %v621_v38 = vmul.f32 0.2, %v473_v28  ;;  %vm541_vm12 = vcmp.ge.f32.partialorder %v433_v27, 0.0  ;;  %vm557_vm13 = vcmp.ge.f32.partialorder %v473_v28, 0.0 }
  0xb9   :  { %vm510_vm10 = vcmp.ge.f32.partialorder %v355_v23, 0.0  ;;  %v574_v25 = vmul.f32 0.2, %v355_v23  ;;  %vm526_vm11 = vcmp.ge.f32.partialorder %v395_v24, 0.0  ;;  %v590_v26 = vmul.f32 0.2, %v395_v24 }
  0xba   :  { %v669_v46 = vsel %vm541_vm12, %v433_v27, %v605_v37  ;;  %v685_v47 = vsel %vm557_vm13, %v473_v28, %v621_v38 }
  0xbb   :  { %v638_v31 = vsel %vm510_vm10, %v355_v23, %v574_v25  ;;  %v654_v32 = vsel %vm526_vm11, %v395_v24, %v590_v26 }
  0xbc   :  { %v1039_v33 = vpack.c.bf16 %v638_v31, %v637_v29  ;;  %v1079_v34 = vpack.c.bf16 %v654_v32, %v653_v30 }
  0xbd   :  { %v434_v35 = vpop.f32.mrf.mxu2  ;;  %v474_v36 = vpop.f32.mrf.mxu3 }
  0xbe   :  { %1191 = vst [vmem:[%s1555_s3 + $0x8] sm:$0xff] %v1039_v33   ;;  %v435_v39 = vadd.f32 %v1390_v42, %v434_v35  ;;  %v475_v40 = vadd.f32 %v1390_v42, %v474_v36  ;;  %v357_v41 = vpop.f32.mrf.mxu0  ;;  %v397_v43 = vpop.f32.mrf.mxu1 }
  0xbf   :  { %1199 = vst [vmem:[%s1555_s3 + $0x48] sm:$0xff] %v1079_v34   ;;  %v358_v52 = vadd.f32 %v1390_v42, %v357_v41  ;;  %v398_v53 = vadd.f32 %v1390_v42, %v397_v43 }
  0xc0   :  { %vm542_vm14 = vcmp.ge.f32.partialorder %v435_v39, 0.0  ;;  %v606_v44 = vmul.f32 0.2, %v435_v39  ;;  %vm558_vm15 = vcmp.ge.f32.partialorder %v475_v40, 0.0  ;;  %v622_v45 = vmul.f32 0.2, %v475_v40 }
  0xc1   :  { %v575_v58 = vmul.f32 0.2, %v358_v52  ;;  %v591_v59 = vmul.f32 0.2, %v398_v53  ;;  %vm511_vm0 = vcmp.ge.f32.partialorder %v358_v52, 0.0  ;;  %vm527_vm1 = vcmp.ge.f32.partialorder %v398_v53, 0.0 }
  0xc2   :  { %v670_v48 = vsel %vm542_vm14, %v435_v39, %v606_v44  ;;  %v686_v49 = vsel %vm558_vm15, %v475_v40, %v622_v45 }
  0xc3   :  { %v1119_v50 = vpack.c.bf16 %v670_v48, %v669_v46  ;;  %v1159_v51 = vpack.c.bf16 %v686_v49, %v685_v47  ;;  %v639_v2 = vsel %vm511_vm0, %v358_v52, %v575_v58  ;;  %v655_v3 = vsel %vm527_vm1, %v398_v53, %v591_v59 }
  0xc5   :  { %1207 = vst [vmem:[%s1555_s3 + $0x88] sm:$0xff] %v1119_v50   ;;  %v437_v54 = vpop.f32.mrf.mxu2  ;;  %v477_v55 = vpop.f32.mrf.mxu3 }
  0xc6   :  { %1215 = vst [vmem:[%s1555_s3 + $0xc8] sm:$0xff] %v1159_v51   ;;  %v359_v56 = vpop.f32.mrf.mxu0  ;;  %v399_v57 = vpop.f32.mrf.mxu1  ;;  %v438_v0 = vadd.f32 %v1390_v42, %v437_v54  ;;  %v478_v1 = vadd.f32 %v1390_v42, %v477_v55 }
  0xc7   :  { %v360_v60 = vadd.f32 %v1390_v42, %v359_v56  ;;  %v400_v61 = vadd.f32 %v1390_v42, %v399_v57 }
  0xc8   :  { %v607_v10 = vmul.f32 0.2, %v438_v0  ;;  %v623_v11 = vmul.f32 0.2, %v478_v1  ;;  %vm543_vm4 = vcmp.ge.f32.partialorder %v438_v0, 0.0  ;;  %vm559_vm5 = vcmp.ge.f32.partialorder %v478_v1, 0.0 }
  0xc9   :  { %vm512_vm2 = vcmp.ge.f32.partialorder %v360_v60, 0.0  ;;  %v576_v62 = vmul.f32 0.2, %v360_v60  ;;  %vm528_vm3 = vcmp.ge.f32.partialorder %v400_v61, 0.0  ;;  %v592_v63 = vmul.f32 0.2, %v400_v61 }
  0xca   :  { %v671_v18 = vsel %vm543_vm4, %v438_v0, %v607_v10  ;;  %v687_v19 = vsel %vm559_vm5, %v478_v1, %v623_v11 }
  0xcb   :  { %v640_v4 = vsel %vm512_vm2, %v360_v60, %v576_v62  ;;  %v656_v5 = vsel %vm528_vm3, %v400_v61, %v592_v63 }
  0xcc   :  { %v1044_v6 = vpack.c.bf16 %v640_v4, %v639_v2  ;;  %v1084_v7 = vpack.c.bf16 %v656_v5, %v655_v3 }
  0xcd   :  { %v439_v8 = vpop.f32.mrf.mxu2  ;;  %v479_v9 = vpop.f32.mrf.mxu3 }
  0xce   :  { %1192 = vst [vmem:[%s1555_s3 + $0x10] sm:$0xff] %v1044_v6   ;;  %v440_v12 = vadd.f32 %v1390_v42, %v439_v8  ;;  %v480_v13 = vadd.f32 %v1390_v42, %v479_v9  ;;  %v362_v14 = vpop.f32.mrf.mxu0  ;;  %v402_v15 = vpop.f32.mrf.mxu1 }
  0xcf   :  { %1200 = vst [vmem:[%s1555_s3 + $0x50] sm:$0xff] %v1084_v7   ;;  %v363_v24 = vadd.f32 %v1390_v42, %v362_v14  ;;  %v403_v25 = vadd.f32 %v1390_v42, %v402_v15 }
  0xd0   :  { %vm544_vm6 = vcmp.ge.f32.partialorder %v440_v12, 0.0  ;;  %v608_v16 = vmul.f32 0.2, %v440_v12  ;;  %vm560_vm7 = vcmp.ge.f32.partialorder %v480_v13, 0.0  ;;  %v624_v17 = vmul.f32 0.2, %v480_v13 }
  0xd1   :  { %v577_v30 = vmul.f32 0.2, %v363_v24  ;;  %v593_v31 = vmul.f32 0.2, %v403_v25  ;;  %vm513_vm8 = vcmp.ge.f32.partialorder %v363_v24, 0.0  ;;  %vm529_vm9 = vcmp.ge.f32.partialorder %v403_v25, 0.0 }
  0xd2   :  { %v672_v20 = vsel %vm544_vm6, %v440_v12, %v608_v16  ;;  %v688_v21 = vsel %vm560_vm7, %v480_v13, %v624_v17 }
  0xd3   :  { %v1124_v22 = vpack.c.bf16 %v672_v20, %v671_v18  ;;  %v1164_v23 = vpack.c.bf16 %v688_v21, %v687_v19  ;;  %v641_v38 = vsel %vm513_vm8, %v363_v24, %v577_v30  ;;  %v657_v39 = vsel %vm529_vm9, %v403_v25, %v593_v31 }
  0xd5   :  { %1208 = vst [vmem:[%s1555_s3 + $0x90] sm:$0xff] %v1124_v22   ;;  %v442_v26 = vpop.f32.mrf.mxu2  ;;  %v482_v27 = vpop.f32.mrf.mxu3 }
  0xd6   :  { %1216 = vst [vmem:[%s1555_s3 + $0xd0] sm:$0xff] %v1164_v23   ;;  %v364_v28 = vpop.f32.mrf.mxu0  ;;  %v404_v29 = vpop.f32.mrf.mxu1  ;;  %v443_v36 = vadd.f32 %v1390_v42, %v442_v26  ;;  %v483_v37 = vadd.f32 %v1390_v42, %v482_v27 }
  0xd7   :  { %v365_v32 = vadd.f32 %v1390_v42, %v364_v28  ;;  %v405_v33 = vadd.f32 %v1390_v42, %v404_v29 }
  0xd8   :  { %v609_v47 = vmul.f32 0.2, %v443_v36  ;;  %v625_v48 = vmul.f32 0.2, %v483_v37  ;;  %vm545_vm12 = vcmp.ge.f32.partialorder %v443_v36, 0.0  ;;  %vm561_vm13 = vcmp.ge.f32.partialorder %v483_v37, 0.0 }
  0xd9   :  { %vm514_vm10 = vcmp.ge.f32.partialorder %v365_v32, 0.0  ;;  %v578_v34 = vmul.f32 0.2, %v365_v32  ;;  %vm530_vm11 = vcmp.ge.f32.partialorder %v405_v33, 0.0  ;;  %v594_v35 = vmul.f32 0.2, %v405_v33 }
  0xda   :  { %v673_v55 = vsel %vm545_vm12, %v443_v36, %v609_v47  ;;  %v689_v56 = vsel %vm561_vm13, %v483_v37, %v625_v48 }
  0xdb   :  { %v642_v40 = vsel %vm514_vm10, %v365_v32, %v578_v34  ;;  %v658_v41 = vsel %vm530_vm11, %v405_v33, %v594_v35 }
  0xdc   :  { %v1049_v43 = vpack.c.bf16 %v642_v40, %v641_v38  ;;  %v1089_v44 = vpack.c.bf16 %v658_v41, %v657_v39 }
  0xdd   :  { %v444_v45 = vpop.f32.mrf.mxu2  ;;  %v484_v46 = vpop.f32.mrf.mxu3 }
  0xde   :  { %1193 = vst [vmem:[%s1555_s3 + $0x18] sm:$0xff] %v1049_v43   ;;  %v445_v49 = vadd.f32 %v1390_v42, %v444_v45  ;;  %v485_v50 = vadd.f32 %v1390_v42, %v484_v46  ;;  %v367_v51 = vpop.f32.mrf.mxu0  ;;  %v407_v52 = vpop.f32.mrf.mxu1 }
  0xdf   :  { %1201 = vst [vmem:[%s1555_s3 + $0x58] sm:$0xff] %v1089_v44   ;;  %v368_v61 = vadd.f32 %v1390_v42, %v367_v51  ;;  %v408_v62 = vadd.f32 %v1390_v42, %v407_v52 }
  0xe0   :  { %vm546_vm14 = vcmp.ge.f32.partialorder %v445_v49, 0.0  ;;  %v610_v53 = vmul.f32 0.2, %v445_v49  ;;  %vm562_vm15 = vcmp.ge.f32.partialorder %v485_v50, 0.0  ;;  %v626_v54 = vmul.f32 0.2, %v485_v50 }
  0xe1   :  { %v579_v3 = vmul.f32 0.2, %v368_v61  ;;  %v595_v4 = vmul.f32 0.2, %v408_v62  ;;  %vm515_vm0 = vcmp.ge.f32.partialorder %v368_v61, 0.0  ;;  %vm531_vm1 = vcmp.ge.f32.partialorder %v408_v62, 0.0 }
  0xe2   :  { %v674_v57 = vsel %vm546_vm14, %v445_v49, %v610_v53  ;;  %v690_v58 = vsel %vm562_vm15, %v485_v50, %v626_v54 }
  0xe3   :  { %v1129_v59 = vpack.c.bf16 %v674_v57, %v673_v55  ;;  %v1169_v60 = vpack.c.bf16 %v690_v58, %v689_v56  ;;  %v643_v11 = vsel %vm515_vm0, %v368_v61, %v579_v3  ;;  %v659_v12 = vsel %vm531_vm1, %v408_v62, %v595_v4 }
  0xe5   :  { %1209 = vst [vmem:[%s1555_s3 + $0x98] sm:$0xff] %v1129_v59   ;;  %v447_v63 = vpop.f32.mrf.mxu2  ;;  %v487_v0 = vpop.f32.mrf.mxu3 }
  0xe6   :  { %1217 = vst [vmem:[%s1555_s3 + $0xd8] sm:$0xff] %v1169_v60   ;;  %v369_v1 = vpop.f32.mrf.mxu0  ;;  %v409_v2 = vpop.f32.mrf.mxu1  ;;  %v448_v9 = vadd.f32 %v1390_v42, %v447_v63  ;;  %v488_v10 = vadd.f32 %v1390_v42, %v487_v0 }
  0xe7   :  { %v370_v5 = vadd.f32 %v1390_v42, %v369_v1  ;;  %v410_v6 = vadd.f32 %v1390_v42, %v409_v2 }
  0xe8   :  { %v611_v19 = vmul.f32 0.2, %v448_v9  ;;  %v627_v20 = vmul.f32 0.2, %v488_v10  ;;  %vm547_vm4 = vcmp.ge.f32.partialorder %v448_v9, 0.0  ;;  %vm563_vm5 = vcmp.ge.f32.partialorder %v488_v10, 0.0 }
  0xe9   :  { %vm516_vm2 = vcmp.ge.f32.partialorder %v370_v5, 0.0  ;;  %v580_v7 = vmul.f32 0.2, %v370_v5  ;;  %vm532_vm3 = vcmp.ge.f32.partialorder %v410_v6, 0.0  ;;  %v596_v8 = vmul.f32 0.2, %v410_v6 }
  0xea   :  { %v675_v27 = vsel %vm547_vm4, %v448_v9, %v611_v19  ;;  %v691_v28 = vsel %vm563_vm5, %v488_v10, %v627_v20 }
  0xeb   :  { %v644_v13 = vsel %vm516_vm2, %v370_v5, %v580_v7  ;;  %v660_v14 = vsel %vm532_vm3, %v410_v6, %v596_v8 }
  0xec   :  { %v1054_v15 = vpack.c.bf16 %v644_v13, %v643_v11  ;;  %v1094_v16 = vpack.c.bf16 %v660_v14, %v659_v12 }
  0xed   :  { %v449_v17 = vpop.f32.mrf.mxu2  ;;  %v489_v18 = vpop.f32.mrf.mxu3 }
  0xee   :  { %1194 = vst [vmem:[%s1555_s3 + $0x20] sm:$0xff] %v1054_v15   ;;  %v450_v21 = vadd.f32 %v1390_v42, %v449_v17  ;;  %v490_v22 = vadd.f32 %v1390_v42, %v489_v18  ;;  %v372_v23 = vpop.f32.mrf.mxu0  ;;  %v412_v24 = vpop.f32.mrf.mxu1 }
  0xef   :  { %1202 = vst [vmem:[%s1555_s3 + $0x60] sm:$0xff] %v1094_v16   ;;  %v373_v33 = vadd.f32 %v1390_v42, %v372_v23  ;;  %v413_v34 = vadd.f32 %v1390_v42, %v412_v24 }
  0xf0   :  { %vm548_vm6 = vcmp.ge.f32.partialorder %v450_v21, 0.0  ;;  %v612_v25 = vmul.f32 0.2, %v450_v21  ;;  %vm564_vm7 = vcmp.ge.f32.partialorder %v490_v22, 0.0  ;;  %v628_v26 = vmul.f32 0.2, %v490_v22 }
  0xf1   :  { %v581_v39 = vmul.f32 0.2, %v373_v33  ;;  %v597_v40 = vmul.f32 0.2, %v413_v34  ;;  %vm517_vm8 = vcmp.ge.f32.partialorder %v373_v33, 0.0  ;;  %vm533_vm9 = vcmp.ge.f32.partialorder %v413_v34, 0.0 }
  0xf2   :  { %v676_v29 = vsel %vm548_vm6, %v450_v21, %v612_v25  ;;  %v692_v30 = vsel %vm564_vm7, %v490_v22, %v628_v26 }
  0xf3   :  { %v1134_v31 = vpack.c.bf16 %v676_v29, %v675_v27  ;;  %v1174_v32 = vpack.c.bf16 %v692_v30, %v691_v28  ;;  %v645_v48 = vsel %vm517_vm8, %v373_v33, %v581_v39  ;;  %v661_v49 = vsel %vm533_vm9, %v413_v34, %v597_v40 }
  0xf5   :  { %1210 = vst [vmem:[%s1555_s3 + $0xa0] sm:$0xff] %v1134_v31   ;;  %v452_v35 = vpop.f32.mrf.mxu2  ;;  %v492_v36 = vpop.f32.mrf.mxu3 }
  0xf6   :  { %1218 = vst [vmem:[%s1555_s3 + $0xe0] sm:$0xff] %v1174_v32   ;;  %v374_v37 = vpop.f32.mrf.mxu0  ;;  %v414_v38 = vpop.f32.mrf.mxu1  ;;  %v453_v46 = vadd.f32 %v1390_v42, %v452_v35  ;;  %v493_v47 = vadd.f32 %v1390_v42, %v492_v36 }
  0xf7   :  { %v375_v41 = vadd.f32 %v1390_v42, %v374_v37  ;;  %v415_v43 = vadd.f32 %v1390_v42, %v414_v38 }
  0xf8   :  { %v613_v56 = vmul.f32 0.2, %v453_v46  ;;  %v629_v57 = vmul.f32 0.2, %v493_v47  ;;  %vm549_vm12 = vcmp.ge.f32.partialorder %v453_v46, 0.0  ;;  %vm565_vm13 = vcmp.ge.f32.partialorder %v493_v47, 0.0 }
  0xf9   :  { %vm518_vm10 = vcmp.ge.f32.partialorder %v375_v41, 0.0  ;;  %v582_v44 = vmul.f32 0.2, %v375_v41  ;;  %vm534_vm11 = vcmp.ge.f32.partialorder %v415_v43, 0.0  ;;  %v598_v45 = vmul.f32 0.2, %v415_v43 }
  0xfa   :  { %v677_v0 = vsel %vm549_vm12, %v453_v46, %v613_v56  ;;  %v693_v1 = vsel %vm565_vm13, %v493_v47, %v629_v57 }
  0xfb   :  { %v646_v50 = vsel %vm518_vm10, %v375_v41, %v582_v44  ;;  %v662_v51 = vsel %vm534_vm11, %v415_v43, %v598_v45 }
  0xfc   :  { %v1059_v52 = vpack.c.bf16 %v646_v50, %v645_v48  ;;  %v1099_v53 = vpack.c.bf16 %v662_v51, %v661_v49 }
  0xfd   :  { %v454_v54 = vpop.f32.mrf.mxu2  ;;  %v494_v55 = vpop.f32.mrf.mxu3 }
  0xfe   :  { %1195 = vst [vmem:[%s1555_s3 + $0x28] sm:$0xff] %v1059_v52   ;;  %v455_v58 = vadd.f32 %v1390_v42, %v454_v54  ;;  %v495_v59 = vadd.f32 %v1390_v42, %v494_v55  ;;  %v377_v60 = vpop.f32.mrf.mxu0  ;;  %v417_v61 = vpop.f32.mrf.mxu1 }
  0xff   :  { %1203 = vst [vmem:[%s1555_s3 + $0x68] sm:$0xff] %v1099_v53   ;;  %v378_v6 = vadd.f32 %v1390_v42, %v377_v60  ;;  %v418_v7 = vadd.f32 %v1390_v42, %v417_v61 }
 0x100   :  { %vm550_vm14 = vcmp.ge.f32.partialorder %v455_v58, 0.0  ;;  %v614_v62 = vmul.f32 0.2, %v455_v58  ;;  %vm566_vm15 = vcmp.ge.f32.partialorder %v495_v59, 0.0  ;;  %v630_v63 = vmul.f32 0.2, %v495_v59 }
 0x101   :  { %v583_v12 = vmul.f32 0.2, %v378_v6  ;;  %v599_v13 = vmul.f32 0.2, %v418_v7  ;;  %vm519_vm0 = vcmp.ge.f32.partialorder %v378_v6, 0.0  ;;  %vm535_vm1 = vcmp.ge.f32.partialorder %v418_v7, 0.0 }
 0x102   :  { %v678_v2 = vsel %vm550_vm14, %v455_v58, %v614_v62  ;;  %v694_v3 = vsel %vm566_vm15, %v495_v59, %v630_v63 }
 0x103   :  { %v1139_v4 = vpack.c.bf16 %v678_v2, %v677_v0  ;;  %v1179_v5 = vpack.c.bf16 %v694_v3, %v693_v1  ;;  %v647_v20 = vsel %vm519_vm0, %v378_v6, %v583_v12  ;;  %v663_v21 = vsel %vm535_vm1, %v418_v7, %v599_v13 }
 0x105   :  { %1211 = vst [vmem:[%s1555_s3 + $0xa8] sm:$0xff] %v1139_v4   ;;  %v457_v8 = vpop.f32.mrf.mxu2  ;;  %v497_v9 = vpop.f32.mrf.mxu3 }
 0x106   :  { %1219 = vst [vmem:[%s1555_s3 + $0xe8] sm:$0xff] %v1179_v5   ;;  %v379_v10 = vpop.f32.mrf.mxu0  ;;  %v419_v11 = vpop.f32.mrf.mxu1  ;;  %v458_v18 = vadd.f32 %v1390_v42, %v457_v8  ;;  %v498_v19 = vadd.f32 %v1390_v42, %v497_v9 }
 0x107   :  { %v380_v14 = vadd.f32 %v1390_v42, %v379_v10  ;;  %v420_v15 = vadd.f32 %v1390_v42, %v419_v11 }
 0x108   :  { %v615_v28 = vmul.f32 0.2, %v458_v18  ;;  %v631_v29 = vmul.f32 0.2, %v498_v19  ;;  %vm551_vm4 = vcmp.ge.f32.partialorder %v458_v18, 0.0  ;;  %vm567_vm5 = vcmp.ge.f32.partialorder %v498_v19, 0.0 }
 0x109   :  { %vm520_vm2 = vcmp.ge.f32.partialorder %v380_v14, 0.0  ;;  %v584_v16 = vmul.f32 0.2, %v380_v14  ;;  %vm536_vm3 = vcmp.ge.f32.partialorder %v420_v15, 0.0  ;;  %v600_v17 = vmul.f32 0.2, %v420_v15 }
 0x10a   :  { %v679_v36 = vsel %vm551_vm4, %v458_v18, %v615_v28  ;;  %v695_v37 = vsel %vm567_vm5, %v498_v19, %v631_v29 }
 0x10b   :  { %v648_v22 = vsel %vm520_vm2, %v380_v14, %v584_v16  ;;  %v664_v23 = vsel %vm536_vm3, %v420_v15, %v600_v17 }
 0x10c   :  { %v1064_v24 = vpack.c.bf16 %v648_v22, %v647_v20  ;;  %v1104_v25 = vpack.c.bf16 %v664_v23, %v663_v21 }
 0x10d   :  { %v459_v26 = vpop.f32.mrf.mxu2  ;;  %v499_v27 = vpop.f32.mrf.mxu3 }
 0x10e   :  { %1196 = vst [vmem:[%s1555_s3 + $0x30] sm:$0xff] %v1064_v24   ;;  %v460_v30 = vadd.f32 %v1390_v42, %v459_v26  ;;  %v500_v31 = vadd.f32 %v1390_v42, %v499_v27  ;;  %v382_v32 = vpop.f32.mrf.mxu0  ;;  %v422_v33 = vpop.f32.mrf.mxu1 }
 0x10f   :  { %1204 = vst [vmem:[%s1555_s3 + $0x70] sm:$0xff] %v1104_v25   ;;  %v383_v43 = vadd.f32 %v1390_v42, %v382_v32  ;;  %v423_v44 = vadd.f32 %v1390_v42, %v422_v33 }
 0x110   :  { %vm552_vm6 = vcmp.ge.f32.partialorder %v460_v30, 0.0  ;;  %v616_v34 = vmul.f32 0.2, %v460_v30  ;;  %vm568_vm7 = vcmp.ge.f32.partialorder %v500_v31, 0.0  ;;  %v632_v35 = vmul.f32 0.2, %v500_v31 }
 0x111   :  { %v585_v49 = vmul.f32 0.2, %v383_v43  ;;  %v601_v50 = vmul.f32 0.2, %v423_v44  ;;  %vm521_vm8 = vcmp.ge.f32.partialorder %v383_v43, 0.0  ;;  %vm537_vm9 = vcmp.ge.f32.partialorder %v423_v44, 0.0 }
 0x112   :  { %v680_v38 = vsel %vm552_vm6, %v460_v30, %v616_v34  ;;  %v696_v39 = vsel %vm568_vm7, %v500_v31, %v632_v35 }
 0x113   :  { %v1144_v40 = vpack.c.bf16 %v680_v38, %v679_v36  ;;  %v1184_v41 = vpack.c.bf16 %v696_v39, %v695_v37  ;;  %v649_v57 = vsel %vm521_vm8, %v383_v43, %v585_v49  ;;  %v665_v58 = vsel %vm537_vm9, %v423_v44, %v601_v50 }
 0x115   :  { %1212 = vst [vmem:[%s1555_s3 + $0xb0] sm:$0xff] %v1144_v40   ;;  %v462_v45 = vpop.f32.mrf.mxu2  ;;  %v502_v46 = vpop.f32.mrf.mxu3 }
 0x116   :  { %1220 = vst [vmem:[%s1555_s3 + $0xf0] sm:$0xff] %v1184_v41   ;;  %v384_v47 = vpop.f32.mrf.mxu0  ;;  %v424_v48 = vpop.f32.mrf.mxu1  ;;  %v463_v55 = vadd.f32 %v1390_v42, %v462_v45  ;;  %v503_v56 = vadd.f32 %v1390_v42, %v502_v46 }
 0x117   :  { %v385_v51 = vadd.f32 %v1390_v42, %v384_v47  ;;  %v425_v52 = vadd.f32 %v1390_v42, %v424_v48 }
 0x118   :  { %v617_v1 = vmul.f32 0.2, %v463_v55  ;;  %v633_v2 = vmul.f32 0.2, %v503_v56  ;;  %vm553_vm12 = vcmp.ge.f32.partialorder %v463_v55, 0.0  ;;  %vm569_vm13 = vcmp.ge.f32.partialorder %v503_v56, 0.0 }
 0x119   :  { %vm522_vm10 = vcmp.ge.f32.partialorder %v385_v51, 0.0  ;;  %v586_v53 = vmul.f32 0.2, %v385_v51  ;;  %vm538_vm11 = vcmp.ge.f32.partialorder %v425_v52, 0.0  ;;  %v602_v54 = vmul.f32 0.2, %v425_v52 }
 0x11a   :  { %v681_v7 = vsel %vm553_vm12, %v463_v55, %v617_v1  ;;  %v697_v8 = vsel %vm569_vm13, %v503_v56, %v633_v2 }
 0x11b   :  { %v650_v59 = vsel %vm522_vm10, %v385_v51, %v586_v53  ;;  %v666_v60 = vsel %vm538_vm11, %v425_v52, %v602_v54 }
 0x11c   :  { %v1069_v61 = vpack.c.bf16 %v650_v59, %v649_v57  ;;  %v1109_v62 = vpack.c.bf16 %v666_v60, %v665_v58 }
 0x11d   :  { %v464_v63 = vpop.f32.mrf.mxu2  ;;  %v504_v0 = vpop.f32.mrf.mxu3 }
 0x11e   :  { %1197 = vst [vmem:[%s1555_s3 + $0x38] sm:$0xff] %v1069_v61   ;;  %v465_v3 = vadd.f32 %v1390_v42, %v464_v63  ;;  %v505_v4 = vadd.f32 %v1390_v42, %v504_v0 }
 0x11f   :  { %1205 = vst [vmem:[%s1555_s3 + $0x78] sm:$0xff] %v1109_v62  }
 0x120   :  { %vm554_vm14 = vcmp.ge.f32.partialorder %v465_v3, 0.0  ;;  %v618_v5 = vmul.f32 0.2, %v465_v3  ;;  %vm570_vm15 = vcmp.ge.f32.partialorder %v505_v4, 0.0  ;;  %v634_v6 = vmul.f32 0.2, %v505_v4 }
 0x122   :  { %v682_v9 = vsel %vm554_vm14, %v465_v3, %v618_v5  ;;  %v698_v10 = vsel %vm570_vm15, %v505_v4, %v634_v6 }
 0x123   :  { %v1149_v11 = vpack.c.bf16 %v682_v9, %v681_v7  ;;  %v1189_v12 = vpack.c.bf16 %v698_v10, %v697_v8 }
 0x125   :  { %1213 = vst [vmem:[%s1555_s3 + $0xb8] sm:$0xff] %v1149_v11  }
 0x126   :  { %1221 = vst [vmem:[%s1555_s3 + $0xf8] sm:$0xff] %v1189_v12  }

// kernel: _lambda_.6
= control target key start
LH: loop header
LB: loop body
LE: loop exit
PB: predicated region body
PF: predicated region fallthrough
CT: control target
= control target key end

     0   :  { %s1109_s1 = inlined_call_operand.vmem [shape: bf16[256,128], index: 1, kind: input, shape index: {}]   ;;  %s1110_s0 = inlined_call_operand.vmem [shape: bf16[128,256], index: 0, kind: input, shape index: {}]   ;;  %s1111_s3 = inlined_call_operand.vmem [shape: f32[1,128], index: 3, kind: input, shape index: {}]   ;;  %s1112_s2 = inlined_call_operand.vmem [shape: f32[1,128], index: 2, kind: input, shape index: {}]   ;;  %s1113_s4 = inlined_call_operand.vmem [shape: bf16[128,128], index: 4, kind: output, shape index: {}]  }
   0x1   :  { %v705_v0 = vld [vmem:[%s1109_s1 + $0x38] sm:$0xff]  ;;  %v704_v2 = vld [vmem:[%s1109_s1 + $0x30] sm:$0xff]  ;;  %v703_v4 = vld [vmem:[%s1109_s1 + $0x28] sm:$0xff] }
   0x2   :  { %v713_v1 = vld [vmem:[%s1109_s1 + $0x78] sm:$0xff]  ;;  %241 = vmatpush.bf16.msra.mxu0 %v705_v0  ;;  %v712_v3 = vld [vmem:[%s1109_s1 + $0x70] sm:$0xff]  ;;  %761 = vmatpush.bf16.msra.mxu2 %v705_v0  ;;  %v711_v5 = vld [vmem:[%s1109_s1 + $0x68] sm:$0xff] }
   0x3   :  { %290 = vmatpush.bf16.msra.mxu1 %v713_v1  ;;  %769 = vmatpush.bf16.msra.mxu3 %v713_v1  ;;  %v702_v6 = vld [vmem:[%s1109_s1 + $0x20] sm:$0xff]  ;;  %v701_v8 = vld [vmem:[%s1109_s1 + $0x18] sm:$0xff]  ;;  %v700_v10 = vld [vmem:[%s1109_s1 + $0x10] sm:$0xff] }
   0x4   :  { %v710_v7 = vld [vmem:[%s1109_s1 + $0x60] sm:$0xff]  ;;  %v709_v9 = vld [vmem:[%s1109_s1 + $0x58] sm:$0xff]  ;;  %v708_v11 = vld [vmem:[%s1109_s1 + $0x50] sm:$0xff] }
   0x5   :  { %v699_v12 = vld [vmem:[%s1109_s1 + $0x8] sm:$0xff]  ;;  %v698_v14 = vld [vmem:[%s1109_s1] sm:$0xff]  ;;  %v564_v28 = vld [vmem:[%s1110_s0 + $0x10] sm:$0xf] }
   0x6   :  { %242 = vmatpush.bf16.msra.mxu0 %v704_v2  ;;  %762 = vmatpush.bf16.msra.mxu2 %v704_v2  ;;  %v707_v13 = vld [vmem:[%s1109_s1 + $0x48] sm:$0xff]  ;;  %v706_v15 = vld [vmem:[%s1109_s1 + $0x40] sm:$0xff]  ;;  %v685_v29 = vld [vmem:[%s1110_s0 + $0x14] sm:$0xf0] }
   0x7   :  { %291 = vmatpush.bf16.msra.mxu1 %v712_v3  ;;  %770 = vmatpush.bf16.msra.mxu3 %v712_v3  ;;  %v556_v16 = vld [vmem:[%s1110_s0] sm:$0xf]  ;;  %v683_v17 = vld [vmem:[%s1110_s0 + $0x4] sm:$0xf0]  ;;  %v682_v18 = vld [vmem:[%s1110_s0 + $0x4] sm:$0xf]  ;;  %v565_v36 = vor.u32 %v685_v29, %v564_v28 }
   0x8   :  { %v558_v19 = vld [vmem:[%s1110_s0 + $0x8] sm:$0xf0]  ;;  %v588_v20 = vld [vmem:[%s1110_s0 + $0x40] sm:$0xf]  ;;  %v691_v21 = vld [vmem:[%s1110_s0 + $0x44] sm:$0xf0]  ;;  %v557_v24 = vor.u32 %v683_v17, %v556_v16 }
   0x9   :  { %v690_v22 = vld [vmem:[%s1110_s0 + $0x44] sm:$0xf]  ;;  %v590_v23 = vld [vmem:[%s1110_s0 + $0x48] sm:$0xf0]  ;;  %v561_v25 = vor.u32 %v682_v18, %v558_v19  ;;  %v589_v26 = vor.u32 %v691_v21, %v588_v20  ;;  %v684_v30 = vld [vmem:[%s1110_s0 + $0x14] sm:$0xf] }
   0xa   :  { %243 = vmatpush.bf16.msra.mxu0 %v703_v4  ;;  %763 = vmatpush.bf16.msra.mxu2 %v703_v4  ;;  %v593_v27 = vor.u32 %v690_v22, %v590_v23  ;;  %v566_v31 = vld [vmem:[%s1110_s0 + $0x18] sm:$0xf0]  ;;  %v596_v32 = vld [vmem:[%s1110_s0 + $0x50] sm:$0xf]  ;;  %v693_v33 = vld [vmem:[%s1110_s0 + $0x54] sm:$0xf0] }
   0xb   :  { %292 = vmatpush.bf16.msra.mxu1 %v711_v5  ;;  %771 = vmatpush.bf16.msra.mxu3 %v711_v5  ;;  %v692_v34 = vld [vmem:[%s1110_s0 + $0x54] sm:$0xf]  ;;  %v598_v35 = vld [vmem:[%s1110_s0 + $0x58] sm:$0xf0]  ;;  %v569_v37 = vor.u32 %v684_v30, %v566_v31  ;;  %v597_v38 = vor.u32 %v693_v33, %v596_v32  ;;  %v572_v40 = vld [vmem:[%s1110_s0 + $0x20] sm:$0xf] }
   0xc   :  { %v601_v39 = vor.u32 %v692_v34, %v598_v35  ;;  %v687_v41 = vld [vmem:[%s1110_s0 + $0x24] sm:$0xf0]  ;;  %v686_v42 = vld [vmem:[%s1110_s0 + $0x24] sm:$0xf]  ;;  %v574_v43 = vld [vmem:[%s1110_s0 + $0x28] sm:$0xf0] }
   0xd   :  { %v604_v44 = vld [vmem:[%s1110_s0 + $0x60] sm:$0xf]  ;;  %v695_v45 = vld [vmem:[%s1110_s0 + $0x64] sm:$0xf0]  ;;  %v694_v46 = vld [vmem:[%s1110_s0 + $0x64] sm:$0xf]  ;;  %v573_v48 = vor.u32 %v687_v41, %v572_v40  ;;  %v577_v49 = vor.u32 %v686_v42, %v574_v43 }
   0xe   :  { %244 = vmatpush.bf16.msra.mxu0 %v702_v6  ;;  %764 = vmatpush.bf16.msra.mxu2 %v702_v6  ;;  %v606_v47 = vld [vmem:[%s1110_s0 + $0x68] sm:$0xf0]  ;;  %v605_v50 = vor.u32 %v695_v45, %v604_v44  ;;  %v580_v52 = vld [vmem:[%s1110_s0 + $0x30] sm:$0xf]  ;;  %v689_v53 = vld [vmem:[%s1110_s0 + $0x34] sm:$0xf0] }
   0xf   :  { %293 = vmatpush.bf16.msra.mxu1 %v710_v7  ;;  %772 = vmatpush.bf16.msra.mxu3 %v710_v7  ;;  %v609_v51 = vor.u32 %v694_v46, %v606_v47  ;;  %v688_v54 = vld [vmem:[%s1110_s0 + $0x34] sm:$0xf]  ;;  %v582_v55 = vld [vmem:[%s1110_s0 + $0x38] sm:$0xf0]  ;;  %v612_v56 = vld [vmem:[%s1110_s0 + $0x70] sm:$0xf]  ;;  %v581_v60 = vor.u32 %v689_v53, %v580_v52 }
  0x10   :  { %v697_v57 = vld [vmem:[%s1110_s0 + $0x74] sm:$0xf0]  ;;  %v696_v58 = vld [vmem:[%s1110_s0 + $0x74] sm:$0xf]  ;;  %v614_v59 = vld [vmem:[%s1110_s0 + $0x78] sm:$0xf0]  ;;  %v585_v61 = vor.u32 %v688_v54, %v582_v55 }
  0x11   :  { %v613_v62 = vor.u32 %v697_v57, %v612_v56  ;;  %v617_v63 = vor.u32 %v696_v58, %v614_v59 }
  0x12   :  { %245 = vmatpush.bf16.msra.mxu0 %v701_v8  ;;  %765 = vmatpush.bf16.msra.mxu2 %v701_v8 }
  0x13   :  { %294 = vmatpush.bf16.msra.mxu1 %v709_v9  ;;  %773 = vmatpush.bf16.msra.mxu3 %v709_v9 }
  0x16   :  { %246 = vmatpush.bf16.msra.mxu0 %v700_v10  ;;  %766 = vmatpush.bf16.msra.mxu2 %v700_v10 }
  0x17   :  { %295 = vmatpush.bf16.msra.mxu1 %v708_v11  ;;  %774 = vmatpush.bf16.msra.mxu3 %v708_v11 }
  0x1a   :  { %247 = vmatpush.bf16.msra.mxu0 %v699_v12  ;;  %767 = vmatpush.bf16.msra.mxu2 %v699_v12 }
  0x1b   :  { %296 = vmatpush.bf16.msra.mxu1 %v707_v13  ;;  %775 = vmatpush.bf16.msra.mxu3 %v707_v13 }
  0x1e   :  { %248 = vmatpush.bf16.msra.mxu0 %v698_v14  ;;  %768 = vmatpush.bf16.msra.mxu2 %v698_v14 }
  0x1f   :  { %297 = vmatpush.bf16.msra.mxu1 %v706_v15  ;;  %776 = vmatpush.bf16.msra.mxu3 %v706_v15 }
  0x21   :  { %249 = vmatmul.bf16.vlgmr.msra.gmra.mxu0 %v557_v24  ;;  %269 = vmatmul.bf16.vlgmr.msra.gmra.mxu2 %v589_v26 }
  0x22   :  { %298 = vmatmul.bf16.vlgmr.msra.gmra.mxu1 %v561_v25  ;;  %318 = vmatmul.bf16.vlgmr.msra.gmra.mxu3 %v593_v27 }
  0x31   :  { %254 = vmatmul.bf16.gmra.mxu0 %v565_v36  ;;  %274 = vmatmul.bf16.gmra.mxu2 %v597_v38 }
  0x32   :  { %303 = vmatmul.bf16.gmra.mxu1 %v569_v37  ;;  %323 = vmatmul.bf16.gmra.mxu3 %v601_v39 }
  0x41   :  { %259 = vmatmul.bf16.gmra.mxu0 %v573_v48  ;;  %279 = vmatmul.bf16.gmra.mxu2 %v605_v50 }
  0x42   :  { %308 = vmatmul.bf16.gmra.mxu1 %v577_v49  ;;  %328 = vmatmul.bf16.gmra.mxu3 %v609_v51 }
  0x51   :  { %264 = vmatmul.bf16.gmra.mxu0 %v581_v60  ;;  %284 = vmatmul.bf16.gmra.mxu2 %v613_v62 }
  0x52   :  { %313 = vmatmul.bf16.gmra.mxu1 %v585_v61  ;;  %333 = vmatmul.bf16.gmra.mxu3 %v617_v63 }
  0x9e   :  { %v250_v0 = vpop.f32.mrf.mxu0 }
  0x9f   :  { %v299_v1 = vpop.f32.mrf.mxu1 }
  0xa0   :  { %v951_v23 = vadd.f32 %v299_v1, %v250_v0 }
  0xa2   :  { %v361_v27 = vmul.f32 %v951_v23, %v951_v23 }
  0xa4   :  { %v270_v2 = vpop.f32.mrf.mxu2 }
  0xa5   :  { %v319_v3 = vpop.f32.mrf.mxu3 }
  0xa6   :  { %v252_v4 = vpop.f32.mrf.mxu0  ;;  %v983_v51 = vadd.f32 %v319_v3, %v270_v2 }
  0xa7   :  { %v301_v5 = vpop.f32.mrf.mxu1 }
  0xa8   :  { %v949_v22 = vadd.f32 %v301_v5, %v252_v4  ;;  %v369_v61 = vmul.f32 %v983_v51, %v983_v51 }
  0xaa   :  { %v362_v25 = vmul.f32 %v949_v22, %v949_v22  ;;  %v339_v28 = vadd.f32 %v949_v22, %v951_v23 }
  0xac   :  { %v272_v6 = vpop.f32.mrf.mxu2  ;;  %v377_v35 = vadd.f32 %v362_v25, %v361_v27 }
  0xad   :  { %v321_v7 = vpop.f32.mrf.mxu3 }
  0xae   :  { %v255_v8 = vpop.f32.mrf.mxu0  ;;  %v988_v57 = vadd.f32 %v321_v7, %v272_v6 }
  0xaf   :  { %v304_v9 = vpop.f32.mrf.mxu1 }
  0xb0   :  { %v953_v24 = vadd.f32 %v304_v9, %v255_v8  ;;  %v370_v1 = vmul.f32 %v988_v57, %v988_v57 }
  0xb2   :  { %v363_v29 = vmul.f32 %v953_v24, %v953_v24  ;;  %v340_v36 = vadd.f32 %v339_v28, %v953_v24 }
  0xb4   :  { %v275_v10 = vpop.f32.mrf.mxu2  ;;  %v378_v39 = vadd.f32 %v377_v35, %v363_v29 }
  0xb5   :  { %v324_v11 = vpop.f32.mrf.mxu3 }
  0xb6   :  { %v257_v12 = vpop.f32.mrf.mxu0  ;;  %v995_v62 = vadd.f32 %v324_v11, %v275_v10 }
  0xb7   :  { %v306_v13 = vpop.f32.mrf.mxu1 }
  0xb8   :  { %v957_v26 = vadd.f32 %v306_v13, %v257_v12  ;;  %v371_v5 = vmul.f32 %v995_v62, %v995_v62 }
  0xba   :  { %v364_v37 = vmul.f32 %v957_v26, %v957_v26  ;;  %v341_v40 = vadd.f32 %v340_v36, %v957_v26 }
  0xbc   :  { %v277_v14 = vpop.f32.mrf.mxu2  ;;  %v379_v43 = vadd.f32 %v378_v39, %v364_v37 }
  0xbd   :  { %v326_v15 = vpop.f32.mrf.mxu3 }
  0xbe   :  { %v260_v16 = vpop.f32.mrf.mxu0  ;;  %v1000_v2 = vadd.f32 %v326_v15, %v277_v14 }
  0xbf   :  { %v309_v17 = vpop.f32.mrf.mxu1 }
  0xc0   :  { %v965_v30 = vadd.f32 %v309_v17, %v260_v16  ;;  %v372_v9 = vmul.f32 %v1000_v2, %v1000_v2 }
  0xc2   :  { %v365_v41 = vmul.f32 %v965_v30, %v965_v30  ;;  %v342_v44 = vadd.f32 %v341_v40, %v965_v30 }
  0xc4   :  { %v280_v18 = vpop.f32.mrf.mxu2  ;;  %v380_v46 = vadd.f32 %v379_v43, %v365_v41 }
  0xc5   :  { %v329_v19 = vpop.f32.mrf.mxu3 }
  0xc6   :  { %v262_v20 = vpop.f32.mrf.mxu0  ;;  %v1005_v6 = vadd.f32 %v329_v19, %v280_v18 }
  0xc7   :  { %v311_v21 = vpop.f32.mrf.mxu1 }
  0xc8   :  { %v970_v38 = vadd.f32 %v311_v21, %v262_v20  ;;  %v373_v15 = vmul.f32 %v1005_v6, %v1005_v6 }
  0xca   :  { %v366_v45 = vmul.f32 %v970_v38, %v970_v38  ;;  %v343_v47 = vadd.f32 %v342_v44, %v970_v38 }
  0xcc   :  { %v282_v31 = vpop.f32.mrf.mxu2  ;;  %v381_v52 = vadd.f32 %v380_v46, %v366_v45 }
  0xcd   :  { %v331_v32 = vpop.f32.mrf.mxu3 }
  0xce   :  { %v265_v33 = vpop.f32.mrf.mxu0  ;;  %v1010_v10 = vadd.f32 %v331_v32, %v282_v31 }
  0xcf   :  { %v314_v34 = vpop.f32.mrf.mxu1 }
  0xd0   :  { %v975_v42 = vadd.f32 %v314_v34, %v265_v33  ;;  %v374_v19 = vmul.f32 %v1010_v10, %v1010_v10 }
  0xd2   :  { %v367_v48 = vmul.f32 %v975_v42, %v975_v42  ;;  %v344_v53 = vadd.f32 %v343_v47, %v975_v42 }
  0xd4   :  { %v285_v55 = vpop.f32.mrf.mxu2  ;;  %v382_v58 = vadd.f32 %v381_v52, %v367_v48 }
  0xd5   :  { %v334_v56 = vpop.f32.mrf.mxu3 }
  0xd6   :  { %v267_v49 = vpop.f32.mrf.mxu0  ;;  %v1015_v16 = vadd.f32 %v334_v56, %v285_v55 }
  0xd7   :  { %v316_v50 = vpop.f32.mrf.mxu1 }
  0xd8   :  { %v986_v54 = vadd.f32 %v316_v50, %v267_v49  ;;  %v375_v28 = vmul.f32 %v1015_v16, %v1015_v16 }
  0xda   :  { %v345_v59 = vadd.f32 %v344_v53, %v986_v54  ;;  %v368_v60 = vmul.f32 %v986_v54, %v986_v54 }
  0xdc   :  { %v346_v63 = vadd.f32 %v345_v59, %v983_v51  ;;  %v383_v0 = vadd.f32 %v382_v58, %v368_v60  ;;  %v287_v13 = vpop.f32.mrf.mxu2 }
  0xdd   :  { %v336_v14 = vpop.f32.mrf.mxu3 }
  0xde   :  { %v347_v3 = vadd.f32 %v346_v63, %v988_v57  ;;  %v384_v4 = vadd.f32 %v383_v0, %v369_v61  ;;  %v1021_v25 = vadd.f32 %v336_v14, %v287_v13  ;;  %v402_v0 = vld [vmem:[%s1112_s2] sm:$0x1] }
  0xe0   :  { %v348_v7 = vadd.f32 %v347_v3, %v995_v62  ;;  %v385_v8 = vadd.f32 %v384_v4, %v370_v1  ;;  %v376_v33 = vmul.f32 %v1021_v25, %v1021_v25 }
  0xe2   :  { %v386_v11 = vadd.f32 %v385_v8, %v371_v5  ;;  %v349_v12 = vadd.f32 %v348_v7, %v1000_v2 }
  0xe4   :  { %v350_v17 = vadd.f32 %v349_v12, %v1005_v6  ;;  %v387_v18 = vadd.f32 %v386_v11, %v372_v9 }
  0xe6   :  { %v351_v20 = vadd.f32 %v350_v17, %v1010_v10  ;;  %v388_v21 = vadd.f32 %v387_v18, %v373_v15 }
  0xe8   :  { %v352_v27 = vadd.f32 %v351_v20, %v1015_v16  ;;  %v389_v29 = vadd.f32 %v388_v21, %v374_v19 }
  0xea   :  { %v390_v31 = vadd.f32 %v389_v29, %v375_v28  ;;  %v353_v32 = vadd.f32 %v352_v27, %v1021_v25 }
  0xec   :  { %v354_v34 = vrot.slane %v353_v32, 4  ;;  %v391_v35 = vadd.f32 %v390_v31, %v376_v33 }
  0xee   :  { %v355_v36 = vadd.f32 %v354_v34, %v353_v32  ;;  %v392_v37 = vrot.slane %v391_v35, 4 }
  0xf0   :  { %v356_v39 = vrot.slane %v355_v36, 2  ;;  %v393_v40 = vadd.f32 %v392_v37, %v391_v35 }
  0xf2   :  { %v357_v41 = vadd.f32 %v356_v39, %v355_v36  ;;  %v394_v43 = vrot.slane %v393_v40, 2 }
  0xf4   :  { %v358_v44 = vrot.slane %v357_v41, 1  ;;  %v395_v45 = vadd.f32 %v394_v43, %v393_v40 }
  0xf6   :  { %v359_v46 = vadd.f32 %v358_v44, %v357_v41  ;;  %v396_v47 = vrot.slane %v395_v45, 1 }
  0xf8   :  { %v1029_v48 = vmul.f32 0.0078125, %v359_v46  ;;  %v397_v49 = vadd.f32 %v396_v47, %v395_v45 }
  0xfa   :  { %v398_v50 = vmul.f32 0.0078125, %v397_v49  ;;  %v399_v52 = vmul.f32 %v1029_v48, %v1029_v48  ;;  %v415_v5 = vsub.f32 %v951_v23, %v1029_v48  ;;  %v416_v7 = vsub.f32 %v949_v22, %v1029_v48 }
  0xfb   :  { %v417_v8 = vsub.f32 %v953_v24, %v1029_v48  ;;  %v418_v9 = vsub.f32 %v957_v26, %v1029_v48  ;;  %v419_v11 = vsub.f32 %v965_v30, %v1029_v48  ;;  %v420_v12 = vsub.f32 %v970_v38, %v1029_v48 }
  0xfc   :  { %v400_v53 = vsub.f32 %v398_v50, %v399_v52  ;;  %v421_v13 = vsub.f32 %v975_v42, %v1029_v48  ;;  %v422_v23 = vsub.f32 %v986_v54, %v1029_v48  ;;  %v423_v22 = vsub.f32 %v983_v51, %v1029_v48 }
  0xfd   :  { %v424_v24 = vsub.f32 %v988_v57, %v1029_v48  ;;  %v425_v26 = vsub.f32 %v995_v62, %v1029_v48  ;;  %v426_v30 = vsub.f32 %v1000_v2, %v1029_v48  ;;  %v427_v38 = vsub.f32 %v1005_v6, %v1029_v48  ;;  %v777_v57 = vld [vmem:[%s1111_s3] ss:$0 sm:$0xff] }
  0xfe   :  { %v401_v55 = vmax.f32 %v400_v53, 0.0  ;;  %v428_v42 = vsub.f32 %v1010_v10, %v1029_v48  ;;  %v429_v54 = vsub.f32 %v1015_v16, %v1029_v48  ;;  %v430_v10 = vsub.f32 %v1021_v25, %v1029_v48 }
 0x100   :  { %v403_v56 = vadd.f32 1e-05, %v401_v55 }
 0x102   :  { %778 = vrsqrt.f32 %v403_v56  ;;  %vm410_vm1 = vweird.f32 %v403_v56 }
 0x108   :  { %v779_v58 = vpop.eup %778 }
 0x109   :  { %v405_v59 = vmul.f32 %v779_v58, %v403_v56  ;;  %vm411_vm0 = vweird.f32 %v779_v58 }
 0x10a   :  { %vm412_vm2 = vmor %vm410_vm1, %vm411_vm0 }
 0x10b   :  { %v406_v60 = vmul.f32 %v779_v58, %v405_v59 }
 0x10d   :  { %v407_v61 = vmul.f32 0.5, %v406_v60 }
 0x10f   :  { %v408_v63 = vsub.f32 1.5, %v407_v61 }
 0x111   :  { %v409_v1 = vmul.f32 %v779_v58, %v408_v63 }
 0x113   :  { %v413_v3 = vsel %vm412_vm2, %v779_v58, %v409_v1 }
 0x114   :  { %v414_v4 = vmul.f32 %v413_v3, %v402_v0 }
 0x116   :  { %v432_v14 = vperm.slane %v414_v4, 0 }
 0x118   :  { %v434_v15 = vmul.f32 %v432_v14, %v415_v5  ;;  %v435_v51 = vmul.f32 %v432_v14, %v416_v7  ;;  %v436_v17 = vmul.f32 %v432_v14, %v417_v8  ;;  %v437_v18 = vmul.f32 %v432_v14, %v418_v9 }
 0x119   :  { %v438_v62 = vmul.f32 %v432_v14, %v419_v11  ;;  %v439_v19 = vmul.f32 %v432_v14, %v420_v12  ;;  %v440_v2 = vmul.f32 %v432_v14, %v421_v13  ;;  %v441_v20 = vmul.f32 %v432_v14, %v422_v23 }
 0x11a   :  { %v442_v21 = vmul.f32 %v432_v14, %v423_v22  ;;  %v443_v6 = vmul.f32 %v432_v14, %v424_v24  ;;  %v444_v27 = vmul.f32 %v432_v14, %v425_v26  ;;  %v445_v28 = vmul.f32 %v432_v14, %v426_v30 }
 0x11b   :  { %v446_v16 = vmul.f32 %v432_v14, %v427_v38  ;;  %v447_v29 = vmul.f32 %v432_v14, %v428_v42  ;;  %v448_v31 = vmul.f32 %v432_v14, %v429_v54  ;;  %v454_v32 = vadd.f32 %v777_v57, %v434_v15 }
 0x11c   :  { %v455_v33 = vadd.f32 %v777_v57, %v435_v51  ;;  %v456_v34 = vadd.f32 %v777_v57, %v436_v17  ;;  %v457_v35 = vadd.f32 %v777_v57, %v437_v18  ;;  %v458_v36 = vadd.f32 %v777_v57, %v438_v62 }
 0x11d   :  { %v459_v37 = vadd.f32 %v777_v57, %v439_v19  ;;  %v460_v39 = vadd.f32 %v777_v57, %v440_v2  ;;  %v461_v40 = vadd.f32 %v777_v57, %v441_v20  ;;  %v462_v41 = vadd.f32 %v777_v57, %v442_v21 }
 0x11e   :  { %v463_v43 = vadd.f32 %v777_v57, %v443_v6  ;;  %v464_v44 = vadd.f32 %v777_v57, %v444_v27  ;;  %v465_v45 = vadd.f32 %v777_v57, %v445_v28  ;;  %v449_v46 = vmul.f32 %v432_v14, %v430_v10 }
 0x11f   :  { %v466_v47 = vadd.f32 %v777_v57, %v446_v16  ;;  %v467_v49 = vadd.f32 %v777_v57, %v447_v29  ;;  %v468_v50 = vadd.f32 %v777_v57, %v448_v31  ;;  %vm470_vm3 = vcmp.ge.f32.partialorder %v454_v32, 0.0 }
 0x120   :  { %vm471_vm4 = vcmp.ge.f32.partialorder %v455_v33, 0.0  ;;  %vm472_vm5 = vcmp.ge.f32.partialorder %v456_v34, 0.0  ;;  %vm473_vm6 = vcmp.ge.f32.partialorder %v457_v35, 0.0  ;;  %vm474_vm7 = vcmp.ge.f32.partialorder %v458_v36, 0.0 }
 0x121   :  { %vm475_vm8 = vcmp.ge.f32.partialorder %v459_v37, 0.0  ;;  %vm476_vm9 = vcmp.ge.f32.partialorder %v460_v39, 0.0  ;;  %vm477_vm10 = vcmp.ge.f32.partialorder %v461_v40, 0.0  ;;  %vm478_vm11 = vcmp.ge.f32.partialorder %v462_v41, 0.0 }
 0x122   :  { %vm479_vm12 = vcmp.ge.f32.partialorder %v463_v43, 0.0  ;;  %vm480_vm13 = vcmp.ge.f32.partialorder %v464_v44, 0.0  ;;  %vm481_vm14 = vcmp.ge.f32.partialorder %v465_v45, 0.0  ;;  %vm482_vm15 = vcmp.ge.f32.partialorder %v466_v47, 0.0 }
 0x123   :  { %vm483_vm0 = vcmp.ge.f32.partialorder %v467_v49, 0.0  ;;  %v486_v25 = vmul.f32 0.2, %v454_v32  ;;  %v487_v48 = vmul.f32 0.2, %v455_v33  ;;  %v469_v52 = vadd.f32 %v777_v57, %v449_v46 }
 0x124   :  { %v488_v53 = vmul.f32 0.2, %v456_v34  ;;  %v489_v55 = vmul.f32 0.2, %v457_v35  ;;  %v490_v56 = vmul.f32 0.2, %v458_v36 }
 0x125   :  { %v491_v58 = vmul.f32 0.2, %v459_v37  ;;  %v492_v59 = vmul.f32 0.2, %v460_v39  ;;  %v493_v60 = vmul.f32 0.2, %v461_v40  ;;  %v502_v1 = vsel %vm470_vm3, %v454_v32, %v486_v25 }
 0x126   :  { %v494_v61 = vmul.f32 0.2, %v462_v41  ;;  %v495_v63 = vmul.f32 0.2, %v463_v43  ;;  %v496_v0 = vmul.f32 0.2, %v464_v44  ;;  %v503_v7 = vsel %vm471_vm4, %v455_v33, %v487_v48 }
 0x127   :  { %v497_v3 = vmul.f32 0.2, %v465_v45  ;;  %v498_v4 = vmul.f32 0.2, %v466_v47  ;;  %v499_v5 = vmul.f32 0.2, %v467_v49  ;;  %v504_v11 = vsel %vm472_vm5, %v456_v34, %v488_v53 }
 0x128   :  { %v500_v8 = vmul.f32 0.2, %v468_v50  ;;  %v501_v9 = vmul.f32 0.2, %v469_v52  ;;  %v505_v12 = vsel %vm473_vm6, %v457_v35, %v489_v55  ;;  %v506_v13 = vsel %vm474_vm7, %v458_v36, %v490_v56 }
 0x129   :  { %v507_v14 = vsel %vm475_vm8, %v459_v37, %v491_v58  ;;  %v508_v23 = vsel %vm476_vm9, %v460_v39, %v492_v59  ;;  %v509_v22 = vsel %vm477_vm10, %v461_v40, %v493_v60  ;;  %vm484_vm1 = vcmp.ge.f32.partialorder %v468_v50, 0.0 }
 0x12a   :  { %vm485_vm2 = vcmp.ge.f32.partialorder %v469_v52, 0.0  ;;  %v510_v24 = vsel %vm478_vm11, %v462_v41, %v494_v61  ;;  %v511_v26 = vsel %vm479_vm12, %v463_v43, %v495_v63  ;;  %v512_v30 = vsel %vm480_vm13, %v464_v44, %v496_v0 }
 0x12b   :  { %v513_v38 = vsel %vm481_vm14, %v465_v45, %v497_v3  ;;  %v717_v42 = vpack.c.bf16 %v503_v7, %v502_v1  ;;  %v722_v54 = vpack.c.bf16 %v505_v12, %v504_v11  ;;  %v514_v15 = vsel %vm482_vm15, %v466_v47, %v498_v4 }
 0x12c   :  { %v515_v51 = vsel %vm483_vm0, %v467_v49, %v499_v5  ;;  %v727_v17 = vpack.c.bf16 %v507_v14, %v506_v13  ;;  %v732_v18 = vpack.c.bf16 %v509_v22, %v508_v23  ;;  %v516_v57 = vsel %vm484_vm1, %v468_v50, %v500_v8 }
 0x12d   :  { %v517_v62 = vsel %vm485_vm2, %v469_v52, %v501_v9  ;;  %718 = vst [vmem:[%s1113_s4] sm:$0xff] %v717_v42   ;;  %v737_v19 = vpack.c.bf16 %v511_v26, %v510_v24  ;;  %v742_v2 = vpack.c.bf16 %v513_v38, %v512_v30  ;;  %v747_v20 = vpack.c.bf16 %v515_v51, %v514_v15 }
 0x12e   :  { %754 = vst [vmem:[%s1113_s4 + $0x8] sm:$0xff] %v722_v54   ;;  %v752_v21 = vpack.c.bf16 %v517_v62, %v516_v57 }
 0x12f   :  { %755 = vst [vmem:[%s1113_s4 + $0x10] sm:$0xff] %v727_v17  }
 0x130   :  { %756 = vst [vmem:[%s1113_s4 + $0x18] sm:$0xff] %v732_v18  }
 0x131   :  { %757 = vst [vmem:[%s1113_s4 + $0x20] sm:$0xff] %v737_v19  }
 0x132   :  { %758 = vst [vmem:[%s1113_s4 + $0x28] sm:$0xff] %v742_v2  }
 0x133   :  { %759 = vst [vmem:[%s1113_s4 + $0x30] sm:$0xff] %v747_v20  }
 0x134   :  { %760 = vst [vmem:[%s1113_s4 + $0x38] sm:$0xff] %v752_v21  }

// kernel: _lambda_.7
= control target key start
LH: loop header
LB: loop body
LE: loop exit
PB: predicated region body
PF: predicated region fallthrough
CT: control target
= control target key end

     0   :  { %s875_s1 = inlined_call_operand.vmem [shape: bf16[512,128], index: 1, kind: input, shape index: {}]   ;;  %s876_s0 = inlined_call_operand.vmem [shape: bf16[32,512], index: 0, kind: input, shape index: {}]   ;;  %s877_s3 = inlined_call_operand.vmem [shape: f32[1,128], index: 3, kind: input, shape index: {}]   ;;  %s878_s2 = inlined_call_operand.vmem [shape: f32[1,128], index: 2, kind: input, shape index: {}]   ;;  %s879_s4 = inlined_call_operand.vmem [shape: bf16[32,128], index: 4, kind: output, shape index: {}]  }
   0x1   :  { %v655_v0 = vld [vmem:[%s875_s1 + $0x38] sm:$0xff]  ;;  %v654_v4 = vld [vmem:[%s875_s1 + $0x30] sm:$0xff]  ;;  %v653_v8 = vld [vmem:[%s875_s1 + $0x28] sm:$0xff] }
   0x2   :  { %v663_v1 = vld [vmem:[%s875_s1 + $0x78] sm:$0xff]  ;;  %321 = vmatpush.bf16.msra.mxu0 %v655_v0  ;;  %v662_v5 = vld [vmem:[%s875_s1 + $0x70] sm:$0xff]  ;;  %v661_v9 = vld [vmem:[%s875_s1 + $0x68] sm:$0xff] }
   0x3   :  { %v671_v2 = vld [vmem:[%s875_s1 + $0xb8] sm:$0xff]  ;;  %340 = vmatpush.bf16.msra.mxu1 %v663_v1  ;;  %v670_v6 = vld [vmem:[%s875_s1 + $0xb0] sm:$0xff]  ;;  %v669_v10 = vld [vmem:[%s875_s1 + $0xa8] sm:$0xff] }
   0x4   :  { %v679_v3 = vld [vmem:[%s875_s1 + $0xf8] sm:$0xff]  ;;  %359 = vmatpush.bf16.msra.mxu2 %v671_v2  ;;  %v678_v7 = vld [vmem:[%s875_s1 + $0xf0] sm:$0xff]  ;;  %v677_v11 = vld [vmem:[%s875_s1 + $0xe8] sm:$0xff] }
   0x5   :  { %378 = vmatpush.bf16.msra.mxu3 %v679_v3  ;;  %v652_v12 = vld [vmem:[%s875_s1 + $0x20] sm:$0xff]  ;;  %v651_v16 = vld [vmem:[%s875_s1 + $0x18] sm:$0xff]  ;;  %v650_v20 = vld [vmem:[%s875_s1 + $0x10] sm:$0xff] }
   0x6   :  { %322 = vmatpush.bf16.msra.mxu0 %v654_v4  ;;  %v660_v13 = vld [vmem:[%s875_s1 + $0x60] sm:$0xff]  ;;  %v659_v17 = vld [vmem:[%s875_s1 + $0x58] sm:$0xff]  ;;  %v658_v21 = vld [vmem:[%s875_s1 + $0x50] sm:$0xff] }
   0x7   :  { %341 = vmatpush.bf16.msra.mxu1 %v662_v5  ;;  %v668_v14 = vld [vmem:[%s875_s1 + $0xa0] sm:$0xff]  ;;  %v667_v18 = vld [vmem:[%s875_s1 + $0x98] sm:$0xff]  ;;  %v666_v22 = vld [vmem:[%s875_s1 + $0x90] sm:$0xff] }
   0x8   :  { %360 = vmatpush.bf16.msra.mxu2 %v670_v6  ;;  %v676_v15 = vld [vmem:[%s875_s1 + $0xe0] sm:$0xff]  ;;  %v675_v19 = vld [vmem:[%s875_s1 + $0xd8] sm:$0xff]  ;;  %v674_v23 = vld [vmem:[%s875_s1 + $0xd0] sm:$0xff] }
   0x9   :  { %379 = vmatpush.bf16.msra.mxu3 %v678_v7  ;;  %v649_v24 = vld [vmem:[%s875_s1 + $0x8] sm:$0xff]  ;;  %v648_v28 = vld [vmem:[%s875_s1] sm:$0xff]  ;;  %v642_v33 = vld [vmem:[%s876_s0 + $0xc] sm:$0xf0] }
   0xa   :  { %323 = vmatpush.bf16.msra.mxu0 %v653_v8  ;;  %v657_v25 = vld [vmem:[%s875_s1 + $0x48] sm:$0xff]  ;;  %v656_v29 = vld [vmem:[%s875_s1 + $0x40] sm:$0xff]  ;;  %v484_v35 = vld [vmem:[%s876_s0 + $0x10] sm:$0xf0] }
   0xb   :  { %342 = vmatpush.bf16.msra.mxu1 %v661_v9  ;;  %v665_v26 = vld [vmem:[%s875_s1 + $0x88] sm:$0xff]  ;;  %v664_v30 = vld [vmem:[%s875_s1 + $0x80] sm:$0xff]  ;;  %v643_v37 = vld [vmem:[%s876_s0 + $0x14] sm:$0xf0] }
   0xc   :  { %361 = vmatpush.bf16.msra.mxu2 %v669_v10  ;;  %v673_v27 = vld [vmem:[%s875_s1 + $0xc8] sm:$0xff]  ;;  %v672_v31 = vld [vmem:[%s875_s1 + $0xc0] sm:$0xff]  ;;  %v492_v39 = vld [vmem:[%s876_s0 + $0x18] sm:$0xf0] }
   0xd   :  { %380 = vmatpush.bf16.msra.mxu3 %v677_v11  ;;  %v482_v32 = vld [vmem:[%s876_s0] sm:$0xf]  ;;  %v640_v34 = vld [vmem:[%s876_s0 + $0x4] sm:$0xf]  ;;  %v490_v36 = vld [vmem:[%s876_s0 + $0x8] sm:$0xf] }
   0xe   :  { %324 = vmatpush.bf16.msra.mxu0 %v652_v12  ;;  %v641_v38 = vld [vmem:[%s876_s0 + $0xc] sm:$0xf]  ;;  %v483_v40 = vor.u32 %v642_v33, %v482_v32  ;;  %v487_v41 = vor.u32 %v640_v34, %v484_v35  ;;  %v491_v42 = vor.u32 %v643_v37, %v490_v36  ;;  %v498_v44 = vld [vmem:[%s876_s0 + $0x20] sm:$0xf]  ;;  %v646_v45 = vld [vmem:[%s876_s0 + $0x2c] sm:$0xf0] }
   0xf   :  { %343 = vmatpush.bf16.msra.mxu1 %v660_v13  ;;  %v495_v43 = vor.u32 %v641_v38, %v492_v39  ;;  %v644_v46 = vld [vmem:[%s876_s0 + $0x24] sm:$0xf]  ;;  %v500_v47 = vld [vmem:[%s876_s0 + $0x30] sm:$0xf0]  ;;  %v506_v48 = vld [vmem:[%s876_s0 + $0x28] sm:$0xf]  ;;  %v499_v52 = vor.u32 %v646_v45, %v498_v44 }
  0x10   :  { %362 = vmatpush.bf16.msra.mxu2 %v668_v14  ;;  %v647_v49 = vld [vmem:[%s876_s0 + $0x34] sm:$0xf0]  ;;  %v645_v50 = vld [vmem:[%s876_s0 + $0x2c] sm:$0xf]  ;;  %v508_v51 = vld [vmem:[%s876_s0 + $0x38] sm:$0xf0]  ;;  %v503_v53 = vor.u32 %v644_v46, %v500_v47 }
  0x11   :  { %381 = vmatpush.bf16.msra.mxu3 %v676_v15  ;;  %v507_v54 = vor.u32 %v647_v49, %v506_v48  ;;  %v511_v55 = vor.u32 %v645_v50, %v508_v51 }
  0x12   :  { %325 = vmatpush.bf16.msra.mxu0 %v651_v16 }
  0x13   :  { %344 = vmatpush.bf16.msra.mxu1 %v659_v17 }
  0x14   :  { %363 = vmatpush.bf16.msra.mxu2 %v667_v18 }
  0x15   :  { %382 = vmatpush.bf16.msra.mxu3 %v675_v19 }
  0x16   :  { %326 = vmatpush.bf16.msra.mxu0 %v650_v20 }
  0x17   :  { %345 = vmatpush.bf16.msra.mxu1 %v658_v21 }
  0x18   :  { %364 = vmatpush.bf16.msra.mxu2 %v666_v22 }
  0x19   :  { %383 = vmatpush.bf16.msra.mxu3 %v674_v23 }
  0x1a   :  { %327 = vmatpush.bf16.msra.mxu0 %v649_v24 }
  0x1b   :  { %346 = vmatpush.bf16.msra.mxu1 %v657_v25 }
  0x1c   :  { %365 = vmatpush.bf16.msra.mxu2 %v665_v26 }
  0x1d   :  { %384 = vmatpush.bf16.msra.mxu3 %v673_v27 }
  0x1e   :  { %328 = vmatpush.bf16.msra.mxu0 %v648_v28 }
  0x1f   :  { %347 = vmatpush.bf16.msra.mxu1 %v656_v29 }
  0x20   :  { %366 = vmatpush.bf16.msra.mxu2 %v664_v30 }
  0x21   :  { %385 = vmatpush.bf16.msra.mxu3 %v672_v31  ;;  %329 = vmatmul.bf16.vlgmr.msra.gmra.mxu0 %v483_v40 }
  0x22   :  { %348 = vmatmul.bf16.vlgmr.msra.gmra.mxu1 %v487_v41 }
  0x23   :  { %367 = vmatmul.bf16.vlgmr.msra.gmra.mxu2 %v491_v42 }
  0x24   :  { %386 = vmatmul.bf16.vlgmr.msra.gmra.mxu3 %v495_v43 }
  0x31   :  { %334 = vmatmul.bf16.gmra.mxu0 %v499_v52 }
  0x32   :  { %353 = vmatmul.bf16.gmra.mxu1 %v503_v53  ;;  %v424_v53 = vld [vmem:[%s878_s2] sm:$0x1] }
  0x33   :  { %372 = vmatmul.bf16.gmra.mxu2 %v507_v54 }
  0x34   :  { %391 = vmatmul.bf16.gmra.mxu3 %v511_v55 }
  0x9e   :  { %v330_v56 = vpop.f32.mrf.mxu0 }
  0x9f   :  { %v349_v57 = vpop.f32.mrf.mxu1 }
  0xa0   :  { %v350_v2 = vadd.f32 %v349_v57, %v330_v56 }
  0xa6   :  { %v368_v58 = vpop.f32.mrf.mxu2  ;;  %v332_v60 = vpop.f32.mrf.mxu0 }
  0xa7   :  { %v387_v59 = vpop.f32.mrf.mxu3  ;;  %v351_v61 = vpop.f32.mrf.mxu1  ;;  %v369_v8 = vadd.f32 %v368_v58, %v350_v2 }
  0xa8   :  { %v352_v3 = vadd.f32 %v351_v61, %v332_v60 }
  0xa9   :  { %v388_v13 = vadd.f32 %v387_v59, %v369_v8 }
  0xab   :  { %v407_v18 = vmul.f32 %v388_v13, %v388_v13 }
  0xae   :  { %v370_v62 = vpop.f32.mrf.mxu2  ;;  %v335_v0 = vpop.f32.mrf.mxu0 }
  0xaf   :  { %v389_v63 = vpop.f32.mrf.mxu3  ;;  %v354_v1 = vpop.f32.mrf.mxu1  ;;  %v371_v5 = vadd.f32 %v370_v62, %v352_v3  ;;  %v691_v62 = vld [vmem:[%s877_s3] ss:$0 sm:$0xff] }
  0xb0   :  { %v355_v4 = vadd.f32 %v354_v1, %v335_v0 }
  0xb1   :  { %v390_v10 = vadd.f32 %v389_v63, %v371_v5 }
  0xb3   :  { %v408_v15 = vmul.f32 %v390_v10, %v390_v10  ;;  %v397_v19 = vadd.f32 %v390_v10, %v388_v13 }
  0xb5   :  { %v411_v23 = vadd.f32 %v408_v15, %v407_v18 }
  0xb6   :  { %v373_v6 = vpop.f32.mrf.mxu2  ;;  %v337_v11 = vpop.f32.mrf.mxu0 }
  0xb7   :  { %v392_v7 = vpop.f32.mrf.mxu3  ;;  %v374_v9 = vadd.f32 %v373_v6, %v355_v4  ;;  %v356_v12 = vpop.f32.mrf.mxu1 }
  0xb8   :  { %v357_v16 = vadd.f32 %v356_v12, %v337_v11 }
  0xb9   :  { %v393_v14 = vadd.f32 %v392_v7, %v374_v9 }
  0xbb   :  { %v409_v20 = vmul.f32 %v393_v14, %v393_v14  ;;  %v398_v24 = vadd.f32 %v397_v19, %v393_v14 }
  0xbd   :  { %v412_v26 = vadd.f32 %v411_v23, %v409_v20 }
  0xbe   :  { %v375_v17 = vpop.f32.mrf.mxu2 }
  0xbf   :  { %v376_v21 = vadd.f32 %v375_v17, %v357_v16  ;;  %v394_v22 = vpop.f32.mrf.mxu3 }
  0xc1   :  { %v395_v25 = vadd.f32 %v394_v22, %v376_v21 }
  0xc3   :  { %v399_v27 = vadd.f32 %v398_v24, %v395_v25  ;;  %v410_v28 = vmul.f32 %v395_v25, %v395_v25 }
  0xc5   :  { %v400_v29 = vrot.slane %v399_v27, 4  ;;  %v413_v30 = vadd.f32 %v412_v26, %v410_v28 }
  0xc7   :  { %v401_v31 = vadd.f32 %v400_v29, %v399_v27  ;;  %v414_v32 = vrot.slane %v413_v30, 4 }
  0xc9   :  { %v402_v33 = vrot.slane %v401_v31, 2  ;;  %v415_v34 = vadd.f32 %v414_v32, %v413_v30 }
  0xcb   :  { %v403_v35 = vadd.f32 %v402_v33, %v401_v31  ;;  %v416_v36 = vrot.slane %v415_v34, 2 }
  0xcd   :  { %v404_v37 = vrot.slane %v403_v35, 1  ;;  %v417_v38 = vadd.f32 %v416_v36, %v415_v34 }
  0xcf   :  { %v405_v39 = vadd.f32 %v404_v37, %v403_v35  ;;  %v418_v40 = vrot.slane %v417_v38, 1 }
  0xd1   :  { %v406_v41 = vmul.f32 0.03125, %v405_v39  ;;  %v419_v42 = vadd.f32 %v418_v40, %v417_v38 }
  0xd3   :  { %v420_v43 = vmul.f32 0.03125, %v419_v42  ;;  %v421_v44 = vmul.f32 %v406_v41, %v406_v41  ;;  %v437_v57 = vsub.f32 %v388_v13, %v406_v41  ;;  %v438_v58 = vsub.f32 %v390_v10, %v406_v41 }
  0xd4   :  { %v439_v59 = vsub.f32 %v393_v14, %v406_v41  ;;  %v440_v60 = vsub.f32 %v395_v25, %v406_v41 }
  0xd5   :  { %v422_v45 = vsub.f32 %v420_v43, %v421_v44 }
  0xd7   :  { %v423_v46 = vmax.f32 %v422_v45, 0.0 }
  0xd9   :  { %v425_v47 = vadd.f32 1e-05, %v423_v46 }
  0xdb   :  { %692 = vrsqrt.f32 %v425_v47  ;;  %vm432_vm1 = vweird.f32 %v425_v47 }
  0xe1   :  { %v693_v48 = vpop.eup %692 }
  0xe2   :  { %v427_v49 = vmul.f32 %v693_v48, %v425_v47  ;;  %vm433_vm0 = vweird.f32 %v693_v48 }
  0xe3   :  { %vm434_vm2 = vmor %vm432_vm1, %vm433_vm0 }
  0xe4   :  { %v428_v50 = vmul.f32 %v693_v48, %v427_v49 }
  0xe6   :  { %v429_v51 = vmul.f32 0.5, %v428_v50 }
  0xe8   :  { %v430_v52 = vsub.f32 1.5, %v429_v51 }
  0xea   :  { %v431_v54 = vmul.f32 %v693_v48, %v430_v52 }
  0xec   :  { %v435_v55 = vsel %vm434_vm2, %v693_v48, %v431_v54 }
  0xed   :  { %v436_v56 = vmul.f32 %v435_v55, %v424_v53 }
  0xef   :  { %v442_v61 = vperm.slane %v436_v56, 0 }
  0xf1   :  { %v444_v63 = vmul.f32 %v442_v61, %v437_v57  ;;  %v445_v0 = vmul.f32 %v442_v61, %v438_v58  ;;  %v446_v1 = vmul.f32 %v442_v61, %v439_v59  ;;  %v447_v2 = vmul.f32 %v442_v61, %v440_v60 }
  0xf3   :  { %v452_v3 = vadd.f32 %v691_v62, %v444_v63  ;;  %v453_v4 = vadd.f32 %v691_v62, %v445_v0  ;;  %v454_v5 = vadd.f32 %v691_v62, %v446_v1  ;;  %v455_v6 = vadd.f32 %v691_v62, %v447_v2 }
  0xf5   :  { %vm456_vm3 = vcmp.ge.f32.partialorder %v452_v3, 0.0  ;;  %vm457_vm4 = vcmp.ge.f32.partialorder %v453_v4, 0.0  ;;  %vm458_vm5 = vcmp.ge.f32.partialorder %v454_v5, 0.0  ;;  %vm459_vm6 = vcmp.ge.f32.partialorder %v455_v6, 0.0 }
  0xf6   :  { %v460_v7 = vmul.f32 0.2, %v452_v3  ;;  %v461_v8 = vmul.f32 0.2, %v453_v4  ;;  %v462_v9 = vmul.f32 0.2, %v454_v5 }
  0xf7   :  { %v463_v10 = vmul.f32 0.2, %v455_v6 }
  0xf8   :  { %v464_v11 = vsel %vm456_vm3, %v452_v3, %v460_v7  ;;  %v465_v12 = vsel %vm457_vm4, %v453_v4, %v461_v8  ;;  %v466_v13 = vsel %vm458_vm5, %v454_v5, %v462_v9 }
  0xf9   :  { %v467_v14 = vsel %vm459_vm6, %v455_v6, %v463_v10  ;;  %v683_v15 = vpack.c.bf16 %v465_v12, %v464_v11 }
  0xfa   :  { %v688_v16 = vpack.c.bf16 %v467_v14, %v466_v13 }
  0xfb   :  { %684 = vst [vmem:[%s879_s4] sm:$0xff] %v683_v15  }
  0xfc   :  { %690 = vst [vmem:[%s879_s4 + $0x8] sm:$0xff] %v688_v16  }

// kernel: _lambda_.8
= control target key start
LH: loop header
LB: loop body
LE: loop exit
PB: predicated region body
PF: predicated region fallthrough
CT: control target
= control target key end

     0   :  { %s1599_s1 = inlined_call_operand.vmem [shape: bf16[1024,128], index: 1, kind: input, shape index: {}]   ;;  %s1600_s0 = inlined_call_operand.vmem [shape: bf16[32,1024], index: 0, kind: input, shape index: {}]   ;;  %s1601_s3 = inlined_call_operand.vmem [shape: f32[1,128], index: 3, kind: input, shape index: {}]   ;;  %s1602_s2 = inlined_call_operand.vmem [shape: f32[1,128], index: 2, kind: input, shape index: {}]   ;;  %s1603_s4 = inlined_call_operand.vmem [shape: bf16[32,128], index: 4, kind: output, shape index: {}]  }
   0x1   :  { %v1203_v0 = vld [vmem:[%s1599_s1 + $0x38] sm:$0xff]  ;;  %v1202_v4 = vld [vmem:[%s1599_s1 + $0x30] sm:$0xff]  ;;  %v1201_v8 = vld [vmem:[%s1599_s1 + $0x28] sm:$0xff] }
   0x2   :  { %v1211_v1 = vld [vmem:[%s1599_s1 + $0x78] sm:$0xff]  ;;  %625 = vmatpush.bf16.msra.mxu0 %v1203_v0  ;;  %v1210_v5 = vld [vmem:[%s1599_s1 + $0x70] sm:$0xff]  ;;  %v1209_v9 = vld [vmem:[%s1599_s1 + $0x68] sm:$0xff] }
   0x3   :  { %v1219_v2 = vld [vmem:[%s1599_s1 + $0xb8] sm:$0xff]  ;;  %644 = vmatpush.bf16.msra.mxu1 %v1211_v1  ;;  %v1218_v6 = vld [vmem:[%s1599_s1 + $0xb0] sm:$0xff]  ;;  %v1217_v10 = vld [vmem:[%s1599_s1 + $0xa8] sm:$0xff] }
   0x4   :  { %v1227_v3 = vld [vmem:[%s1599_s1 + $0xf8] sm:$0xff]  ;;  %663 = vmatpush.bf16.msra.mxu2 %v1219_v2  ;;  %v1226_v7 = vld [vmem:[%s1599_s1 + $0xf0] sm:$0xff]  ;;  %v1225_v11 = vld [vmem:[%s1599_s1 + $0xe8] sm:$0xff] }
   0x5   :  { %682 = vmatpush.bf16.msra.mxu3 %v1227_v3  ;;  %v1200_v12 = vld [vmem:[%s1599_s1 + $0x20] sm:$0xff]  ;;  %v1199_v16 = vld [vmem:[%s1599_s1 + $0x18] sm:$0xff]  ;;  %v1198_v20 = vld [vmem:[%s1599_s1 + $0x10] sm:$0xff] }
   0x6   :  { %626 = vmatpush.bf16.msra.mxu0 %v1202_v4  ;;  %v1208_v13 = vld [vmem:[%s1599_s1 + $0x60] sm:$0xff]  ;;  %v1207_v17 = vld [vmem:[%s1599_s1 + $0x58] sm:$0xff]  ;;  %v1206_v21 = vld [vmem:[%s1599_s1 + $0x50] sm:$0xff] }
   0x7   :  { %645 = vmatpush.bf16.msra.mxu1 %v1210_v5  ;;  %v1216_v14 = vld [vmem:[%s1599_s1 + $0xa0] sm:$0xff]  ;;  %v1215_v18 = vld [vmem:[%s1599_s1 + $0x98] sm:$0xff]  ;;  %v1214_v22 = vld [vmem:[%s1599_s1 + $0x90] sm:$0xff] }
   0x8   :  { %664 = vmatpush.bf16.msra.mxu2 %v1218_v6  ;;  %v1224_v15 = vld [vmem:[%s1599_s1 + $0xe0] sm:$0xff]  ;;  %v1223_v19 = vld [vmem:[%s1599_s1 + $0xd8] sm:$0xff]  ;;  %v1222_v23 = vld [vmem:[%s1599_s1 + $0xd0] sm:$0xff] }
   0x9   :  { %683 = vmatpush.bf16.msra.mxu3 %v1226_v7  ;;  %v1197_v24 = vld [vmem:[%s1599_s1 + $0x8] sm:$0xff]  ;;  %v1196_v28 = vld [vmem:[%s1599_s1] sm:$0xff]  ;;  %v1251_v40 = vld [vmem:[%s1599_s1 + $0x1b8] sm:$0xff] }
   0xa   :  { %627 = vmatpush.bf16.msra.mxu0 %v1201_v8  ;;  %v1205_v25 = vld [vmem:[%s1599_s1 + $0x48] sm:$0xff]  ;;  %v1204_v29 = vld [vmem:[%s1599_s1 + $0x40] sm:$0xff]  ;;  %v1235_v41 = vld [vmem:[%s1599_s1 + $0x138] sm:$0xff] }
   0xb   :  { %646 = vmatpush.bf16.msra.mxu1 %v1209_v9  ;;  %v1213_v26 = vld [vmem:[%s1599_s1 + $0x88] sm:$0xff]  ;;  %v1212_v30 = vld [vmem:[%s1599_s1 + $0x80] sm:$0xff]  ;;  %v1243_v46 = vld [vmem:[%s1599_s1 + $0x178] sm:$0xff] }
   0xc   :  { %665 = vmatpush.bf16.msra.mxu2 %v1217_v10  ;;  %v1221_v27 = vld [vmem:[%s1599_s1 + $0xc8] sm:$0xff]  ;;  %v1220_v31 = vld [vmem:[%s1599_s1 + $0xc0] sm:$0xff]  ;;  %v1259_v47 = vld [vmem:[%s1599_s1 + $0x1f8] sm:$0xff] }
   0xd   :  { %684 = vmatpush.bf16.msra.mxu3 %v1225_v11  ;;  %v862_v32 = vld [vmem:[%s1600_s0] sm:$0xf]  ;;  %v1180_v34 = vld [vmem:[%s1600_s0 + $0x4] sm:$0xf]  ;;  %v870_v36 = vld [vmem:[%s1600_s0 + $0x8] sm:$0xf] }
   0xe   :  { %628 = vmatpush.bf16.msra.mxu0 %v1200_v12  ;;  %v1184_v33 = vld [vmem:[%s1600_s0 + $0x1c] sm:$0xf0]  ;;  %v864_v35 = vld [vmem:[%s1600_s0 + $0x20] sm:$0xf0]  ;;  %v1185_v37 = vld [vmem:[%s1600_s0 + $0x24] sm:$0xf0] }
   0xf   :  { %647 = vmatpush.bf16.msra.mxu1 %v1208_v13  ;;  %v1181_v38 = vld [vmem:[%s1600_s0 + $0xc] sm:$0xf]  ;;  %v863_v42 = vor.u32 %v1184_v33, %v862_v32  ;;  %v867_v43 = vor.u32 %v1180_v34, %v864_v35  ;;  %v871_v44 = vor.u32 %v1185_v37, %v870_v36  ;;  %v1250_v48 = vld [vmem:[%s1599_s1 + $0x1b0] sm:$0xff]  ;;  %v1248_v56 = vld [vmem:[%s1599_s1 + $0x1a0] sm:$0xff] }
  0x10   :  { %666 = vmatpush.bf16.msra.mxu2 %v1216_v14  ;;  %v872_v39 = vld [vmem:[%s1600_s0 + $0x28] sm:$0xf0]  ;;  %v1234_v49 = vld [vmem:[%s1599_s1 + $0x130] sm:$0xff]  ;;  %v1232_v57 = vld [vmem:[%s1599_s1 + $0x120] sm:$0xff] }
  0x11   :  { %685 = vmatpush.bf16.msra.mxu3 %v1224_v15  ;;  %v875_v45 = vor.u32 %v1181_v38, %v872_v39  ;;  %v1242_v50 = vld [vmem:[%s1599_s1 + $0x170] sm:$0xff]  ;;  %v1249_v52 = vld [vmem:[%s1599_s1 + $0x1a8] sm:$0xff]  ;;  %v1240_v58 = vld [vmem:[%s1599_s1 + $0x160] sm:$0xff] }
  0x12   :  { %629 = vmatpush.bf16.msra.mxu0 %v1199_v16  ;;  %v1258_v51 = vld [vmem:[%s1599_s1 + $0x1f0] sm:$0xff]  ;;  %v1233_v53 = vld [vmem:[%s1599_s1 + $0x128] sm:$0xff]  ;;  %v1256_v59 = vld [vmem:[%s1599_s1 + $0x1e0] sm:$0xff] }
  0x13   :  { %648 = vmatpush.bf16.msra.mxu1 %v1207_v17  ;;  %v1241_v54 = vld [vmem:[%s1599_s1 + $0x168] sm:$0xff]  ;;  %v894_v60 = vld [vmem:[%s1600_s0 + $0x40] sm:$0xf]  ;;  %v1188_v62 = vld [vmem:[%s1600_s0 + $0x44] sm:$0xf] }
  0x14   :  { %667 = vmatpush.bf16.msra.mxu2 %v1215_v18  ;;  %v1257_v55 = vld [vmem:[%s1599_s1 + $0x1e8] sm:$0xff]  ;;  %v1192_v61 = vld [vmem:[%s1600_s0 + $0x5c] sm:$0xf0]  ;;  %v896_v63 = vld [vmem:[%s1600_s0 + $0x60] sm:$0xf0] }
  0x15   :  { %686 = vmatpush.bf16.msra.mxu3 %v1223_v19  ;;  %v902_v0 = vld [vmem:[%s1600_s0 + $0x48] sm:$0xf]  ;;  %v1189_v2 = vld [vmem:[%s1600_s0 + $0x4c] sm:$0xf]  ;;  %v1247_v4 = vld [vmem:[%s1599_s1 + $0x198] sm:$0xff]  ;;  %v895_v6 = vor.u32 %v1192_v61, %v894_v60  ;;  %v899_v7 = vor.u32 %v1188_v62, %v896_v63 }
  0x16   :  { %630 = vmatpush.bf16.msra.mxu0 %v1198_v20  ;;  %v1193_v1 = vld [vmem:[%s1600_s0 + $0x64] sm:$0xf0]  ;;  %v904_v3 = vld [vmem:[%s1600_s0 + $0x68] sm:$0xf0]  ;;  %v1231_v5 = vld [vmem:[%s1599_s1 + $0x118] sm:$0xff] }
  0x17   :  { %649 = vmatpush.bf16.msra.mxu1 %v1206_v21  ;;  %v903_v8 = vor.u32 %v1193_v1, %v902_v0  ;;  %v907_v9 = vor.u32 %v1189_v2, %v904_v3  ;;  %v1239_v10 = vld [vmem:[%s1599_s1 + $0x158] sm:$0xff]  ;;  %v1246_v12 = vld [vmem:[%s1599_s1 + $0x190] sm:$0xff]  ;;  %v1245_v16 = vld [vmem:[%s1599_s1 + $0x188] sm:$0xff] }
  0x18   :  { %668 = vmatpush.bf16.msra.mxu2 %v1214_v22  ;;  %v1255_v11 = vld [vmem:[%s1599_s1 + $0x1d8] sm:$0xff]  ;;  %v1230_v13 = vld [vmem:[%s1599_s1 + $0x110] sm:$0xff]  ;;  %v1229_v17 = vld [vmem:[%s1599_s1 + $0x108] sm:$0xff] }
  0x19   :  { %687 = vmatpush.bf16.msra.mxu3 %v1222_v23  ;;  %v1238_v14 = vld [vmem:[%s1599_s1 + $0x150] sm:$0xff]  ;;  %v1237_v18 = vld [vmem:[%s1599_s1 + $0x148] sm:$0xff]  ;;  %v1244_v20 = vld [vmem:[%s1599_s1 + $0x180] sm:$0xff] }
  0x1a   :  { %631 = vmatpush.bf16.msra.mxu0 %v1197_v24  ;;  %v1254_v15 = vld [vmem:[%s1599_s1 + $0x1d0] sm:$0xff]  ;;  %v1253_v19 = vld [vmem:[%s1599_s1 + $0x1c8] sm:$0xff]  ;;  %v1228_v21 = vld [vmem:[%s1599_s1 + $0x100] sm:$0xff] }
  0x1b   :  { %650 = vmatpush.bf16.msra.mxu1 %v1205_v25  ;;  %v1236_v22 = vld [vmem:[%s1599_s1 + $0x140] sm:$0xff]  ;;  %v878_v24 = vld [vmem:[%s1600_s0 + $0x10] sm:$0xf]  ;;  %v1190_v38 = vld [vmem:[%s1600_s0 + $0x54] sm:$0xf] }
  0x1c   :  { %669 = vmatpush.bf16.msra.mxu2 %v1213_v26  ;;  %v1252_v23 = vld [vmem:[%s1599_s1 + $0x1c0] sm:$0xff]  ;;  %v1186_v25 = vld [vmem:[%s1600_s0 + $0x2c] sm:$0xf0]  ;;  %v1182_v26 = vld [vmem:[%s1600_s0 + $0x14] sm:$0xf] }
  0x1d   :  { %688 = vmatpush.bf16.msra.mxu3 %v1221_v27  ;;  %v880_v27 = vld [vmem:[%s1600_s0 + $0x30] sm:$0xf0]  ;;  %v879_v32 = vor.u32 %v1186_v25, %v878_v24  ;;  %v910_v36 = vld [vmem:[%s1600_s0 + $0x50] sm:$0xf] }
  0x1e   :  { %632 = vmatpush.bf16.msra.mxu0 %v1196_v28  ;;  %v886_v28 = vld [vmem:[%s1600_s0 + $0x18] sm:$0xf]  ;;  %v883_v33 = vor.u32 %v1182_v26, %v880_v27  ;;  %v1194_v37 = vld [vmem:[%s1600_s0 + $0x6c] sm:$0xf0]  ;;  %v912_v39 = vld [vmem:[%s1600_s0 + $0x70] sm:$0xf0] }
  0x1f   :  { %651 = vmatpush.bf16.msra.mxu1 %v1204_v29  ;;  %v1187_v29 = vld [vmem:[%s1600_s0 + $0x34] sm:$0xf0] }
  0x20   :  { %670 = vmatpush.bf16.msra.mxu2 %v1212_v30  ;;  %v1183_v30 = vld [vmem:[%s1600_s0 + $0x1c] sm:$0xf]  ;;  %v887_v34 = vor.u32 %v1187_v29, %v886_v28 }
  0x21   :  { %689 = vmatpush.bf16.msra.mxu3 %v1220_v31  ;;  %633 = vmatmul.bf16.vlgmr.msra.gmra.mxu0 %v863_v42  ;;  %v888_v31 = vld [vmem:[%s1600_s0 + $0x38] sm:$0xf0] }
  0x22   :  { %701 = vmatpush.bf16.msrb.mxu0 %v1235_v41  ;;  %652 = vmatmul.bf16.vlgmr.msra.gmra.mxu1 %v867_v43  ;;  %v891_v35 = vor.u32 %v1183_v30, %v888_v31  ;;  %v1195_v41 = vld [vmem:[%s1600_s0 + $0x74] sm:$0xf0]  ;;  %v1191_v42 = vld [vmem:[%s1600_s0 + $0x5c] sm:$0xf] }
  0x23   :  { %671 = vmatmul.bf16.vlgmr.msra.gmra.mxu2 %v871_v44  ;;  %720 = vmatpush.bf16.msrb.mxu1 %v1243_v46  ;;  %v920_v43 = vld [vmem:[%s1600_s0 + $0x78] sm:$0xf0]  ;;  %v911_v44 = vor.u32 %v1194_v37, %v910_v36 }
  0x24   :  { %739 = vmatpush.bf16.msrb.mxu2 %v1251_v40  ;;  %690 = vmatmul.bf16.vlgmr.msra.gmra.mxu3 %v875_v45  ;;  %v918_v40 = vld [vmem:[%s1600_s0 + $0x58] sm:$0xf]  ;;  %v915_v45 = vor.u32 %v1190_v38, %v912_v39 }
  0x25   :  { %758 = vmatpush.bf16.msrb.mxu3 %v1259_v47  ;;  %v919_v46 = vor.u32 %v1195_v41, %v918_v40  ;;  %v923_v47 = vor.u32 %v1191_v42, %v920_v43 }
  0x26   :  { %702 = vmatpush.bf16.msrb.mxu0 %v1234_v49 }
  0x27   :  { %721 = vmatpush.bf16.msrb.mxu1 %v1242_v50 }
  0x28   :  { %740 = vmatpush.bf16.msrb.mxu2 %v1250_v48 }
  0x29   :  { %759 = vmatpush.bf16.msrb.mxu3 %v1258_v51 }
  0x2a   :  { %703 = vmatpush.bf16.msrb.mxu0 %v1233_v53 }
  0x2b   :  { %722 = vmatpush.bf16.msrb.mxu1 %v1241_v54 }
  0x2c   :  { %741 = vmatpush.bf16.msrb.mxu2 %v1249_v52 }
  0x2d   :  { %760 = vmatpush.bf16.msrb.mxu3 %v1257_v55 }
  0x2e   :  { %704 = vmatpush.bf16.msrb.mxu0 %v1232_v57 }
  0x2f   :  { %723 = vmatpush.bf16.msrb.mxu1 %v1240_v58 }
  0x30   :  { %742 = vmatpush.bf16.msrb.mxu2 %v1248_v56 }
  0x31   :  { %761 = vmatpush.bf16.msrb.mxu3 %v1256_v59  ;;  %638 = vmatmul.bf16.gmra.mxu0 %v895_v6 }
  0x32   :  { %705 = vmatpush.bf16.msrb.mxu0 %v1231_v5  ;;  %657 = vmatmul.bf16.gmra.mxu1 %v899_v7 }
  0x33   :  { %676 = vmatmul.bf16.gmra.mxu2 %v903_v8  ;;  %724 = vmatpush.bf16.msrb.mxu1 %v1239_v10 }
  0x34   :  { %743 = vmatpush.bf16.msrb.mxu2 %v1247_v4  ;;  %695 = vmatmul.bf16.gmra.mxu3 %v907_v9 }
  0x35   :  { %762 = vmatpush.bf16.msrb.mxu3 %v1255_v11 }
  0x36   :  { %706 = vmatpush.bf16.msrb.mxu0 %v1230_v13 }
  0x37   :  { %725 = vmatpush.bf16.msrb.mxu1 %v1238_v14 }
  0x38   :  { %744 = vmatpush.bf16.msrb.mxu2 %v1246_v12 }
  0x39   :  { %763 = vmatpush.bf16.msrb.mxu3 %v1254_v15 }
  0x3a   :  { %707 = vmatpush.bf16.msrb.mxu0 %v1229_v17 }
  0x3b   :  { %726 = vmatpush.bf16.msrb.mxu1 %v1237_v18 }
  0x3c   :  { %745 = vmatpush.bf16.msrb.mxu2 %v1245_v16 }
  0x3d   :  { %764 = vmatpush.bf16.msrb.mxu3 %v1253_v19 }
  0x3e   :  { %708 = vmatpush.bf16.msrb.mxu0 %v1228_v21 }
  0x3f   :  { %727 = vmatpush.bf16.msrb.mxu1 %v1236_v22 }
  0x40   :  { %746 = vmatpush.bf16.msrb.mxu2 %v1244_v20 }
  0x41   :  { %765 = vmatpush.bf16.msrb.mxu3 %v1252_v23  ;;  %709 = vmatmul.bf16.vlgmr.msrb.gmra.mxu0 %v879_v32 }
  0x42   :  { %728 = vmatmul.bf16.vlgmr.msrb.gmra.mxu1 %v883_v33 }
  0x43   :  { %747 = vmatmul.bf16.vlgmr.msrb.gmra.mxu2 %v887_v34 }
  0x44   :  { %766 = vmatmul.bf16.vlgmr.msrb.gmra.mxu3 %v891_v35 }
  0x51   :  { %714 = vmatmul.bf16.gmra.mxu0 %v911_v44 }
  0x52   :  { %733 = vmatmul.bf16.gmra.mxu1 %v915_v45 }
  0x53   :  { %752 = vmatmul.bf16.gmra.mxu2 %v919_v46 }
  0x54   :  { %771 = vmatmul.bf16.gmra.mxu3 %v923_v47 }
  0x9e   :  { %v634_v48 = vpop.f32.mrf.mxu0 }
  0x9f   :  { %v653_v49 = vpop.f32.mrf.mxu1 }
  0xa0   :  { %v654_v7 = vadd.f32 %v653_v49, %v634_v48 }
  0xa6   :  { %v672_v50 = vpop.f32.mrf.mxu2  ;;  %v636_v52 = vpop.f32.mrf.mxu0 }
  0xa7   :  { %v691_v51 = vpop.f32.mrf.mxu3  ;;  %v655_v53 = vpop.f32.mrf.mxu1  ;;  %v673_v10 = vadd.f32 %v672_v50, %v654_v7 }
  0xa8   :  { %v656_v3 = vadd.f32 %v655_v53, %v636_v52 }
  0xa9   :  { %v692_v14 = vadd.f32 %v691_v51, %v673_v10 }
  0xae   :  { %v674_v54 = vpop.f32.mrf.mxu2  ;;  %v639_v56 = vpop.f32.mrf.mxu0 }
  0xaf   :  { %v693_v55 = vpop.f32.mrf.mxu3  ;;  %v658_v57 = vpop.f32.mrf.mxu1  ;;  %v675_v8 = vadd.f32 %v674_v54, %v656_v3 }
  0xb0   :  { %v659_v9 = vadd.f32 %v658_v57, %v639_v56 }
  0xb1   :  { %v694_v12 = vadd.f32 %v693_v55, %v675_v8 }
  0xb6   :  { %v677_v58 = vpop.f32.mrf.mxu2  ;;  %v641_v60 = vpop.f32.mrf.mxu0 }
  0xb7   :  { %v696_v59 = vpop.f32.mrf.mxu3  ;;  %v660_v61 = vpop.f32.mrf.mxu1  ;;  %v678_v11 = vadd.f32 %v677_v58, %v659_v9 }
  0xb8   :  { %v661_v19 = vadd.f32 %v660_v61, %v641_v60 }
  0xb9   :  { %v697_v15 = vadd.f32 %v696_v59, %v678_v11 }
  0xbe   :  { %v679_v62 = vpop.f32.mrf.mxu2  ;;  %v710_v0 = vpop.f32.mrf.mxu0 }
  0xbf   :  { %v698_v63 = vpop.f32.mrf.mxu3  ;;  %v729_v1 = vpop.f32.mrf.mxu1  ;;  %v711_v20 = vadd.f32 %v710_v0, %v692_v14  ;;  %v680_v23 = vadd.f32 %v679_v62, %v661_v19 }
  0xc1   :  { %v730_v25 = vadd.f32 %v729_v1, %v711_v20  ;;  %v699_v29 = vadd.f32 %v698_v63, %v680_v23 }
  0xc6   :  { %v748_v2 = vpop.f32.mrf.mxu2  ;;  %v712_v5 = vpop.f32.mrf.mxu0 }
  0xc7   :  { %v767_v4 = vpop.f32.mrf.mxu3  ;;  %v731_v6 = vpop.f32.mrf.mxu1  ;;  %v713_v16 = vadd.f32 %v712_v5, %v694_v12  ;;  %v749_v30 = vadd.f32 %v748_v2, %v730_v25 }
  0xc9   :  { %v732_v24 = vadd.f32 %v731_v6, %v713_v16  ;;  %v768_v36 = vadd.f32 %v767_v4, %v749_v30 }
  0xcb   :  { %v787_v42 = vmul.f32 %v768_v36, %v768_v36 }
  0xce   :  { %v750_v13 = vpop.f32.mrf.mxu2  ;;  %v715_v18 = vpop.f32.mrf.mxu0 }
  0xcf   :  { %v769_v17 = vpop.f32.mrf.mxu3  ;;  %v716_v21 = vadd.f32 %v715_v18, %v697_v15  ;;  %v734_v22 = vpop.f32.mrf.mxu1  ;;  %v751_v26 = vadd.f32 %v750_v13, %v732_v24  ;;  %v804_v13 = vld [vmem:[%s1602_s2] sm:$0x1] }
  0xd1   :  { %v735_v27 = vadd.f32 %v734_v22, %v716_v21  ;;  %v770_v34 = vadd.f32 %v769_v17, %v751_v26  ;;  %v1271_v22 = vld [vmem:[%s1601_s3] ss:$0 sm:$0xff] }
  0xd3   :  { %v788_v39 = vmul.f32 %v770_v34, %v770_v34  ;;  %v777_v43 = vadd.f32 %v770_v34, %v768_v36 }
  0xd5   :  { %v791_v47 = vadd.f32 %v788_v39, %v787_v42 }
  0xd6   :  { %v753_v28 = vpop.f32.mrf.mxu2  ;;  %v717_v33 = vpop.f32.mrf.mxu0 }
  0xd7   :  { %v754_v31 = vadd.f32 %v753_v28, %v735_v27  ;;  %v772_v32 = vpop.f32.mrf.mxu3  ;;  %v718_v35 = vadd.f32 %v717_v33, %v699_v29  ;;  %v736_v38 = vpop.f32.mrf.mxu1 }
  0xd9   :  { %v773_v37 = vadd.f32 %v772_v32, %v754_v31  ;;  %v737_v40 = vadd.f32 %v736_v38, %v718_v35 }
  0xdb   :  { %v789_v44 = vmul.f32 %v773_v37, %v773_v37  ;;  %v778_v48 = vadd.f32 %v777_v43, %v773_v37 }
  0xdd   :  { %v792_v50 = vadd.f32 %v791_v47, %v789_v44 }
  0xde   :  { %v755_v41 = vpop.f32.mrf.mxu2 }
  0xdf   :  { %v756_v45 = vadd.f32 %v755_v41, %v737_v40  ;;  %v774_v46 = vpop.f32.mrf.mxu3 }
  0xe1   :  { %v775_v49 = vadd.f32 %v774_v46, %v756_v45 }
  0xe3   :  { %v779_v51 = vadd.f32 %v778_v48, %v775_v49  ;;  %v790_v52 = vmul.f32 %v775_v49, %v775_v49 }
  0xe5   :  { %v780_v53 = vrot.slane %v779_v51, 4  ;;  %v793_v54 = vadd.f32 %v792_v50, %v790_v52 }
  0xe7   :  { %v781_v55 = vadd.f32 %v780_v53, %v779_v51  ;;  %v794_v56 = vrot.slane %v793_v54, 4 }
  0xe9   :  { %v782_v57 = vrot.slane %v781_v55, 2  ;;  %v795_v58 = vadd.f32 %v794_v56, %v793_v54 }
  0xeb   :  { %v783_v59 = vadd.f32 %v782_v57, %v781_v55  ;;  %v796_v60 = vrot.slane %v795_v58, 2 }
  0xed   :  { %v784_v61 = vrot.slane %v783_v59, 1  ;;  %v797_v62 = vadd.f32 %v796_v60, %v795_v58 }
  0xef   :  { %v785_v63 = vadd.f32 %v784_v61, %v783_v59  ;;  %v798_v0 = vrot.slane %v797_v62, 1 }
  0xf1   :  { %v786_v1 = vmul.f32 0.055555556, %v785_v63  ;;  %v799_v2 = vadd.f32 %v798_v0, %v797_v62 }
  0xf3   :  { %v800_v3 = vmul.f32 0.055555556, %v799_v2  ;;  %v801_v4 = vmul.f32 %v786_v1, %v786_v1  ;;  %v817_v17 = vsub.f32 %v768_v36, %v786_v1  ;;  %v818_v18 = vsub.f32 %v770_v34, %v786_v1 }
  0xf4   :  { %v819_v19 = vsub.f32 %v773_v37, %v786_v1  ;;  %v820_v20 = vsub.f32 %v775_v49, %v786_v1 }
  0xf5   :  { %v802_v5 = vsub.f32 %v800_v3, %v801_v4 }
  0xf7   :  { %v803_v6 = vmax.f32 %v802_v5, 0.0 }
  0xf9   :  { %v805_v7 = vadd.f32 1e-05, %v803_v6 }
  0xfb   :  { %1272 = vrsqrt.f32 %v805_v7  ;;  %vm812_vm1 = vweird.f32 %v805_v7 }
 0x101   :  { %v1273_v8 = vpop.eup %1272 }
 0x102   :  { %v807_v9 = vmul.f32 %v1273_v8, %v805_v7  ;;  %vm813_vm0 = vweird.f32 %v1273_v8 }
 0x103   :  { %vm814_vm2 = vmor %vm812_vm1, %vm813_vm0 }
 0x104   :  { %v808_v10 = vmul.f32 %v1273_v8, %v807_v9 }
 0x106   :  { %v809_v11 = vmul.f32 0.5, %v808_v10 }
 0x108   :  { %v810_v12 = vsub.f32 1.5, %v809_v11 }
 0x10a   :  { %v811_v14 = vmul.f32 %v1273_v8, %v810_v12 }
 0x10c   :  { %v815_v15 = vsel %vm814_vm2, %v1273_v8, %v811_v14 }
 0x10d   :  { %v816_v16 = vmul.f32 %v815_v15, %v804_v13 }
 0x10f   :  { %v822_v21 = vperm.slane %v816_v16, 0 }
 0x111   :  { %v824_v23 = vmul.f32 %v822_v21, %v817_v17  ;;  %v825_v24 = vmul.f32 %v822_v21, %v818_v18  ;;  %v826_v25 = vmul.f32 %v822_v21, %v819_v19  ;;  %v827_v26 = vmul.f32 %v822_v21, %v820_v20 }
 0x113   :  { %v832_v27 = vadd.f32 %v1271_v22, %v824_v23  ;;  %v833_v28 = vadd.f32 %v1271_v22, %v825_v24  ;;  %v834_v29 = vadd.f32 %v1271_v22, %v826_v25  ;;  %v835_v30 = vadd.f32 %v1271_v22, %v827_v26 }
 0x115   :  { %vm836_vm3 = vcmp.ge.f32.partialorder %v832_v27, 0.0  ;;  %vm837_vm4 = vcmp.ge.f32.partialorder %v833_v28, 0.0  ;;  %vm838_vm5 = vcmp.ge.f32.partialorder %v834_v29, 0.0  ;;  %vm839_vm6 = vcmp.ge.f32.partialorder %v835_v30, 0.0 }
 0x116   :  { %v840_v31 = vmul.f32 0.2, %v832_v27  ;;  %v841_v32 = vmul.f32 0.2, %v833_v28  ;;  %v842_v33 = vmul.f32 0.2, %v834_v29 }
 0x117   :  { %v843_v34 = vmul.f32 0.2, %v835_v30 }
 0x118   :  { %v844_v35 = vsel %vm836_vm3, %v832_v27, %v840_v31  ;;  %v845_v36 = vsel %vm837_vm4, %v833_v28, %v841_v32  ;;  %v846_v37 = vsel %vm838_vm5, %v834_v29, %v842_v33 }
 0x119   :  { %v847_v38 = vsel %vm839_vm6, %v835_v30, %v843_v34  ;;  %v1263_v39 = vpack.c.bf16 %v845_v36, %v844_v35 }
 0x11a   :  { %v1268_v40 = vpack.c.bf16 %v847_v38, %v846_v37 }
 0x11b   :  { %1264 = vst [vmem:[%s1603_s4] sm:$0xff] %v1263_v39  }
 0x11c   :  { %1270 = vst [vmem:[%s1603_s4 + $0x8] sm:$0xff] %v1268_v40  }

// kernel: _lambda_.9
= control target key start
LH: loop header
LB: loop body
LE: loop exit
PB: predicated region body
PF: predicated region fallthrough
CT: control target
= control target key end

     0   :  { %s2598_s1 = inlined_call_operand.vmem [shape: bf16[2048,128], index: 1, kind: input, shape index: {}]   ;;  %s2599_s2 = inlined_call_operand.vmem [shape: f32[1,128], index: 2, kind: input, shape index: {}]   ;;  %s2600_s0 = inlined_call_operand.vmem [shape: bf16[16,2048], index: 0, kind: input, shape index: {}]   ;;  %s2601_s3 = inlined_call_operand.vmem [shape: f32[16,128], index: 3, kind: output, shape index: {}]  }
   0x1   :  { %v1967_v0 = vld [vmem:[%s2598_s1 + $0x38] sm:$0xff]  ;;  %v1966_v4 = vld [vmem:[%s2598_s1 + $0x30] sm:$0xff]  ;;  %v1965_v8 = vld [vmem:[%s2598_s1 + $0x28] sm:$0xff] }
   0x2   :  { %v1975_v1 = vld [vmem:[%s2598_s1 + $0x78] sm:$0xff]  ;;  %1138 = vmatpush.bf16.msra.mxu0 %v1967_v0  ;;  %v1974_v5 = vld [vmem:[%s2598_s1 + $0x70] sm:$0xff]  ;;  %v1973_v9 = vld [vmem:[%s2598_s1 + $0x68] sm:$0xff] }
   0x3   :  { %v1983_v2 = vld [vmem:[%s2598_s1 + $0xb8] sm:$0xff]  ;;  %1152 = vmatpush.bf16.msra.mxu1 %v1975_v1  ;;  %v1982_v6 = vld [vmem:[%s2598_s1 + $0xb0] sm:$0xff]  ;;  %v1981_v10 = vld [vmem:[%s2598_s1 + $0xa8] sm:$0xff] }
   0x4   :  { %v1991_v3 = vld [vmem:[%s2598_s1 + $0xf8] sm:$0xff]  ;;  %1166 = vmatpush.bf16.msra.mxu2 %v1983_v2  ;;  %v1990_v7 = vld [vmem:[%s2598_s1 + $0xf0] sm:$0xff]  ;;  %v1989_v11 = vld [vmem:[%s2598_s1 + $0xe8] sm:$0xff] }
   0x5   :  { %1180 = vmatpush.bf16.msra.mxu3 %v1991_v3  ;;  %v1964_v12 = vld [vmem:[%s2598_s1 + $0x20] sm:$0xff]  ;;  %v1963_v16 = vld [vmem:[%s2598_s1 + $0x18] sm:$0xff]  ;;  %v1962_v20 = vld [vmem:[%s2598_s1 + $0x10] sm:$0xff] }
   0x6   :  { %1139 = vmatpush.bf16.msra.mxu0 %v1966_v4  ;;  %v1972_v13 = vld [vmem:[%s2598_s1 + $0x60] sm:$0xff]  ;;  %v1971_v17 = vld [vmem:[%s2598_s1 + $0x58] sm:$0xff]  ;;  %v1970_v21 = vld [vmem:[%s2598_s1 + $0x50] sm:$0xff] }
   0x7   :  { %1153 = vmatpush.bf16.msra.mxu1 %v1974_v5  ;;  %v1980_v14 = vld [vmem:[%s2598_s1 + $0xa0] sm:$0xff]  ;;  %v1979_v18 = vld [vmem:[%s2598_s1 + $0x98] sm:$0xff]  ;;  %v1978_v22 = vld [vmem:[%s2598_s1 + $0x90] sm:$0xff] }
   0x8   :  { %1167 = vmatpush.bf16.msra.mxu2 %v1982_v6  ;;  %v1988_v15 = vld [vmem:[%s2598_s1 + $0xe0] sm:$0xff]  ;;  %v1987_v19 = vld [vmem:[%s2598_s1 + $0xd8] sm:$0xff]  ;;  %v1986_v23 = vld [vmem:[%s2598_s1 + $0xd0] sm:$0xff] }
   0x9   :  { %1181 = vmatpush.bf16.msra.mxu3 %v1990_v7  ;;  %v1961_v24 = vld [vmem:[%s2598_s1 + $0x8] sm:$0xff]  ;;  %v1960_v28 = vld [vmem:[%s2598_s1] sm:$0xff]  ;;  %v1999_v32 = vld [vmem:[%s2598_s1 + $0x138] sm:$0xff] }
   0xa   :  { %1140 = vmatpush.bf16.msra.mxu0 %v1965_v8  ;;  %v1969_v25 = vld [vmem:[%s2598_s1 + $0x48] sm:$0xff]  ;;  %v1968_v29 = vld [vmem:[%s2598_s1 + $0x40] sm:$0xff]  ;;  %v2007_v33 = vld [vmem:[%s2598_s1 + $0x178] sm:$0xff] }
   0xb   :  { %1154 = vmatpush.bf16.msra.mxu1 %v1973_v9  ;;  %v1977_v26 = vld [vmem:[%s2598_s1 + $0x88] sm:$0xff]  ;;  %v1976_v30 = vld [vmem:[%s2598_s1 + $0x80] sm:$0xff]  ;;  %v2015_v42 = vld [vmem:[%s2598_s1 + $0x1b8] sm:$0xff] }
   0xc   :  { %1168 = vmatpush.bf16.msra.mxu2 %v1981_v10  ;;  %v1985_v27 = vld [vmem:[%s2598_s1 + $0xc8] sm:$0xff]  ;;  %v1984_v31 = vld [vmem:[%s2598_s1 + $0xc0] sm:$0xff]  ;;  %v2023_v43 = vld [vmem:[%s2598_s1 + $0x1f8] sm:$0xff] }
   0xd   :  { %1182 = vmatpush.bf16.msra.mxu3 %v1989_v11  ;;  %v1370_v34 = vld [vmem:[%s2600_s0] sm:$0xf]  ;;  %v1378_v36 = vld [vmem:[%s2600_s0 + $0x8] sm:$0xf]  ;;  %v1944_v38 = vld [vmem:[%s2600_s0 + $0x4] sm:$0xf] }
   0xe   :  { %1141 = vmatpush.bf16.msra.mxu0 %v1964_v12  ;;  %v1952_v35 = vld [vmem:[%s2600_s0 + $0x3c] sm:$0xf0]  ;;  %v1953_v37 = vld [vmem:[%s2600_s0 + $0x44] sm:$0xf0]  ;;  %v1372_v39 = vld [vmem:[%s2600_s0 + $0x40] sm:$0xf0] }
   0xf   :  { %1155 = vmatpush.bf16.msra.mxu1 %v1972_v13  ;;  %v1945_v40 = vld [vmem:[%s2600_s0 + $0xc] sm:$0xf]  ;;  %v1371_v44 = vor.u32 %v1952_v35, %v1370_v34  ;;  %v1379_v45 = vor.u32 %v1953_v37, %v1378_v36  ;;  %v1375_v46 = vor.u32 %v1944_v38, %v1372_v39  ;;  %v1998_v48 = vld [vmem:[%s2598_s1 + $0x130] sm:$0xff]  ;;  %v1996_v56 = vld [vmem:[%s2598_s1 + $0x120] sm:$0xff] }
  0x10   :  { %1169 = vmatpush.bf16.msra.mxu2 %v1980_v14  ;;  %v1380_v41 = vld [vmem:[%s2600_s0 + $0x48] sm:$0xf0]  ;;  %v2006_v49 = vld [vmem:[%s2598_s1 + $0x170] sm:$0xff]  ;;  %v2004_v57 = vld [vmem:[%s2598_s1 + $0x160] sm:$0xff] }
  0x11   :  { %1183 = vmatpush.bf16.msra.mxu3 %v1988_v15  ;;  %v1383_v47 = vor.u32 %v1945_v40, %v1380_v41  ;;  %v2014_v50 = vld [vmem:[%s2598_s1 + $0x1b0] sm:$0xff]  ;;  %v1997_v52 = vld [vmem:[%s2598_s1 + $0x128] sm:$0xff]  ;;  %v2012_v58 = vld [vmem:[%s2598_s1 + $0x1a0] sm:$0xff] }
  0x12   :  { %1142 = vmatpush.bf16.msra.mxu0 %v1963_v16  ;;  %v2022_v51 = vld [vmem:[%s2598_s1 + $0x1f0] sm:$0xff]  ;;  %v2005_v53 = vld [vmem:[%s2598_s1 + $0x168] sm:$0xff]  ;;  %v2020_v59 = vld [vmem:[%s2598_s1 + $0x1e0] sm:$0xff] }
  0x13   :  { %1156 = vmatpush.bf16.msra.mxu1 %v1971_v17  ;;  %v2013_v54 = vld [vmem:[%s2598_s1 + $0x1a8] sm:$0xff]  ;;  %v1995_v60 = vld [vmem:[%s2598_s1 + $0x118] sm:$0xff]  ;;  %v1994_v0 = vld [vmem:[%s2598_s1 + $0x110] sm:$0xff] }
  0x14   :  { %1170 = vmatpush.bf16.msra.mxu2 %v1979_v18  ;;  %v2021_v55 = vld [vmem:[%s2598_s1 + $0x1e8] sm:$0xff]  ;;  %v2003_v61 = vld [vmem:[%s2598_s1 + $0x158] sm:$0xff]  ;;  %v2002_v1 = vld [vmem:[%s2598_s1 + $0x150] sm:$0xff] }
  0x15   :  { %1184 = vmatpush.bf16.msra.mxu3 %v1987_v19  ;;  %v2011_v62 = vld [vmem:[%s2598_s1 + $0x198] sm:$0xff]  ;;  %v2010_v2 = vld [vmem:[%s2598_s1 + $0x190] sm:$0xff]  ;;  %v1993_v4 = vld [vmem:[%s2598_s1 + $0x108] sm:$0xff] }
  0x16   :  { %1143 = vmatpush.bf16.msra.mxu0 %v1962_v20  ;;  %v2019_v63 = vld [vmem:[%s2598_s1 + $0x1d8] sm:$0xff]  ;;  %v2018_v3 = vld [vmem:[%s2598_s1 + $0x1d0] sm:$0xff]  ;;  %v2001_v5 = vld [vmem:[%s2598_s1 + $0x148] sm:$0xff] }
  0x17   :  { %1157 = vmatpush.bf16.msra.mxu1 %v1970_v21  ;;  %v2009_v6 = vld [vmem:[%s2598_s1 + $0x188] sm:$0xff]  ;;  %v1992_v8 = vld [vmem:[%s2598_s1 + $0x100] sm:$0xff]  ;;  %v2031_v12 = vld [vmem:[%s2598_s1 + $0x238] sm:$0xff] }
  0x18   :  { %1171 = vmatpush.bf16.msra.mxu2 %v1978_v22  ;;  %v2017_v7 = vld [vmem:[%s2598_s1 + $0x1c8] sm:$0xff]  ;;  %v2000_v9 = vld [vmem:[%s2598_s1 + $0x140] sm:$0xff]  ;;  %v2039_v13 = vld [vmem:[%s2598_s1 + $0x278] sm:$0xff] }
  0x19   :  { %1185 = vmatpush.bf16.msra.mxu3 %v1986_v23  ;;  %v2008_v10 = vld [vmem:[%s2598_s1 + $0x180] sm:$0xff]  ;;  %v1386_v14 = vld [vmem:[%s2600_s0 + $0x10] sm:$0xf]  ;;  %v1394_v16 = vld [vmem:[%s2600_s0 + $0x18] sm:$0xf] }
  0x1a   :  { %1144 = vmatpush.bf16.msra.mxu0 %v1961_v24  ;;  %v2016_v11 = vld [vmem:[%s2598_s1 + $0x1c0] sm:$0xff]  ;;  %v1954_v15 = vld [vmem:[%s2600_s0 + $0x4c] sm:$0xf0]  ;;  %v1955_v17 = vld [vmem:[%s2600_s0 + $0x54] sm:$0xf0] }
  0x1b   :  { %1158 = vmatpush.bf16.msra.mxu1 %v1969_v25  ;;  %v1946_v18 = vld [vmem:[%s2600_s0 + $0x14] sm:$0xf]  ;;  %v1947_v20 = vld [vmem:[%s2600_s0 + $0x1c] sm:$0xf]  ;;  %v1387_v24 = vor.u32 %v1954_v15, %v1386_v14  ;;  %v1395_v25 = vor.u32 %v1955_v17, %v1394_v16  ;;  %v2045_v34 = vld [vmem:[%s2598_s1 + $0x2a8] sm:$0xff] }
  0x1c   :  { %1172 = vmatpush.bf16.msra.mxu2 %v1977_v26  ;;  %v1388_v19 = vld [vmem:[%s2600_s0 + $0x50] sm:$0xf0]  ;;  %v1396_v21 = vld [vmem:[%s2600_s0 + $0x58] sm:$0xf0]  ;;  %v2053_v35 = vld [vmem:[%s2598_s1 + $0x2e8] sm:$0xff] }
  0x1d   :  { %1186 = vmatpush.bf16.msra.mxu3 %v1985_v27  ;;  %v2047_v22 = vld [vmem:[%s2598_s1 + $0x2b8] sm:$0xff]  ;;  %v1391_v26 = vor.u32 %v1946_v18, %v1388_v19  ;;  %v1399_v27 = vor.u32 %v1947_v20, %v1396_v21  ;;  %v2028_v36 = vld [vmem:[%s2598_s1 + $0x220] sm:$0xff]  ;;  %v2077_v14 = vld [vmem:[%s2598_s1 + $0x3a8] sm:$0xff] }
  0x1e   :  { %1145 = vmatpush.bf16.msra.mxu0 %v1960_v28  ;;  %v2055_v23 = vld [vmem:[%s2598_s1 + $0x2f8] sm:$0xff]  ;;  %v2030_v28 = vld [vmem:[%s2598_s1 + $0x230] sm:$0xff]  ;;  %v2036_v37 = vld [vmem:[%s2598_s1 + $0x260] sm:$0xff] }
  0x1f   :  { %1159 = vmatpush.bf16.msra.mxu1 %v1968_v29  ;;  %v2038_v29 = vld [vmem:[%s2598_s1 + $0x270] sm:$0xff]  ;;  %v2044_v38 = vld [vmem:[%s2598_s1 + $0x2a0] sm:$0xff]  ;;  %v2027_v40 = vld [vmem:[%s2598_s1 + $0x218] sm:$0xff] }
  0x20   :  { %1173 = vmatpush.bf16.msra.mxu2 %v1976_v30  ;;  %v2046_v30 = vld [vmem:[%s2598_s1 + $0x2b0] sm:$0xff]  ;;  %v2052_v39 = vld [vmem:[%s2598_s1 + $0x2e0] sm:$0xff]  ;;  %v2035_v41 = vld [vmem:[%s2598_s1 + $0x258] sm:$0xff] }
  0x21   :  { %1187 = vmatpush.bf16.msra.mxu3 %v1984_v31  ;;  %1146 = vmatmul.bf16.vlgmr.msra.gmra.mxu0 %v1371_v44  ;;  %v2054_v31 = vld [vmem:[%s2598_s1 + $0x2f0] sm:$0xff]  ;;  %v2085_v15 = vld [vmem:[%s2598_s1 + $0x3e8] sm:$0xff]  ;;  %v2060_v16 = vld [vmem:[%s2598_s1 + $0x320] sm:$0xff] }
  0x22   :  { %1194 = vmatpush.bf16.msrb.mxu0 %v1999_v32  ;;  %1160 = vmatmul.bf16.vlgmr.msra.gmra.mxu1 %v1375_v46  ;;  %v2029_v32 = vld [vmem:[%s2598_s1 + $0x228] sm:$0xff]  ;;  %v2026_v44 = vld [vmem:[%s2598_s1 + $0x210] sm:$0xff]  ;;  %v2068_v17 = vld [vmem:[%s2598_s1 + $0x360] sm:$0xff] }
  0x23   :  { %1208 = vmatpush.bf16.msrb.mxu1 %v2007_v33  ;;  %1174 = vmatmul.bf16.vlgmr.msra.gmra.mxu2 %v1379_v45  ;;  %v2037_v33 = vld [vmem:[%s2598_s1 + $0x268] sm:$0xff]  ;;  %v2034_v45 = vld [vmem:[%s2598_s1 + $0x250] sm:$0xff]  ;;  %v2076_v18 = vld [vmem:[%s2598_s1 + $0x3a0] sm:$0xff] }
  0x24   :  { %1222 = vmatpush.bf16.msrb.mxu2 %v2015_v42  ;;  %1188 = vmatmul.bf16.vlgmr.msra.gmra.mxu3 %v1383_v47  ;;  %v2043_v42 = vld [vmem:[%s2598_s1 + $0x298] sm:$0xff]  ;;  %v2042_v46 = vld [vmem:[%s2598_s1 + $0x290] sm:$0xff]  ;;  %v2084_v19 = vld [vmem:[%s2598_s1 + $0x3e0] sm:$0xff] }
  0x25   :  { %1236 = vmatpush.bf16.msrb.mxu3 %v2023_v43  ;;  %v2051_v43 = vld [vmem:[%s2598_s1 + $0x2d8] sm:$0xff]  ;;  %v2050_v47 = vld [vmem:[%s2598_s1 + $0x2d0] sm:$0xff] }
  0x26   :  { %1195 = vmatpush.bf16.msrb.mxu0 %v1998_v48  ;;  %v2025_v48 = vld [vmem:[%s2598_s1 + $0x208] sm:$0xff]  ;;  %v2059_v20 = vld [vmem:[%s2598_s1 + $0x318] sm:$0xff] }
  0x27   :  { %1209 = vmatpush.bf16.msrb.mxu1 %v2006_v49  ;;  %v2033_v49 = vld [vmem:[%s2598_s1 + $0x248] sm:$0xff]  ;;  %v2067_v21 = vld [vmem:[%s2598_s1 + $0x358] sm:$0xff] }
  0x28   :  { %1223 = vmatpush.bf16.msrb.mxu2 %v2014_v50  ;;  %v2041_v50 = vld [vmem:[%s2598_s1 + $0x288] sm:$0xff] }
  0x29   :  { %1237 = vmatpush.bf16.msrb.mxu3 %v2022_v51  ;;  %v2049_v51 = vld [vmem:[%s2598_s1 + $0x2c8] sm:$0xff] }
  0x2a   :  { %1196 = vmatpush.bf16.msrb.mxu0 %v1997_v52  ;;  %v2024_v52 = vld [vmem:[%s2598_s1 + $0x200] sm:$0xff] }
  0x2b   :  { %1210 = vmatpush.bf16.msrb.mxu1 %v2005_v53  ;;  %v2032_v53 = vld [vmem:[%s2598_s1 + $0x240] sm:$0xff] }
  0x2c   :  { %1224 = vmatpush.bf16.msrb.mxu2 %v2013_v54  ;;  %v2040_v54 = vld [vmem:[%s2598_s1 + $0x280] sm:$0xff] }
  0x2d   :  { %1238 = vmatpush.bf16.msrb.mxu3 %v2021_v55  ;;  %v2048_v55 = vld [vmem:[%s2598_s1 + $0x2c0] sm:$0xff] }
  0x2e   :  { %1197 = vmatpush.bf16.msrb.mxu0 %v1996_v56  ;;  %v2063_v56 = vld [vmem:[%s2598_s1 + $0x338] sm:$0xff] }
  0x2f   :  { %1211 = vmatpush.bf16.msrb.mxu1 %v2004_v57  ;;  %v2071_v57 = vld [vmem:[%s2598_s1 + $0x378] sm:$0xff] }
  0x30   :  { %1225 = vmatpush.bf16.msrb.mxu2 %v2012_v58  ;;  %v1402_v58 = vld [vmem:[%s2600_s0 + $0x20] sm:$0xf] }
  0x31   :  { %1239 = vmatpush.bf16.msrb.mxu3 %v2020_v59  ;;  %v1956_v59 = vld [vmem:[%s2600_s0 + $0x5c] sm:$0xf0] }
  0x32   :  { %1198 = vmatpush.bf16.msrb.mxu0 %v1995_v60  ;;  %v1410_v60 = vld [vmem:[%s2600_s0 + $0x28] sm:$0xf] }
  0x33   :  { %1212 = vmatpush.bf16.msrb.mxu1 %v2003_v61  ;;  %v1957_v61 = vld [vmem:[%s2600_s0 + $0x64] sm:$0xf0] }
  0x34   :  { %1226 = vmatpush.bf16.msrb.mxu2 %v2011_v62  ;;  %v1948_v62 = vld [vmem:[%s2600_s0 + $0x24] sm:$0xf] }
  0x35   :  { %1240 = vmatpush.bf16.msrb.mxu3 %v2019_v63  ;;  %v1404_v63 = vld [vmem:[%s2600_s0 + $0x60] sm:$0xf0] }
  0x36   :  { %1199 = vmatpush.bf16.msrb.mxu0 %v1994_v0  ;;  %v1949_v0 = vld [vmem:[%s2600_s0 + $0x2c] sm:$0xf] }
  0x37   :  { %1213 = vmatpush.bf16.msrb.mxu1 %v2002_v1  ;;  %v1412_v1 = vld [vmem:[%s2600_s0 + $0x68] sm:$0xf0] }
  0x38   :  { %1227 = vmatpush.bf16.msrb.mxu2 %v2010_v2  ;;  %v2079_v2 = vld [vmem:[%s2598_s1 + $0x3b8] sm:$0xff] }
  0x39   :  { %1241 = vmatpush.bf16.msrb.mxu3 %v2018_v3  ;;  %v2087_v3 = vld [vmem:[%s2598_s1 + $0x3f8] sm:$0xff] }
  0x3a   :  { %1200 = vmatpush.bf16.msrb.mxu0 %v1993_v4  ;;  %v1403_v4 = vor.u32 %v1956_v59, %v1402_v58 }
  0x3b   :  { %1214 = vmatpush.bf16.msrb.mxu1 %v2001_v5  ;;  %v1411_v5 = vor.u32 %v1957_v61, %v1410_v60 }
  0x3c   :  { %1228 = vmatpush.bf16.msrb.mxu2 %v2009_v6  ;;  %v1407_v6 = vor.u32 %v1948_v62, %v1404_v63 }
  0x3d   :  { %1242 = vmatpush.bf16.msrb.mxu3 %v2017_v7  ;;  %v1415_v7 = vor.u32 %v1949_v0, %v1412_v1 }
  0x3e   :  { %1201 = vmatpush.bf16.msrb.mxu0 %v1992_v8  ;;  %v2062_v8 = vld [vmem:[%s2598_s1 + $0x330] sm:$0xff] }
  0x3f   :  { %1215 = vmatpush.bf16.msrb.mxu1 %v2000_v9  ;;  %v2070_v9 = vld [vmem:[%s2598_s1 + $0x370] sm:$0xff] }
  0x40   :  { %1229 = vmatpush.bf16.msrb.mxu2 %v2008_v10  ;;  %v2078_v10 = vld [vmem:[%s2598_s1 + $0x3b0] sm:$0xff] }
  0x41   :  { %1243 = vmatpush.bf16.msrb.mxu3 %v2016_v11  ;;  %1202 = vmatmul.bf16.vlgmr.msrb.gmra.mxu0 %v1387_v24  ;;  %v2086_v11 = vld [vmem:[%s2598_s1 + $0x3f0] sm:$0xff] }
  0x42   :  { %1250 = vmatpush.bf16.msra.mxu0 %v2031_v12  ;;  %1216 = vmatmul.bf16.vlgmr.msrb.gmra.mxu1 %v1391_v26  ;;  %v2061_v12 = vld [vmem:[%s2598_s1 + $0x328] sm:$0xff]  ;;  %v2058_v24 = vld [vmem:[%s2598_s1 + $0x310] sm:$0xff] }
  0x43   :  { %1264 = vmatpush.bf16.msra.mxu1 %v2039_v13  ;;  %1230 = vmatmul.bf16.vlgmr.msrb.gmra.mxu2 %v1395_v25  ;;  %v2069_v13 = vld [vmem:[%s2598_s1 + $0x368] sm:$0xff]  ;;  %v2066_v25 = vld [vmem:[%s2598_s1 + $0x350] sm:$0xff] }
  0x44   :  { %1278 = vmatpush.bf16.msra.mxu2 %v2047_v22  ;;  %1244 = vmatmul.bf16.vlgmr.msrb.gmra.mxu3 %v1399_v27  ;;  %v2075_v22 = vld [vmem:[%s2598_s1 + $0x398] sm:$0xff]  ;;  %v2074_v26 = vld [vmem:[%s2598_s1 + $0x390] sm:$0xff] }
  0x45   :  { %1292 = vmatpush.bf16.msra.mxu3 %v2055_v23  ;;  %v2083_v23 = vld [vmem:[%s2598_s1 + $0x3d8] sm:$0xff]  ;;  %v2082_v27 = vld [vmem:[%s2598_s1 + $0x3d0] sm:$0xff] }
  0x46   :  { %1251 = vmatpush.bf16.msra.mxu0 %v2030_v28  ;;  %v2057_v28 = vld [vmem:[%s2598_s1 + $0x308] sm:$0xff] }
  0x47   :  { %1265 = vmatpush.bf16.msra.mxu1 %v2038_v29  ;;  %v2065_v29 = vld [vmem:[%s2598_s1 + $0x348] sm:$0xff] }
  0x48   :  { %1279 = vmatpush.bf16.msra.mxu2 %v2046_v30  ;;  %v2073_v30 = vld [vmem:[%s2598_s1 + $0x388] sm:$0xff] }
  0x49   :  { %1293 = vmatpush.bf16.msra.mxu3 %v2054_v31  ;;  %v2081_v31 = vld [vmem:[%s2598_s1 + $0x3c8] sm:$0xff] }
  0x4a   :  { %1252 = vmatpush.bf16.msra.mxu0 %v2029_v32  ;;  %v2056_v32 = vld [vmem:[%s2598_s1 + $0x300] sm:$0xff] }
  0x4b   :  { %1266 = vmatpush.bf16.msra.mxu1 %v2037_v33  ;;  %v2064_v33 = vld [vmem:[%s2598_s1 + $0x340] sm:$0xff] }
  0x4c   :  { %1280 = vmatpush.bf16.msra.mxu2 %v2045_v34  ;;  %v2072_v34 = vld [vmem:[%s2598_s1 + $0x380] sm:$0xff] }
  0x4d   :  { %1294 = vmatpush.bf16.msra.mxu3 %v2053_v35  ;;  %v2080_v35 = vld [vmem:[%s2598_s1 + $0x3c0] sm:$0xff] }
  0x4e   :  { %1253 = vmatpush.bf16.msra.mxu0 %v2028_v36  ;;  %v1418_v36 = vld [vmem:[%s2600_s0 + $0x30] sm:$0xf] }
  0x4f   :  { %1267 = vmatpush.bf16.msra.mxu1 %v2036_v37  ;;  %v1958_v37 = vld [vmem:[%s2600_s0 + $0x6c] sm:$0xf0] }
  0x50   :  { %1281 = vmatpush.bf16.msra.mxu2 %v2044_v38  ;;  %v1950_v38 = vld [vmem:[%s2600_s0 + $0x34] sm:$0xf] }
  0x51   :  { %1295 = vmatpush.bf16.msra.mxu3 %v2052_v39  ;;  %v1420_v39 = vld [vmem:[%s2600_s0 + $0x70] sm:$0xf0] }
  0x52   :  { %1254 = vmatpush.bf16.msra.mxu0 %v2027_v40  ;;  %v1426_v40 = vld [vmem:[%s2600_s0 + $0x38] sm:$0xf] }
  0x53   :  { %1268 = vmatpush.bf16.msra.mxu1 %v2035_v41  ;;  %v1959_v41 = vld [vmem:[%s2600_s0 + $0x74] sm:$0xf0] }
  0x54   :  { %1282 = vmatpush.bf16.msra.mxu2 %v2043_v42  ;;  %v1951_v42 = vld [vmem:[%s2600_s0 + $0x3c] sm:$0xf] }
  0x55   :  { %1296 = vmatpush.bf16.msra.mxu3 %v2051_v43  ;;  %v1428_v43 = vld [vmem:[%s2600_s0 + $0x78] sm:$0xf0] }
  0x56   :  { %1255 = vmatpush.bf16.msra.mxu0 %v2026_v44  ;;  %v1419_v44 = vor.u32 %v1958_v37, %v1418_v36 }
  0x57   :  { %1269 = vmatpush.bf16.msra.mxu1 %v2034_v45  ;;  %v1423_v45 = vor.u32 %v1950_v38, %v1420_v39 }
  0x58   :  { %1283 = vmatpush.bf16.msra.mxu2 %v2042_v46  ;;  %v1427_v46 = vor.u32 %v1959_v41, %v1426_v40 }
  0x59   :  { %1297 = vmatpush.bf16.msra.mxu3 %v2050_v47  ;;  %v1431_v47 = vor.u32 %v1951_v42, %v1428_v43 }
  0x5a   :  { %1256 = vmatpush.bf16.msra.mxu0 %v2025_v48 }
  0x5b   :  { %1270 = vmatpush.bf16.msra.mxu1 %v2033_v49 }
  0x5c   :  { %1284 = vmatpush.bf16.msra.mxu2 %v2041_v50 }
  0x5d   :  { %1298 = vmatpush.bf16.msra.mxu3 %v2049_v51 }
  0x5e   :  { %1257 = vmatpush.bf16.msra.mxu0 %v2024_v52 }
  0x5f   :  { %1271 = vmatpush.bf16.msra.mxu1 %v2032_v53  ;;  %v2088_v53 = vld [vmem:[%s2599_s2] ss:$0 sm:$0xff] }
  0x60   :  { %1285 = vmatpush.bf16.msra.mxu2 %v2040_v54 }
  0x61   :  { %1299 = vmatpush.bf16.msra.mxu3 %v2048_v55  ;;  %1258 = vmatmul.bf16.vlgmr.msra.gmra.mxu0 %v1403_v4 }
  0x62   :  { %1306 = vmatpush.bf16.msrb.mxu0 %v2063_v56  ;;  %1272 = vmatmul.bf16.vlgmr.msra.gmra.mxu1 %v1407_v6 }
  0x63   :  { %1320 = vmatpush.bf16.msrb.mxu1 %v2071_v57  ;;  %1286 = vmatmul.bf16.vlgmr.msra.gmra.mxu2 %v1411_v5 }
  0x64   :  { %1334 = vmatpush.bf16.msrb.mxu2 %v2079_v2  ;;  %1300 = vmatmul.bf16.vlgmr.msra.gmra.mxu3 %v1415_v7 }
  0x65   :  { %1348 = vmatpush.bf16.msrb.mxu3 %v2087_v3 }
  0x66   :  { %1307 = vmatpush.bf16.msrb.mxu0 %v2062_v8 }
  0x67   :  { %1321 = vmatpush.bf16.msrb.mxu1 %v2070_v9 }
  0x68   :  { %1335 = vmatpush.bf16.msrb.mxu2 %v2078_v10 }
  0x69   :  { %1349 = vmatpush.bf16.msrb.mxu3 %v2086_v11 }
  0x6a   :  { %1308 = vmatpush.bf16.msrb.mxu0 %v2061_v12 }
  0x6b   :  { %1322 = vmatpush.bf16.msrb.mxu1 %v2069_v13 }
  0x6c   :  { %1336 = vmatpush.bf16.msrb.mxu2 %v2077_v14 }
  0x6d   :  { %1350 = vmatpush.bf16.msrb.mxu3 %v2085_v15 }
  0x6e   :  { %1309 = vmatpush.bf16.msrb.mxu0 %v2060_v16 }
  0x6f   :  { %1323 = vmatpush.bf16.msrb.mxu1 %v2068_v17 }
  0x70   :  { %1337 = vmatpush.bf16.msrb.mxu2 %v2076_v18 }
  0x71   :  { %1351 = vmatpush.bf16.msrb.mxu3 %v2084_v19 }
  0x72   :  { %1310 = vmatpush.bf16.msrb.mxu0 %v2059_v20 }
  0x73   :  { %1324 = vmatpush.bf16.msrb.mxu1 %v2067_v21 }
  0x74   :  { %1338 = vmatpush.bf16.msrb.mxu2 %v2075_v22 }
  0x75   :  { %1352 = vmatpush.bf16.msrb.mxu3 %v2083_v23 }
  0x76   :  { %1311 = vmatpush.bf16.msrb.mxu0 %v2058_v24 }
  0x77   :  { %1325 = vmatpush.bf16.msrb.mxu1 %v2066_v25 }
  0x78   :  { %1339 = vmatpush.bf16.msrb.mxu2 %v2074_v26 }
  0x79   :  { %1353 = vmatpush.bf16.msrb.mxu3 %v2082_v27 }
  0x7a   :  { %1312 = vmatpush.bf16.msrb.mxu0 %v2057_v28 }
  0x7b   :  { %1326 = vmatpush.bf16.msrb.mxu1 %v2065_v29 }
  0x7c   :  { %1340 = vmatpush.bf16.msrb.mxu2 %v2073_v30 }
  0x7d   :  { %1354 = vmatpush.bf16.msrb.mxu3 %v2081_v31 }
  0x7e   :  { %1313 = vmatpush.bf16.msrb.mxu0 %v2056_v32 }
  0x7f   :  { %1327 = vmatpush.bf16.msrb.mxu1 %v2064_v33 }
  0x80   :  { %1341 = vmatpush.bf16.msrb.mxu2 %v2072_v34 }
  0x81   :  { %1355 = vmatpush.bf16.msrb.mxu3 %v2080_v35  ;;  %1314 = vmatmul.bf16.vlgmr.msrb.gmra.mxu0 %v1419_v44 }
  0x82   :  { %1328 = vmatmul.bf16.vlgmr.msrb.gmra.mxu1 %v1423_v45 }
  0x83   :  { %1342 = vmatmul.bf16.vlgmr.msrb.gmra.mxu2 %v1427_v46 }
  0x84   :  { %1356 = vmatmul.bf16.vlgmr.msrb.gmra.mxu3 %v1431_v47 }
  0x9e   :  { %v1147_v48 = vpop.f32.mrf.mxu0 }
  0x9f   :  { %v1161_v49 = vpop.f32.mrf.mxu1  ;;  %v1148_v55 = vadd.f32 %v2088_v53, %v1147_v48 }
  0xa1   :  { %v1162_v58 = vadd.f32 %v1161_v49, %v1148_v55 }
  0xa6   :  { %v1175_v50 = vpop.f32.mrf.mxu2  ;;  %v1149_v52 = vpop.f32.mrf.mxu0 }
  0xa7   :  { %v1189_v51 = vpop.f32.mrf.mxu3  ;;  %v1163_v54 = vpop.f32.mrf.mxu1  ;;  %v1176_v61 = vadd.f32 %v1175_v50, %v1162_v58  ;;  %v1150_v62 = vadd.f32 %v2088_v53, %v1149_v52 }
  0xa9   :  { %v1190_v1 = vadd.f32 %v1189_v51, %v1176_v61  ;;  %v1164_v2 = vadd.f32 %v1163_v54, %v1150_v62 }
  0xae   :  { %v1177_v56 = vpop.f32.mrf.mxu2 }
  0xaf   :  { %v1191_v57 = vpop.f32.mrf.mxu3  ;;  %v1178_v6 = vadd.f32 %v1177_v56, %v1164_v2 }
  0xb1   :  { %v1192_v10 = vadd.f32 %v1191_v57, %v1178_v6 }
  0xbe   :  { %v1203_v59 = vpop.f32.mrf.mxu0 }
  0xbf   :  { %v1217_v60 = vpop.f32.mrf.mxu1  ;;  %v1204_v4 = vadd.f32 %v1203_v59, %v1190_v1 }
  0xc1   :  { %v1218_v7 = vadd.f32 %v1217_v60, %v1204_v4 }
  0xc6   :  { %v1231_v63 = vpop.f32.mrf.mxu2  ;;  %v1205_v3 = vpop.f32.mrf.mxu0 }
  0xc7   :  { %v1245_v0 = vpop.f32.mrf.mxu3  ;;  %v1219_v5 = vpop.f32.mrf.mxu1  ;;  %v1232_v12 = vadd.f32 %v1231_v63, %v1218_v7  ;;  %v1206_v14 = vadd.f32 %v1205_v3, %v1192_v10 }
  0xc9   :  { %v1246_v15 = vadd.f32 %v1245_v0, %v1232_v12  ;;  %v1220_v18 = vadd.f32 %v1219_v5, %v1206_v14 }
  0xce   :  { %v1233_v8 = vpop.f32.mrf.mxu2 }
  0xcf   :  { %v1247_v9 = vpop.f32.mrf.mxu3  ;;  %v1234_v20 = vadd.f32 %v1233_v8, %v1220_v18 }
  0xd1   :  { %v1248_v24 = vadd.f32 %v1247_v9, %v1234_v20 }
  0xde   :  { %v1259_v11 = vpop.f32.mrf.mxu0 }
  0xdf   :  { %v1273_v13 = vpop.f32.mrf.mxu1  ;;  %v1260_v19 = vadd.f32 %v1259_v11, %v1246_v15 }
  0xe1   :  { %v1274_v22 = vadd.f32 %v1273_v13, %v1260_v19 }
  0xe6   :  { %v1287_v16 = vpop.f32.mrf.mxu2  ;;  %v1261_v21 = vpop.f32.mrf.mxu0 }
  0xe7   :  { %v1301_v17 = vpop.f32.mrf.mxu3  ;;  %v1275_v23 = vpop.f32.mrf.mxu1  ;;  %v1288_v25 = vadd.f32 %v1287_v16, %v1274_v22  ;;  %v1262_v26 = vadd.f32 %v1261_v21, %v1248_v24 }
  0xe9   :  { %v1302_v29 = vadd.f32 %v1301_v17, %v1288_v25  ;;  %v1276_v31 = vadd.f32 %v1275_v23, %v1262_v26 }
  0xee   :  { %v1289_v27 = vpop.f32.mrf.mxu2 }
  0xef   :  { %v1303_v28 = vpop.f32.mrf.mxu3  ;;  %v1290_v34 = vadd.f32 %v1289_v27, %v1276_v31 }
  0xf1   :  { %v1304_v38 = vadd.f32 %v1303_v28, %v1290_v34 }
  0xfe   :  { %v1315_v30 = vpop.f32.mrf.mxu0 }
  0xff   :  { %v1316_v32 = vadd.f32 %v1315_v30, %v1302_v29  ;;  %v1329_v33 = vpop.f32.mrf.mxu1 }
 0x101   :  { %v1330_v35 = vadd.f32 %v1329_v33, %v1316_v32 }
 0x106   :  { %v1343_v36 = vpop.f32.mrf.mxu2  ;;  %v1317_v40 = vpop.f32.mrf.mxu0 }
 0x107   :  { %v1357_v37 = vpop.f32.mrf.mxu3  ;;  %v1344_v39 = vadd.f32 %v1343_v36, %v1330_v35  ;;  %v1318_v42 = vadd.f32 %v1317_v40, %v1304_v38  ;;  %v1331_v43 = vpop.f32.mrf.mxu1 }
 0x109   :  { %v1358_v41 = vadd.f32 %v1357_v37, %v1344_v39  ;;  %v1332_v44 = vadd.f32 %v1331_v43, %v1318_v42 }
 0x10b   :  { %1362 = vst [vmem:[%s2601_s3] sm:$0xff] %v1358_v41 }
 0x10e   :  { %v1345_v45 = vpop.f32.mrf.mxu2 }
 0x10f   :  { %v1346_v46 = vadd.f32 %v1345_v45, %v1332_v44  ;;  %v1359_v47 = vpop.f32.mrf.mxu3 }
 0x111   :  { %v1360_v48 = vadd.f32 %v1359_v47, %v1346_v46 }
 0x113   :  { %1363 = vst [vmem:[%s2601_s3 + $0x8] sm:$0xff] %v1360_v48 }

</bundles_post_ra>
